<compile_context>
chip_gen: v7x
topology: tpu7x:2x2x1
jax: 0.10.0
libtpu: 0.0.40
codegen_flags: <defaults>
</compile_context>

<pallas_src>
import functools
import math

import jax
import jax.numpy as jnp
from jax.experimental import pallas as pl
from jax.experimental.pallas import tpu as pltpu


# ------------------------------ tiling helper --------------------------------

def _pick_tile(dim, target):
    """Largest divisor of `dim` that is <= target (full dim if dim <= target)."""
    if dim <= target:
        return dim
    for t in range(target, 0, -1):
        if dim % t == 0:
            return t
    return dim


# ------------------------------ Pallas kernels --------------------------------

def _matmul_bias_kernel(x_ref, w_ref, b_ref, o_ref, acc_ref):
    """o = x @ w + b; grid (M/tm, N/tn, K/tk); K is a reduction axis."""
    @pl.when(pl.program_id(2) == 0)
    def _():
        acc_ref[...] = jnp.zeros_like(acc_ref)

    acc_ref[...] += jnp.dot(x_ref[...], w_ref[...],
                            preferred_element_type=jnp.float32)

    @pl.when(pl.program_id(2) == pl.num_programs(2) - 1)
    def _():
        o_ref[...] = (acc_ref[...] + b_ref[...]).astype(o_ref.dtype)


def _matmul_bias_kernel_single_k(x_ref, w_ref, b_ref, o_ref):
    """Fast path when K fits one tile: no accumulator scratch needed."""
    o_ref[...] = (jnp.dot(x_ref[...], w_ref[...],
                          preferred_element_type=jnp.float32)
                  + b_ref[...]).astype(o_ref.dtype)


def linear(x, w, b, *, out_dtype=jnp.float32, tm=256, tn=256, tk=512):
    """y = x @ w + b for x of shape (..., K); bf16 MXU operands, f32 accum."""
    orig_shape = x.shape
    K = orig_shape[-1]
    N = w.shape[1]
    x2 = x.reshape(-1, K).astype(jnp.bfloat16)
    w_b = w.astype(jnp.bfloat16)
    b_f = b.astype(jnp.float32).reshape(1, N)
    M = x2.shape[0]
    tm = _pick_tile(M, tm)
    tn = _pick_tile(N, tn)
    tk = _pick_tile(K, tk)

    if K // tk == 1:
        out = pl.pallas_call(
            _matmul_bias_kernel_single_k,
            out_shape=jax.ShapeDtypeStruct((M, N), out_dtype),
            grid=(M // tm, N // tn),
            in_specs=[
                pl.BlockSpec((tm, K), lambda i, j: (i, 0)),
                pl.BlockSpec((K, tn), lambda i, j: (0, j)),
                pl.BlockSpec((1, tn), lambda i, j: (0, j)),
            ],
            out_specs=pl.BlockSpec((tm, tn), lambda i, j: (i, j)),
            compiler_params=pltpu.CompilerParams(
                dimension_semantics=("parallel", "parallel")),
        )(x2, w_b, b_f)
    else:
        out = pl.pallas_call(
            _matmul_bias_kernel,
            out_shape=jax.ShapeDtypeStruct((M, N), out_dtype),
            grid=(M // tm, N // tn, K // tk),
            in_specs=[
                pl.BlockSpec((tm, tk), lambda i, j, k: (i, k)),
                pl.BlockSpec((tk, tn), lambda i, j, k: (k, j)),
                pl.BlockSpec((1, tn), lambda i, j, k: (0, j)),
            ],
            out_specs=pl.BlockSpec((tm, tn), lambda i, j, k: (i, j)),
            scratch_shapes=[pltpu.VMEM((tm, tn), jnp.float32)],
            compiler_params=pltpu.CompilerParams(
                dimension_semantics=("parallel", "parallel", "arbitrary")),
        )(x2, w_b, b_f)
    return out.reshape(orig_shape[:-1] + (N,))


def _proj_add_ln_kernel(x_ref, w_ref, b_ref, r_ref, g_ref, bt_ref, o_ref, *, eps):
    """o = LayerNorm(x @ w + b + residual); matmul bf16, LN in f32."""
    h = jnp.dot(x_ref[...], w_ref[...],
                preferred_element_type=jnp.float32) + b_ref[...]
    h = h + r_ref[...]
    mu = jnp.mean(h, axis=-1, keepdims=True)
    var = jnp.mean(jnp.square(h - mu), axis=-1, keepdims=True)
    o_ref[...] = ((h - mu) * jax.lax.rsqrt(var + eps) * g_ref[...]
                  + bt_ref[...]).astype(o_ref.dtype)


def proj_add_ln(x_bf, w, b, res, gamma, beta, eps=1e-5, tm=256):
    """Fused attention output projection + residual add + LayerNorm."""
    D = x_bf.shape[-1]
    N = w.shape[1]
    x2 = x_bf.reshape(-1, D).astype(jnp.bfloat16)
    r2 = res.reshape(-1, N).astype(jnp.float32)
    M = x2.shape[0]
    tm = _pick_tile(M, tm)
    out = pl.pallas_call(
        functools.partial(_proj_add_ln_kernel, eps=eps),
        out_shape=jax.ShapeDtypeStruct((M, N), jnp.float32),
        grid=(M // tm,),
        in_specs=[
            pl.BlockSpec((tm, D), lambda i: (i, 0)),
            pl.BlockSpec((D, N), lambda i: (0, 0)),
            pl.BlockSpec((1, N), lambda i: (0, 0)),
            pl.BlockSpec((tm, N), lambda i: (i, 0)),
            pl.BlockSpec((1, N), lambda i: (0, 0)),
            pl.BlockSpec((1, N), lambda i: (0, 0)),
        ],
        out_specs=pl.BlockSpec((tm, N), lambda i: (i, 0)),
        compiler_params=pltpu.CompilerParams(dimension_semantics=("parallel",)),
    )(x2, w.astype(jnp.bfloat16), b.astype(jnp.float32).reshape(1, N),
      r2, gamma.astype(jnp.float32).reshape(1, N),
      beta.astype(jnp.float32).reshape(1, N))
    return out.reshape(res.shape)


def _ffn_add_ln_kernel(x_ref, w1_ref, b1_ref, w2_ref, b2_ref, g_ref, bt_ref,
                       o_ref, *, eps):
    """o = LayerNorm(relu(x@W1+b1)@W2+b2 + x); bf16 MXU operands, f32 LN."""
    x = x_ref[...]                                   # (tm, D) f32 (residual)
    xb = x.astype(jnp.bfloat16)
    h = jnp.dot(xb, w1_ref[...],
                preferred_element_type=jnp.float32) + b1_ref[...]
    h = jnp.maximum(h, 0.0).astype(jnp.bfloat16)
    y = jnp.dot(h, w2_ref[...],
                preferred_element_type=jnp.float32) + b2_ref[...]
    y = y + x
    mu = jnp.mean(y, axis=-1, keepdims=True)
    var = jnp.mean(jnp.square(y - mu), axis=-1, keepdims=True)
    o_ref[...] = ((y - mu) * jax.lax.rsqrt(var + eps) * g_ref[...]
                  + bt_ref[...]).astype(o_ref.dtype)


def ffn_add_ln(x, w1, b1, w2, b2, gamma, beta, eps=1e-5, tm=256):
    """Fused position-wise FFN + residual add + LayerNorm, tiled over rows."""
    D = x.shape[-1]
    F = w1.shape[1]
    x2 = x.reshape(-1, D).astype(jnp.float32)
    M = x2.shape[0]
    tm = _pick_tile(M, tm)
    out = pl.pallas_call(
        functools.partial(_ffn_add_ln_kernel, eps=eps),
        out_shape=jax.ShapeDtypeStruct((M, D), jnp.float32),
        grid=(M // tm,),
        in_specs=[
            pl.BlockSpec((tm, D), lambda i: (i, 0)),
            pl.BlockSpec((D, F), lambda i: (0, 0)),
            pl.BlockSpec((1, F), lambda i: (0, 0)),
            pl.BlockSpec((F, D), lambda i: (0, 0)),
            pl.BlockSpec((1, D), lambda i: (0, 0)),
            pl.BlockSpec((1, D), lambda i: (0, 0)),
            pl.BlockSpec((1, D), lambda i: (0, 0)),
        ],
        out_specs=pl.BlockSpec((tm, D), lambda i: (i, 0)),
        compiler_params=pltpu.CompilerParams(dimension_semantics=("parallel",)),
    )(x2, w1.astype(jnp.bfloat16), b1.astype(jnp.float32).reshape(1, F),
      w2.astype(jnp.bfloat16), b2.astype(jnp.float32).reshape(1, D),
      gamma.astype(jnp.float32).reshape(1, D),
      beta.astype(jnp.float32).reshape(1, D))
    return out.reshape(x.shape)


def _mha_kernel(lens_ref, q_ref, kv_ref, o_ref, *, n_heads, causal, scale):
    """Multi-head attention for one batch element.

    q_ref: (Tq, D) bf16, kv_ref: (Tk, 2D) bf16 ([K|V] fused along lanes).
    Length / causal masks are built in-kernel from the scalar-prefetched
    per-batch key length (True == masked, matching the torch bool masks).
    Output store is lane-dense over D = n_heads * dh.
    """
    b = pl.program_id(0)
    kv_len = lens_ref[b]
    q = q_ref[...] * scale                  # fold 1/sqrt(dh) into q once
    kv = kv_ref[...]
    Tq, D = q.shape
    Tk = kv.shape[0]
    dh = D // n_heads

    kv_idx = jax.lax.broadcasted_iota(jnp.int32, (Tq, Tk), 1)
    mask = kv_idx >= kv_len
    if causal:
        q_idx = jax.lax.broadcasted_iota(jnp.int32, (Tq, Tk), 0)
        mask = jnp.logical_or(mask, kv_idx > q_idx)

    outs = []
    for h in range(n_heads):
        qh = q[:, h * dh:(h + 1) * dh]                     # (Tq, dh)
        kh = kv[:, h * dh:(h + 1) * dh]                    # (Tk, dh)
        vh = kv[:, D + h * dh:D + (h + 1) * dh]            # (Tk, dh)
        s = jax.lax.dot_general(qh, kh, (((1,), (1,)), ((), ())),
                                preferred_element_type=jnp.float32)  # (Tq, Tk)
        s = jnp.where(mask, -1e9, s)                       # mask in f32 scores
        m = jnp.max(s, axis=-1, keepdims=True)
        p = jnp.exp(s - m)
        denom = jnp.sum(p, axis=-1, keepdims=True)
        p = p * pl.reciprocal(denom, approx=True)          # EUP, free slot
        outs.append(jnp.dot(p.astype(vh.dtype), vh,
                            preferred_element_type=jnp.float32))
    o_ref[...] = jnp.concatenate(outs, axis=-1).astype(o_ref.dtype)


def mha_core(q, kv, kv_lens, *, n_heads, causal):
    """q: (B, Tq, D) bf16, kv: (B, Tk, 2D) bf16, kv_lens: (B,) int32."""
    B, Tq, D = q.shape
    Tk = kv.shape[1]
    scale = 1.0 / math.sqrt(D // n_heads)
    kernel = functools.partial(_mha_kernel, n_heads=n_heads, causal=causal,
                               scale=scale)
    return pl.pallas_call(
        kernel,
        out_shape=jax.ShapeDtypeStruct((B, Tq, D), jnp.bfloat16),
        grid_spec=pltpu.PrefetchScalarGridSpec(
            num_scalar_prefetch=1,
            grid=(B,),
            in_specs=[
                pl.BlockSpec((None, Tq, D), lambda b, lens: (b, 0, 0)),
                pl.BlockSpec((None, Tk, 2 * D), lambda b, lens: (b, 0, 0)),
            ],
            out_specs=pl.BlockSpec((None, Tq, D), lambda b, lens: (b, 0, 0)),
        ),
        compiler_params=pltpu.CompilerParams(dimension_semantics=("parallel",)),
    )(kv_lens.astype(jnp.int32), q.astype(jnp.bfloat16),
      kv.astype(jnp.bfloat16))


# ------------------------------ model blocks ----------------------------------

def self_attention_block(x, kv_lens, p, ln_g, ln_b, *, n_heads, causal):
    """x: (B, T, D) f32. Fused QKV proj -> MHA -> fused out-proj+add+LN."""
    D = x.shape[-1]
    qkv = linear(x, p["wqkv"], p["bqkv"], out_dtype=jnp.bfloat16)  # (B,T,3D)
    q = qkv[..., :D]
    kv = qkv[..., D:]
    attn = mha_core(q, kv, kv_lens, n_heads=n_heads, causal=causal)
    return proj_add_ln(attn, p["wo"], p["bo"], x, ln_g, ln_b)


def cross_attention_block(y, enc_out, feat_lens, p, ln_g, ln_b, *, n_heads):
    q = linear(y, p["wq"], p["bq"], out_dtype=jnp.bfloat16)          # (B,L,D)
    kv = linear(enc_out, p["wkv"], p["bkv"], out_dtype=jnp.bfloat16)  # (B,T,2D)
    attn = mha_core(q, kv, feat_lens, n_heads=n_heads, causal=False)
    return proj_add_ln(attn, p["wo"], p["bo"], y, ln_g, ln_b)


def sinusoidal_pe(max_len, d_model):
    pos = jnp.arange(max_len, dtype=jnp.float32)[:, None]
    i = jnp.arange(d_model // 2, dtype=jnp.float32)[None, :]
    angle = pos / jnp.power(10000.0, 2.0 * i / d_model)
    pe = jnp.zeros((max_len, d_model), jnp.float32)
    pe = pe.at[:, 0::2].set(jnp.sin(angle))
    pe = pe.at[:, 1::2].set(jnp.cos(angle))
    return pe


def init_params(key, n_mels, d_model, d_ff, vocab):
    ks = iter(jax.random.split(key, 40))

    def dense(fan_in, fan_out, dtype=jnp.bfloat16):
        w = (0.02 * jax.random.normal(next(ks), (fan_in, fan_out),
                                      jnp.float32)).astype(dtype)
        return w, jnp.zeros((fan_out,), jnp.float32)

    def self_attn_params():
        wqkv, bqkv = dense(d_model, 3 * d_model)
        wo, bo = dense(d_model, d_model)
        return dict(wqkv=wqkv, bqkv=bqkv, wo=wo, bo=bo)

    def cross_attn_params():
        wq, bq = dense(d_model, d_model)
        wkv, bkv = dense(d_model, 2 * d_model)
        wo, bo = dense(d_model, d_model)
        return dict(wq=wq, bq=bq, wkv=wkv, bkv=bkv, wo=wo, bo=bo)

    fw, fb = dense(n_mels, d_model)
    e_w1, e_b1 = dense(d_model, d_ff)
    e_w2, e_b2 = dense(d_ff, d_model)
    d_w1, d_b1 = dense(d_model, d_ff)
    d_w2, d_b2 = dense(d_ff, d_model)
    out_w, out_b = dense(d_model, vocab)
    embed = 0.02 * jax.random.normal(next(ks), (vocab, d_model), jnp.float32)

    ones = jnp.ones((d_model,), jnp.float32)
    zeros = jnp.zeros((d_model,), jnp.float32)
    return {
        "frontend": {"w": fw, "b": fb},
        "encoder": {
            "attn": self_attn_params(),
            "ln1_g": ones, "ln1_b": zeros,
            "ffn_w1": e_w1, "ffn_b1": e_b1, "ffn_w2": e_w2, "ffn_b2": e_b2,
            "ln2_g": ones, "ln2_b": zeros,
        },
        "decoder": {
            "embed": embed,
            "self_attn": self_attn_params(),
            "ln1_g": ones, "ln1_b": zeros,
            "cross_attn": cross_attn_params(),
            "ln2_g": ones, "ln2_b": zeros,
            "ffn_w1": d_w1, "ffn_b1": d_b1, "ffn_w2": d_w2, "ffn_b2": d_b2,
            "ln3_g": ones, "ln3_b": zeros,
        },
        "out_w": out_w, "out_b": out_b,
    }


def transformer_forward(params, fbank, feat_lens, labels, *, n_heads):
    """Mirrors Transformer.forward: frontend -> enc(mask) -> dec(masks) -> linear.

    Masks are never materialized; feat_lens (and the causal structure) are
    applied inside the attention kernels, matching the torch bool-mask
    semantics (key >= feat_len masked; key > query masked for the decoder).
    """
    B = fbank.shape[0]
    L = labels.shape[1]
    feat_lens = feat_lens.astype(jnp.int32)

    # feat_frontend (here: dense projection of fbank features to d_model)
    feature_out = linear(fbank, params["frontend"]["w"], params["frontend"]["b"])
    max_feat_len = feature_out.shape[1]
    d_model = feature_out.shape[-1]

    # encoder (1 layer, post-LN) — enc_mask == length mask on keys
    enc = params["encoder"]
    x = feature_out + sinusoidal_pe(max_feat_len, d_model)[None]
    x = self_attention_block(x, feat_lens, enc["attn"], enc["ln1_g"],
                             enc["ln1_b"], n_heads=n_heads, causal=False)
    enc_out = ffn_add_ln(x, enc["ffn_w1"], enc["ffn_b1"], enc["ffn_w2"],
                         enc["ffn_b2"], enc["ln2_g"], enc["ln2_b"])

    # decoder (1 layer): masked self-attn (causal) + cross-attn (len mask) + FFN
    dec = params["decoder"]
    emb = jnp.take(dec["embed"], labels, axis=0)
    y = emb + sinusoidal_pe(L, d_model)[None]
    full_lens = jnp.full((B,), L, dtype=jnp.int32)
    y = self_attention_block(y, full_lens, dec["self_attn"], dec["ln1_g"],
                             dec["ln1_b"], n_heads=n_heads, causal=True)
    y = cross_attention_block(y, enc_out, feat_lens, dec["cross_attn"],
                              dec["ln2_g"], dec["ln2_b"], n_heads=n_heads)
    dec_out = ffn_add_ln(y, dec["ffn_w1"], dec["ffn_b1"], dec["ffn_w2"],
                         dec["ffn_b2"], dec["ln3_g"], dec["ln3_b"])

    # final vocab projection (the Transformer wrapper's own nn.Linear)
    logits = linear(dec_out, params["out_w"], params["out_b"])
    return logits


if __name__ == "__main__":
    B, T, n_mels = 2, 16, 8          # fbank: (batch, frames, mel-bins)
    d_model, n_heads, d_ff = 32, 4, 64
    L, vocab = 8, 16                 # label seq length, vocab size

    key = jax.random.PRNGKey(0)
    k_feat, k_lab, k_param = jax.random.split(key, 3)

    fbank_feature = jax.random.normal(k_feat, (B, T, n_mels), jnp.float32)
    feat_lens = jnp.array([T, T - 4], dtype=jnp.int32)
    labels = jax.random.randint(k_lab, (B, L), 0, vocab, dtype=jnp.int32)

    params = init_params(k_param, n_mels, d_model, d_ff, vocab)

    fwd = jax.jit(functools.partial(transformer_forward, n_heads=n_heads))
    logits = fwd(params, fbank_feature, feat_lens, labels)
    jax.block_until_ready(logits)

    assert logits.shape == (B, L, vocab), logits.shape
    assert bool(jnp.all(jnp.isfinite(logits)))
    print("KERNEL_OK")
</pallas_src>

<mosaic_0001>
module attributes {stable_mosaic.version = 11 : i64} {
  func.func @_matmul_bias_kernel_single_k(%arg0: i32, %arg1: i32, %arg2: memref<16x32xbf16, #tpu.memory_space<vmem>>, %arg3: memref<32x96xbf16, #tpu.memory_space<vmem>>, %arg4: memref<1x96xf32, #tpu.memory_space<vmem>>, %arg5: memref<16x96xbf16, #tpu.memory_space<vmem>>) attributes {dimension_semantics = [#tpu.dimension_semantics<parallel>, #tpu.dimension_semantics<parallel>], iteration_bounds = array<i64: 1, 1>, scalar_prefetch = 0 : i64, scratch_operands = 0 : i64, tpu.core_type = #tpu.core_type<tc>, window_params = [{transform_indices = @transform_0, window_bounds = array<i64: 16, 32>}, {transform_indices = @transform_1, window_bounds = array<i64: 32, 96>}, {transform_indices = @transform_2, window_bounds = array<i64: 1, 96>}, {transform_indices = @transform_3, window_bounds = array<i64: 16, 96>}]} {
    %c0 = arith.constant 0 : index
    %c0_0 = arith.constant 0 : index
    %0 = vector.load %arg2[%c0, %c0_0] : memref<16x32xbf16, #tpu.memory_space<vmem>>, vector<16x32xbf16>
    %c0_1 = arith.constant 0 : index
    %c0_2 = arith.constant 0 : index
    %1 = vector.load %arg3[%c0_1, %c0_2] : memref<32x96xbf16, #tpu.memory_space<vmem>>, vector<32x96xbf16>
    %cst = arith.constant dense<0.000000e+00> : vector<16x96xf32>
    %2 = tpu.matmul %0, %1, %cst {dimension_numbers = #tpu.dot_dimension_numbers<[1], [0], [0], [1], [0, 0, 1, 1], [], []>} : vector<16x32xbf16>, vector<32x96xbf16>, vector<16x96xf32> -> vector<16x96xf32>
    %c0_3 = arith.constant 0 : index
    %c0_4 = arith.constant 0 : index
    %3 = vector.load %arg4[%c0_3, %c0_4] : memref<1x96xf32, #tpu.memory_space<vmem>>, vector<1x96xf32>
    %4 = vector.broadcast %3 : vector<1x96xf32> to vector<16x96xf32>
    %5 = arith.addf %2, %4 : vector<16x96xf32>
    %6 = arith.truncf %5 : vector<16x96xf32> to vector<16x96xbf16>
    %c0_5 = arith.constant 0 : index
    %c0_6 = arith.constant 0 : index
    %7 = vector.load %arg5[%c0_5, %c0_6] : memref<16x96xbf16, #tpu.memory_space<vmem>>, vector<16x96xbf16>
    tpu.vector_store %arg5[%c0_5, %c0_6], %6 {strides = array<i32>} : memref<16x96xbf16, #tpu.memory_space<vmem>>, vector<16x96xbf16>,
    return
  }
  func.func @transform_0(%arg0: i32, %arg1: i32) -> (i32, i32) {
    %c0_i32 = arith.constant 0 : i32
    %c0_i32_0 = arith.constant 0 : i32
    return %arg0, %c0_i32 : i32, i32
  }
  func.func @transform_1(%arg0: i32, %arg1: i32) -> (i32, i32) {
    %c0_i32 = arith.constant 0 : i32
    %c0_i32_0 = arith.constant 0 : i32
    return %c0_i32, %arg1 : i32, i32
  }
  func.func @transform_2(%arg0: i32, %arg1: i32) -> (i32, i32) {
    %c0_i32 = arith.constant 0 : i32
    %c0_i32_0 = arith.constant 0 : i32
    return %c0_i32, %arg1 : i32, i32
  }
  func.func @transform_3(%arg0: i32, %arg1: i32) -> (i32, i32) {
    %c0_i32 = arith.constant 0 : i32
    return %arg0, %arg1 : i32, i32
  }
}

module attributes {stable_mosaic.version = 11 : i64} {
  func.func @_mha_kernel(%arg0: i32, %arg1: memref<2xi32, #tpu.memory_space<smem>>, %arg2: memref<1x8x32xbf16, #tpu.memory_space<vmem>>, %arg3: memref<1x8x64xbf16, #tpu.memory_space<vmem>>, %arg4: memref<1x8x32xbf16, #tpu.memory_space<vmem>>) attributes {dimension_semantics = [#tpu.dimension_semantics<parallel>], iteration_bounds = array<i64: 2>, scalar_prefetch = 1 : i64, scratch_operands = 0 : i64, tpu.core_type = #tpu.core_type<tc>, window_params = [{transform_indices = @transform_0, window_bounds = array<i64: 1, 8, 32>}, {transform_indices = @transform_1, window_bounds = array<i64: 1, 8, 64>}, {transform_indices = @transform_2, window_bounds = array<i64: 1, 8, 32>}]} {
    %0 = arith.index_cast %arg0 : i32 to index
    %1 = memref.load %arg1[%0] : memref<2xi32, #tpu.memory_space<smem>>
    %c0 = arith.constant 0 : index
    %c0_0 = arith.constant 0 : index
    %c0_1 = arith.constant 0 : index
    %2 = vector.load %arg2[%c0, %c0_0, %c0_1] : memref<1x8x32xbf16, #tpu.memory_space<vmem>>, vector<1x8x32xbf16>
    %3 = vector.shape_cast %2 : vector<1x8x32xbf16> to vector<8x32xbf16>
    %cst = arith.constant 3.535160e-01 : bf16
    %4 = vector.broadcast %cst : bf16 to vector<8x32xbf16>
    %5 = arith.mulf %3, %4 : vector<8x32xbf16>
    %c0_2 = arith.constant 0 : index
    %c0_3 = arith.constant 0 : index
    %c0_4 = arith.constant 0 : index
    %6 = vector.load %arg3[%c0_2, %c0_3, %c0_4] : memref<1x8x64xbf16, #tpu.memory_space<vmem>>, vector<1x8x64xbf16>
    %7 = vector.shape_cast %6 : vector<1x8x64xbf16> to vector<8x64xbf16>
    %8 = tpu.iota {dimensions = array<i32: 1>} : vector<8x8xi32>
    %9 = vector.broadcast %1 : i32 to vector<8x8xi32>
    %10 = arith.cmpi sge, %8, %9 : vector<8x8xi32>
    %11 = tpu.iota {dimensions = array<i32: 0>} : vector<8x8xi32>
    %12 = arith.cmpi sgt, %8, %11 : vector<8x8xi32>
    %13 = arith.ori %10, %12 : vector<8x8xi1>
    %14 = vector.extract_strided_slice %5 {offsets = [0, 0], sizes = [8, 8], strides = [1, 1]} : vector<8x32xbf16> to vector<8x8xbf16>
    %15 = vector.extract_strided_slice %7 {offsets = [0, 0], sizes = [8, 8], strides = [1, 1]} : vector<8x64xbf16> to vector<8x8xbf16>
    %16 = vector.extract_strided_slice %7 {offsets = [0, 32], sizes = [8, 8], strides = [1, 1]} : vector<8x64xbf16> to vector<8x8xbf16>
    %cst_5 = arith.constant dense<0.000000e+00> : vector<8x8xf32>
    %17 = tpu.matmul %14, %15, %cst_5 {dimension_numbers = #tpu.dot_dimension_numbers<[1], [1], [0], [0], [0, 0, 1, 0], [], []>} : vector<8x8xbf16>, vector<8x8xbf16>, vector<8x8xf32> -> vector<8x8xf32>
    %cst_6 = arith.constant -1.000000e+09 : f32
    %18 = vector.broadcast %cst_6 : f32 to vector<8x8xf32>
    %19 = arith.select %13, %18, %17 : vector<8x8xi1>, vector<8x8xf32>
    %cst_7 = arith.constant dense<0xFF800000> : vector<8xf32>
    %20 = vector.multi_reduction <maximumf>, %19, %cst_7 [1] : vector<8x8xf32> to vector<8xf32>
    %21 = vector.shape_cast %20 : vector<8xf32> to vector<8x1xf32>
    %22 = vector.broadcast %21 : vector<8x1xf32> to vector<8x8xf32>
    %23 = arith.subf %19, %22 : vector<8x8xf32>
    %24 = math.exp %23 : vector<8x8xf32>
    %cst_8 = arith.constant dense<0.000000e+00> : vector<8xf32>
    %25 = vector.multi_reduction <add>, %24, %cst_8 [1] : vector<8x8xf32> to vector<8xf32>
    %26 = vector.shape_cast %25 : vector<8xf32> to vector<8x1xf32>
    %27 = tpu.reciprocal %26 {approx = true} : vector<8x1xf32> -> vector<8x1xf32>
    %28 = vector.broadcast %27 : vector<8x1xf32> to vector<8x8xf32>
    %29 = arith.mulf %24, %28 : vector<8x8xf32>
    %30 = arith.truncf %29 : vector<8x8xf32> to vector<8x8xbf16>
    %cst_9 = arith.constant dense<0.000000e+00> : vector<8x8xf32>
    %31 = tpu.matmul %30, %16, %cst_9 {dimension_numbers = #tpu.dot_dimension_numbers<[1], [0], [0], [1], [0, 0, 1, 1], [], []>} : vector<8x8xbf16>, vector<8x8xbf16>, vector<8x8xf32> -> vector<8x8xf32>
    %32 = vector.extract_strided_slice %5 {offsets = [0, 8], sizes = [8, 8], strides = [1, 1]} : vector<8x32xbf16> to vector<8x8xbf16>
    %33 = vector.extract_strided_slice %7 {offsets = [0, 8], sizes = [8, 8], strides = [1, 1]} : vector<8x64xbf16> to vector<8x8xbf16>
    %34 = vector.extract_strided_slice %7 {offsets = [0, 40], sizes = [8, 8], strides = [1, 1]} : vector<8x64xbf16> to vector<8x8xbf16>
    %cst_10 = arith.constant dense<0.000000e+00> : vector<8x8xf32>
    %35 = tpu.matmul %32, %33, %cst_10 {dimension_numbers = #tpu.dot_dimension_numbers<[1], [1], [0], [0], [0, 0, 1, 0], [], []>} : vector<8x8xbf16>, vector<8x8xbf16>, vector<8x8xf32> -> vector<8x8xf32>
    %cst_11 = arith.constant -1.000000e+09 : f32
    %36 = vector.broadcast %cst_11 : f32 to vector<8x8xf32>
    %37 = arith.select %13, %36, %35 : vector<8x8xi1>, vector<8x8xf32>
    %cst_12 = arith.constant dense<0xFF800000> : vector<8xf32>
    %38 = vector.multi_reduction <maximumf>, %37, %cst_12 [1] : vector<8x8xf32> to vector<8xf32>
    %39 = vector.shape_cast %38 : vector<8xf32> to vector<8x1xf32>
    %40 = vector.broadcast %39 : vector<8x1xf32> to vector<8x8xf32>
    %41 = arith.subf %37, %40 : vector<8x8xf32>
    %42 = math.exp %41 : vector<8x8xf32>
    %cst_13 = arith.constant dense<0.000000e+00> : vector<8xf32>
    %43 = vector.multi_reduction <add>, %42, %cst_13 [1] : vector<8x8xf32> to vector<8xf32>
    %44 = vector.shape_cast %43 : vector<8xf32> to vector<8x1xf32>
    %45 = tpu.reciprocal %44 {approx = true} : vector<8x1xf32> -> vector<8x1xf32>
    %46 = vector.broadcast %45 : vector<8x1xf32> to vector<8x8xf32>
    %47 = arith.mulf %42, %46 : vector<8x8xf32>
    %48 = arith.truncf %47 : vector<8x8xf32> to vector<8x8xbf16>
    %cst_14 = arith.constant dense<0.000000e+00> : vector<8x8xf32>
    %49 = tpu.matmul %48, %34, %cst_14 {dimension_numbers = #tpu.dot_dimension_numbers<[1], [0], [0], [1], [0, 0, 1, 1], [], []>} : vector<8x8xbf16>, vector<8x8xbf16>, vector<8x8xf32> -> vector<8x8xf32>
    %50 = vector.extract_strided_slice %5 {offsets = [0, 16], sizes = [8, 8], strides = [1, 1]} : vector<8x32xbf16> to vector<8x8xbf16>
    %51 = vector.extract_strided_slice %7 {offsets = [0, 16], sizes = [8, 8], strides = [1, 1]} : vector<8x64xbf16> to vector<8x8xbf16>
    %52 = vector.extract_strided_slice %7 {offsets = [0, 48], sizes = [8, 8], strides = [1, 1]} : vector<8x64xbf16> to vector<8x8xbf16>
    %cst_15 = arith.constant dense<0.000000e+00> : vector<8x8xf32>
    %53 = tpu.matmul %50, %51, %cst_15 {dimension_numbers = #tpu.dot_dimension_numbers<[1], [1], [0], [0], [0, 0, 1, 0], [], []>} : vector<8x8xbf16>, vector<8x8xbf16>, vector<8x8xf32> -> vector<8x8xf32>
    %cst_16 = arith.constant -1.000000e+09 : f32
    %54 = vector.broadcast %cst_16 : f32 to vector<8x8xf32>
    %55 = arith.select %13, %54, %53 : vector<8x8xi1>, vector<8x8xf32>
    %cst_17 = arith.constant dense<0xFF800000> : vector<8xf32>
    %56 = vector.multi_reduction <maximumf>, %55, %cst_17 [1] : vector<8x8xf32> to vector<8xf32>
    %57 = vector.shape_cast %56 : vector<8xf32> to vector<8x1xf32>
    %58 = vector.broadcast %57 : vector<8x1xf32> to vector<8x8xf32>
    %59 = arith.subf %55, %58 : vector<8x8xf32>
    %60 = math.exp %59 : vector<8x8xf32>
    %cst_18 = arith.constant dense<0.000000e+00> : vector<8xf32>
    %61 = vector.multi_reduction <add>, %60, %cst_18 [1] : vector<8x8xf32> to vector<8xf32>
    %62 = vector.shape_cast %61 : vector<8xf32> to vector<8x1xf32>
    %63 = tpu.reciprocal %62 {approx = true} : vector<8x1xf32> -> vector<8x1xf32>
    %64 = vector.broadcast %63 : vector<8x1xf32> to vector<8x8xf32>
    %65 = arith.mulf %60, %64 : vector<8x8xf32>
    %66 = arith.truncf %65 : vector<8x8xf32> to vector<8x8xbf16>
    %cst_19 = arith.constant dense<0.000000e+00> : vector<8x8xf32>
    %67 = tpu.matmul %66, %52, %cst_19 {dimension_numbers = #tpu.dot_dimension_numbers<[1], [0], [0], [1], [0, 0, 1, 1], [], []>} : vector<8x8xbf16>, vector<8x8xbf16>, vector<8x8xf32> -> vector<8x8xf32>
    %68 = vector.extract_strided_slice %5 {offsets = [0, 24], sizes = [8, 8], strides = [1, 1]} : vector<8x32xbf16> to vector<8x8xbf16>
    %69 = vector.extract_strided_slice %7 {offsets = [0, 24], sizes = [8, 8], strides = [1, 1]} : vector<8x64xbf16> to vector<8x8xbf16>
    %70 = vector.extract_strided_slice %7 {offsets = [0, 56], sizes = [8, 8], strides = [1, 1]} : vector<8x64xbf16> to vector<8x8xbf16>
    %cst_20 = arith.constant dense<0.000000e+00> : vector<8x8xf32>
    %71 = tpu.matmul %68, %69, %cst_20 {dimension_numbers = #tpu.dot_dimension_numbers<[1], [1], [0], [0], [0, 0, 1, 0], [], []>} : vector<8x8xbf16>, vector<8x8xbf16>, vector<8x8xf32> -> vector<8x8xf32>
    %cst_21 = arith.constant -1.000000e+09 : f32
    %72 = vector.broadcast %cst_21 : f32 to vector<8x8xf32>
    %73 = arith.select %13, %72, %71 : vector<8x8xi1>, vector<8x8xf32>
    %cst_22 = arith.constant dense<0xFF800000> : vector<8xf32>
    %74 = vector.multi_reduction <maximumf>, %73, %cst_22 [1] : vector<8x8xf32> to vector<8xf32>
    %75 = vector.shape_cast %74 : vector<8xf32> to vector<8x1xf32>
    %76 = vector.broadcast %75 : vector<8x1xf32> to vector<8x8xf32>
    %77 = arith.subf %73, %76 : vector<8x8xf32>
    %78 = math.exp %77 : vector<8x8xf32>
    %cst_23 = arith.constant dense<0.000000e+00> : vector<8xf32>
    %79 = vector.multi_reduction <add>, %78, %cst_23 [1] : vector<8x8xf32> to vector<8xf32>
    %80 = vector.shape_cast %79 : vector<8xf32> to vector<8x1xf32>
    %81 = tpu.reciprocal %80 {approx = true} : vector<8x1xf32> -> vector<8x1xf32>
    %82 = vector.broadcast %81 : vector<8x1xf32> to vector<8x8xf32>
    %83 = arith.mulf %78, %82 : vector<8x8xf32>
    %84 = arith.truncf %83 : vector<8x8xf32> to vector<8x8xbf16>
    %cst_24 = arith.constant dense<0.000000e+00> : vector<8x8xf32>
    %85 = tpu.matmul %84, %70, %cst_24 {dimension_numbers = #tpu.dot_dimension_numbers<[1], [0], [0], [1], [0, 0, 1, 1], [], []>} : vector<8x8xbf16>, vector<8x8xbf16>, vector<8x8xf32> -> vector<8x8xf32>
    %86 = tpu.concatenate %31, %49, %67, %85 in 1 : vector<8x8xf32>, vector<8x8xf32>, vector<8x8xf32>, vector<8x8xf32> -> vector<8x32xf32>
    %87 = arith.truncf %86 : vector<8x32xf32> to vector<8x32xbf16>
    %c0_25 = arith.constant 0 : index
    %c0_26 = arith.constant 0 : index
    %c0_27 = arith.constant 0 : index
    %88 = vector.load %arg4[%c0_25, %c0_26, %c0_27] : memref<1x8x32xbf16, #tpu.memory_space<vmem>>, vector<1x8x32xbf16>
    %89 = vector.shape_cast %88 : vector<1x8x32xbf16> to vector<8x32xbf16>
    %90 = vector.shape_cast %87 : vector<8x32xbf16> to vector<1x8x32xbf16>
    tpu.vector_store %arg4[%c0_25, %c0_26, %c0_27], %90 {strides = array<i32>} : memref<1x8x32xbf16, #tpu.memory_space<vmem>>, vector<1x8x32xbf16>,
    return
  }
  func.func @transform_0(%arg0: i32, %arg1: memref<2xi32, #tpu.memory_space<smem>>) -> (i32, i32, i32) {
    %c0_i32 = arith.constant 0 : i32
    %c0_i32_0 = arith.constant 0 : i32
    %c0_i32_1 = arith.constant 0 : i32
    return %arg0, %c0_i32, %c0_i32_0 : i32, i32, i32
  }
  func.func @transform_1(%arg0: i32, %arg1: memref<2xi32, #tpu.memory_space<smem>>) -> (i32, i32, i32) {
    %c0_i32 = arith.constant 0 : i32
    %c0_i32_0 = arith.constant 0 : i32
    %c0_i32_1 = arith.constant 0 : i32
    return %arg0, %c0_i32, %c0_i32_0 : i32, i32, i32
  }
  func.func @transform_2(%arg0: i32, %arg1: memref<2xi32, #tpu.memory_space<smem>>) -> (i32, i32, i32) {
    %c0_i32 = arith.constant 0 : i32
    %c0_i32_0 = arith.constant 0 : i32
    %c0_i32_1 = arith.constant 0 : i32
    return %arg0, %c0_i32, %c0_i32_0 : i32, i32, i32
  }
}

module attributes {stable_mosaic.version = 11 : i64} {
  func.func @_proj_add_ln_kernel(%arg0: i32, %arg1: memref<16x32xbf16, #tpu.memory_space<vmem>>, %arg2: memref<32x32xbf16, #tpu.memory_space<vmem>>, %arg3: memref<1x32xf32, #tpu.memory_space<vmem>>, %arg4: memref<16x32xf32, #tpu.memory_space<vmem>>, %arg5: memref<1x32xf32, #tpu.memory_space<vmem>>, %arg6: memref<1x32xf32, #tpu.memory_space<vmem>>, %arg7: memref<16x32xf32, #tpu.memory_space<vmem>>) attributes {dimension_semantics = [#tpu.dimension_semantics<parallel>], iteration_bounds = array<i64: 1>, scalar_prefetch = 0 : i64, scratch_operands = 0 : i64, tpu.core_type = #tpu.core_type<tc>, window_params = [{transform_indices = @transform_0, window_bounds = array<i64: 16, 32>}, {pipeline_mode = #tpu.pipeline_mode<synchronous>, transform_indices = @transform_1, window_bounds = array<i64: 32, 32>}, {pipeline_mode = #tpu.pipeline_mode<synchronous>, transform_indices = @transform_2, window_bounds = array<i64: 1, 32>}, {transform_indices = @transform_3, window_bounds = array<i64: 16, 32>}, {pipeline_mode = #tpu.pipeline_mode<synchronous>, transform_indices = @transform_4, window_bounds = array<i64: 1, 32>}, {pipeline_mode = #tpu.pipeline_mode<synchronous>, transform_indices = @transform_5, window_bounds = array<i64: 1, 32>}, {transform_indices = @transform_6, window_bounds = array<i64: 16, 32>}]} {
    %c0 = arith.constant 0 : index
    %c0_0 = arith.constant 0 : index
    %0 = vector.load %arg1[%c0, %c0_0] : memref<16x32xbf16, #tpu.memory_space<vmem>>, vector<16x32xbf16>
    %c0_1 = arith.constant 0 : index
    %c0_2 = arith.constant 0 : index
    %1 = vector.load %arg2[%c0_1, %c0_2] : memref<32x32xbf16, #tpu.memory_space<vmem>>, vector<32x32xbf16>
    %cst = arith.constant dense<0.000000e+00> : vector<16x32xf32>
    %2 = tpu.matmul %0, %1, %cst {dimension_numbers = #tpu.dot_dimension_numbers<[1], [0], [0], [1], [0, 0, 1, 1], [], []>} : vector<16x32xbf16>, vector<32x32xbf16>, vector<16x32xf32> -> vector<16x32xf32>
    %c0_3 = arith.constant 0 : index
    %c0_4 = arith.constant 0 : index
    %3 = vector.load %arg3[%c0_3, %c0_4] : memref<1x32xf32, #tpu.memory_space<vmem>>, vector<1x32xf32>
    %4 = vector.broadcast %3 : vector<1x32xf32> to vector<16x32xf32>
    %5 = arith.addf %2, %4 : vector<16x32xf32>
    %c0_5 = arith.constant 0 : index
    %c0_6 = arith.constant 0 : index
    %6 = vector.load %arg4[%c0_5, %c0_6] : memref<16x32xf32, #tpu.memory_space<vmem>>, vector<16x32xf32>
    %7 = arith.addf %5, %6 : vector<16x32xf32>
    %cst_7 = arith.constant dense<0.000000e+00> : vector<16xf32>
    %8 = vector.multi_reduction <add>, %7, %cst_7 [1] : vector<16x32xf32> to vector<16xf32>
    %9 = vector.shape_cast %8 : vector<16xf32> to vector<16x1xf32>
    %cst_8 = arith.constant 3.200000e+01 : f32
    %10 = vector.broadcast %cst_8 : f32 to vector<16x1xf32>
    %11 = arith.divf %9, %10 : vector<16x1xf32>
    %12 = vector.broadcast %11 : vector<16x1xf32> to vector<16x32xf32>
    %13 = arith.subf %7, %12 : vector<16x32xf32>
    %14 = arith.mulf %13, %13 : vector<16x32xf32>
    %cst_9 = arith.constant dense<0.000000e+00> : vector<16xf32>
    %15 = vector.multi_reduction <add>, %14, %cst_9 [1] : vector<16x32xf32> to vector<16xf32>
    %16 = vector.shape_cast %15 : vector<16xf32> to vector<16x1xf32>
    %cst_10 = arith.constant 3.200000e+01 : f32
    %17 = vector.broadcast %cst_10 : f32 to vector<16x1xf32>
    %18 = arith.divf %16, %17 : vector<16x1xf32>
    %19 = vector.broadcast %11 : vector<16x1xf32> to vector<16x32xf32>
    %20 = arith.subf %7, %19 : vector<16x32xf32>
    %cst_11 = arith.constant 9.99999974E-6 : f32
    %21 = vector.broadcast %cst_11 : f32 to vector<16x1xf32>
    %22 = arith.addf %18, %21 : vector<16x1xf32>
    %23 = math.rsqrt %22 : vector<16x1xf32>
    %24 = vector.broadcast %23 : vector<16x1xf32> to vector<16x32xf32>
    %25 = arith.mulf %20, %24 : vector<16x32xf32>
    %c0_12 = arith.constant 0 : index
    %c0_13 = arith.constant 0 : index
    %26 = vector.load %arg5[%c0_12, %c0_13] : memref<1x32xf32, #tpu.memory_space<vmem>>, vector<1x32xf32>
    %27 = vector.broadcast %26 : vector<1x32xf32> to vector<16x32xf32>
    %28 = arith.mulf %25, %27 : vector<16x32xf32>
    %c0_14 = arith.constant 0 : index
    %c0_15 = arith.constant 0 : index
    %29 = vector.load %arg6[%c0_14, %c0_15] : memref<1x32xf32, #tpu.memory_space<vmem>>, vector<1x32xf32>
    %30 = vector.broadcast %29 : vector<1x32xf32> to vector<16x32xf32>
    %31 = arith.addf %28, %30 : vector<16x32xf32>
    %c0_16 = arith.constant 0 : index
    %c0_17 = arith.constant 0 : index
    %32 = vector.load %arg7[%c0_16, %c0_17] : memref<16x32xf32, #tpu.memory_space<vmem>>, vector<16x32xf32>
    tpu.vector_store %arg7[%c0_16, %c0_17], %31 {strides = array<i32>} : memref<16x32xf32, #tpu.memory_space<vmem>>, vector<16x32xf32>,
    return
  }
  func.func @transform_0(%arg0: i32) -> (i32, i32) {
    %c0_i32 = arith.constant 0 : i32
    %c0_i32_0 = arith.constant 0 : i32
    return %arg0, %c0_i32 : i32, i32
  }
  func.func @transform_1(%arg0: i32) -> (i32, i32) {
    %c0_i32 = arith.constant 0 : i32
    %c0_i32_0 = arith.constant 0 : i32
    %c0_i32_1 = arith.constant 0 : i32
    return %c0_i32, %c0_i32_0 : i32, i32
  }
  func.func @transform_2(%arg0: i32) -> (i32, i32) {
    %c0_i32 = arith.constant 0 : i32
    %c0_i32_0 = arith.constant 0 : i32
    %c0_i32_1 = arith.constant 0 : i32
    return %c0_i32, %c0_i32_0 : i32, i32
  }
  func.func @transform_3(%arg0: i32) -> (i32, i32) {
    %c0_i32 = arith.constant 0 : i32
    %c0_i32_0 = arith.constant 0 : i32
    return %arg0, %c0_i32 : i32, i32
  }
  func.func @transform_4(%arg0: i32) -> (i32, i32) {
    %c0_i32 = arith.constant 0 : i32
    %c0_i32_0 = arith.constant 0 : i32
    %c0_i32_1 = arith.constant 0 : i32
    return %c0_i32, %c0_i32_0 : i32, i32
  }
  func.func @transform_5(%arg0: i32) -> (i32, i32) {
    %c0_i32 = arith.constant 0 : i32
    %c0_i32_0 = arith.constant 0 : i32
    %c0_i32_1 = arith.constant 0 : i32
    return %c0_i32, %c0_i32_0 : i32, i32
  }
  func.func @transform_6(%arg0: i32) -> (i32, i32) {
    %c0_i32 = arith.constant 0 : i32
    %c0_i32_0 = arith.constant 0 : i32
    return %arg0, %c0_i32 : i32, i32
  }
}

module attributes {stable_mosaic.version = 11 : i64} {
  func.func @_matmul_bias_kernel_single_k(%arg0: i32, %arg1: i32, %arg2: memref<16x32xbf16, #tpu.memory_space<vmem>>, %arg3: memref<32x32xbf16, #tpu.memory_space<vmem>>, %arg4: memref<1x32xf32, #tpu.memory_space<vmem>>, %arg5: memref<16x32xbf16, #tpu.memory_space<vmem>>) attributes {dimension_semantics = [#tpu.dimension_semantics<parallel>, #tpu.dimension_semantics<parallel>], iteration_bounds = array<i64: 1, 1>, scalar_prefetch = 0 : i64, scratch_operands = 0 : i64, tpu.core_type = #tpu.core_type<tc>, window_params = [{transform_indices = @transform_0, window_bounds = array<i64: 16, 32>}, {transform_indices = @transform_1, window_bounds = array<i64: 32, 32>}, {transform_indices = @transform_2, window_bounds = array<i64: 1, 32>}, {transform_indices = @transform_3, window_bounds = array<i64: 16, 32>}]} {
    %c0 = arith.constant 0 : index
    %c0_0 = arith.constant 0 : index
    %0 = vector.load %arg2[%c0, %c0_0] : memref<16x32xbf16, #tpu.memory_space<vmem>>, vector<16x32xbf16>
    %c0_1 = arith.constant 0 : index
    %c0_2 = arith.constant 0 : index
    %1 = vector.load %arg3[%c0_1, %c0_2] : memref<32x32xbf16, #tpu.memory_space<vmem>>, vector<32x32xbf16>
    %cst = arith.constant dense<0.000000e+00> : vector<16x32xf32>
    %2 = tpu.matmul %0, %1, %cst {dimension_numbers = #tpu.dot_dimension_numbers<[1], [0], [0], [1], [0, 0, 1, 1], [], []>} : vector<16x32xbf16>, vector<32x32xbf16>, vector<16x32xf32> -> vector<16x32xf32>
    %c0_3 = arith.constant 0 : index
    %c0_4 = arith.constant 0 : index
    %3 = vector.load %arg4[%c0_3, %c0_4] : memref<1x32xf32, #tpu.memory_space<vmem>>, vector<1x32xf32>
    %4 = vector.broadcast %3 : vector<1x32xf32> to vector<16x32xf32>
    %5 = arith.addf %2, %4 : vector<16x32xf32>
    %6 = arith.truncf %5 : vector<16x32xf32> to vector<16x32xbf16>
    %c0_5 = arith.constant 0 : index
    %c0_6 = arith.constant 0 : index
    %7 = vector.load %arg5[%c0_5, %c0_6] : memref<16x32xbf16, #tpu.memory_space<vmem>>, vector<16x32xbf16>
    tpu.vector_store %arg5[%c0_5, %c0_6], %6 {strides = array<i32>} : memref<16x32xbf16, #tpu.memory_space<vmem>>, vector<16x32xbf16>,
    return
  }
  func.func @transform_0(%arg0: i32, %arg1: i32) -> (i32, i32) {
    %c0_i32 = arith.constant 0 : i32
    %c0_i32_0 = arith.constant 0 : i32
    return %arg0, %c0_i32 : i32, i32
  }
  func.func @transform_1(%arg0: i32, %arg1: i32) -> (i32, i32) {
    %c0_i32 = arith.constant 0 : i32
    %c0_i32_0 = arith.constant 0 : i32
    return %c0_i32, %arg1 : i32, i32
  }
  func.func @transform_2(%arg0: i32, %arg1: i32) -> (i32, i32) {
    %c0_i32 = arith.constant 0 : i32
    %c0_i32_0 = arith.constant 0 : i32
    return %c0_i32, %arg1 : i32, i32
  }
  func.func @transform_3(%arg0: i32, %arg1: i32) -> (i32, i32) {
    %c0_i32 = arith.constant 0 : i32
    return %arg0, %arg1 : i32, i32
  }
}

module attributes {stable_mosaic.version = 11 : i64} {
  func.func @_matmul_bias_kernel_single_k(%arg0: i32, %arg1: i32, %arg2: memref<32x32xbf16, #tpu.memory_space<vmem>>, %arg3: memref<32x96xbf16, #tpu.memory_space<vmem>>, %arg4: memref<1x96xf32, #tpu.memory_space<vmem>>, %arg5: memref<32x96xbf16, #tpu.memory_space<vmem>>) attributes {dimension_semantics = [#tpu.dimension_semantics<parallel>, #tpu.dimension_semantics<parallel>], iteration_bounds = array<i64: 1, 1>, scalar_prefetch = 0 : i64, scratch_operands = 0 : i64, tpu.core_type = #tpu.core_type<tc>, window_params = [{transform_indices = @transform_0, window_bounds = array<i64: 32, 32>}, {transform_indices = @transform_1, window_bounds = array<i64: 32, 96>}, {transform_indices = @transform_2, window_bounds = array<i64: 1, 96>}, {transform_indices = @transform_3, window_bounds = array<i64: 32, 96>}]} {
    %c0 = arith.constant 0 : index
    %c0_0 = arith.constant 0 : index
    %0 = vector.load %arg2[%c0, %c0_0] : memref<32x32xbf16, #tpu.memory_space<vmem>>, vector<32x32xbf16>
    %c0_1 = arith.constant 0 : index
    %c0_2 = arith.constant 0 : index
    %1 = vector.load %arg3[%c0_1, %c0_2] : memref<32x96xbf16, #tpu.memory_space<vmem>>, vector<32x96xbf16>
    %cst = arith.constant dense<0.000000e+00> : vector<32x96xf32>
    %2 = tpu.matmul %0, %1, %cst {dimension_numbers = #tpu.dot_dimension_numbers<[1], [0], [0], [1], [0, 0, 1, 1], [], []>} : vector<32x32xbf16>, vector<32x96xbf16>, vector<32x96xf32> -> vector<32x96xf32>
    %c0_3 = arith.constant 0 : index
    %c0_4 = arith.constant 0 : index
    %3 = vector.load %arg4[%c0_3, %c0_4] : memref<1x96xf32, #tpu.memory_space<vmem>>, vector<1x96xf32>
    %4 = vector.broadcast %3 : vector<1x96xf32> to vector<32x96xf32>
    %5 = arith.addf %2, %4 : vector<32x96xf32>
    %6 = arith.truncf %5 : vector<32x96xf32> to vector<32x96xbf16>
    %c0_5 = arith.constant 0 : index
    %c0_6 = arith.constant 0 : index
    %7 = vector.load %arg5[%c0_5, %c0_6] : memref<32x96xbf16, #tpu.memory_space<vmem>>, vector<32x96xbf16>
    tpu.vector_store %arg5[%c0_5, %c0_6], %6 {strides = array<i32>} : memref<32x96xbf16, #tpu.memory_space<vmem>>, vector<32x96xbf16>,
    return
  }
  func.func @transform_0(%arg0: i32, %arg1: i32) -> (i32, i32) {
    %c0_i32 = arith.constant 0 : i32
    %c0_i32_0 = arith.constant 0 : i32
    return %arg0, %c0_i32 : i32, i32
  }
  func.func @transform_1(%arg0: i32, %arg1: i32) -> (i32, i32) {
    %c0_i32 = arith.constant 0 : i32
    %c0_i32_0 = arith.constant 0 : i32
    return %c0_i32, %arg1 : i32, i32
  }
  func.func @transform_2(%arg0: i32, %arg1: i32) -> (i32, i32) {
    %c0_i32 = arith.constant 0 : i32
    %c0_i32_0 = arith.constant 0 : i32
    return %c0_i32, %arg1 : i32, i32
  }
  func.func @transform_3(%arg0: i32, %arg1: i32) -> (i32, i32) {
    %c0_i32 = arith.constant 0 : i32
    return %arg0, %arg1 : i32, i32
  }
}

module attributes {stable_mosaic.version = 11 : i64} {
  func.func @_matmul_bias_kernel_single_k(%arg0: i32, %arg1: i32, %arg2: memref<32x8xbf16, #tpu.memory_space<vmem>>, %arg3: memref<8x32xbf16, #tpu.memory_space<vmem>>, %arg4: memref<1x32xf32, #tpu.memory_space<vmem>>, %arg5: memref<32x32xf32, #tpu.memory_space<vmem>>) attributes {dimension_semantics = [#tpu.dimension_semantics<parallel>, #tpu.dimension_semantics<parallel>], iteration_bounds = array<i64: 1, 1>, scalar_prefetch = 0 : i64, scratch_operands = 0 : i64, tpu.core_type = #tpu.core_type<tc>, window_params = [{transform_indices = @transform_0, window_bounds = array<i64: 32, 8>}, {transform_indices = @transform_1, window_bounds = array<i64: 8, 32>}, {transform_indices = @transform_2, window_bounds = array<i64: 1, 32>}, {transform_indices = @transform_3, window_bounds = array<i64: 32, 32>}]} {
    %c0 = arith.constant 0 : index
    %c0_0 = arith.constant 0 : index
    %0 = vector.load %arg2[%c0, %c0_0] : memref<32x8xbf16, #tpu.memory_space<vmem>>, vector<32x8xbf16>
    %c0_1 = arith.constant 0 : index
    %c0_2 = arith.constant 0 : index
    %1 = vector.load %arg3[%c0_1, %c0_2] : memref<8x32xbf16, #tpu.memory_space<vmem>>, vector<8x32xbf16>
    %cst = arith.constant dense<0.000000e+00> : vector<32x32xf32>
    %2 = tpu.matmul %0, %1, %cst {dimension_numbers = #tpu.dot_dimension_numbers<[1], [0], [0], [1], [0, 0, 1, 1], [], []>} : vector<32x8xbf16>, vector<8x32xbf16>, vector<32x32xf32> -> vector<32x32xf32>
    %c0_3 = arith.constant 0 : index
    %c0_4 = arith.constant 0 : index
    %3 = vector.load %arg4[%c0_3, %c0_4] : memref<1x32xf32, #tpu.memory_space<vmem>>, vector<1x32xf32>
    %4 = vector.broadcast %3 : vector<1x32xf32> to vector<32x32xf32>
    %5 = arith.addf %2, %4 : vector<32x32xf32>
    %c0_5 = arith.constant 0 : index
    %c0_6 = arith.constant 0 : index
    %6 = vector.load %arg5[%c0_5, %c0_6] : memref<32x32xf32, #tpu.memory_space<vmem>>, vector<32x32xf32>
    tpu.vector_store %arg5[%c0_5, %c0_6], %5 {strides = array<i32>} : memref<32x32xf32, #tpu.memory_space<vmem>>, vector<32x32xf32>,
    return
  }
  func.func @transform_0(%arg0: i32, %arg1: i32) -> (i32, i32) {
    %c0_i32 = arith.constant 0 : i32
    %c0_i32_0 = arith.constant 0 : i32
    return %arg0, %c0_i32 : i32, i32
  }
  func.func @transform_1(%arg0: i32, %arg1: i32) -> (i32, i32) {
    %c0_i32 = arith.constant 0 : i32
    %c0_i32_0 = arith.constant 0 : i32
    return %c0_i32, %arg1 : i32, i32
  }
  func.func @transform_2(%arg0: i32, %arg1: i32) -> (i32, i32) {
    %c0_i32 = arith.constant 0 : i32
    %c0_i32_0 = arith.constant 0 : i32
    return %c0_i32, %arg1 : i32, i32
  }
  func.func @transform_3(%arg0: i32, %arg1: i32) -> (i32, i32) {
    %c0_i32 = arith.constant 0 : i32
    return %arg0, %arg1 : i32, i32
  }
}

module attributes {stable_mosaic.version = 11 : i64} {
  func.func @_mha_kernel(%arg0: i32, %arg1: memref<2xi32, #tpu.memory_space<smem>>, %arg2: memref<1x16x32xbf16, #tpu.memory_space<vmem>>, %arg3: memref<1x16x64xbf16, #tpu.memory_space<vmem>>, %arg4: memref<1x16x32xbf16, #tpu.memory_space<vmem>>) attributes {dimension_semantics = [#tpu.dimension_semantics<parallel>], iteration_bounds = array<i64: 2>, scalar_prefetch = 1 : i64, scratch_operands = 0 : i64, tpu.core_type = #tpu.core_type<tc>, window_params = [{transform_indices = @transform_0, window_bounds = array<i64: 1, 16, 32>}, {transform_indices = @transform_1, window_bounds = array<i64: 1, 16, 64>}, {transform_indices = @transform_2, window_bounds = array<i64: 1, 16, 32>}]} {
    %0 = arith.index_cast %arg0 : i32 to index
    %1 = memref.load %arg1[%0] : memref<2xi32, #tpu.memory_space<smem>>
    %c0 = arith.constant 0 : index
    %c0_0 = arith.constant 0 : index
    %c0_1 = arith.constant 0 : index
    %2 = vector.load %arg2[%c0, %c0_0, %c0_1] : memref<1x16x32xbf16, #tpu.memory_space<vmem>>, vector<1x16x32xbf16>
    %3 = vector.shape_cast %2 : vector<1x16x32xbf16> to vector<16x32xbf16>
    %cst = arith.constant 3.535160e-01 : bf16
    %4 = vector.broadcast %cst : bf16 to vector<16x32xbf16>
    %5 = arith.mulf %3, %4 : vector<16x32xbf16>
    %c0_2 = arith.constant 0 : index
    %c0_3 = arith.constant 0 : index
    %c0_4 = arith.constant 0 : index
    %6 = vector.load %arg3[%c0_2, %c0_3, %c0_4] : memref<1x16x64xbf16, #tpu.memory_space<vmem>>, vector<1x16x64xbf16>
    %7 = vector.shape_cast %6 : vector<1x16x64xbf16> to vector<16x64xbf16>
    %8 = tpu.iota {dimensions = array<i32: 1>} : vector<16x16xi32>
    %9 = vector.broadcast %1 : i32 to vector<16x16xi32>
    %10 = arith.cmpi sge, %8, %9 : vector<16x16xi32>
    %11 = vector.extract_strided_slice %5 {offsets = [0, 0], sizes = [16, 8], strides = [1, 1]} : vector<16x32xbf16> to vector<16x8xbf16>
    %12 = vector.extract_strided_slice %7 {offsets = [0, 0], sizes = [16, 8], strides = [1, 1]} : vector<16x64xbf16> to vector<16x8xbf16>
    %13 = vector.extract_strided_slice %7 {offsets = [0, 32], sizes = [16, 8], strides = [1, 1]} : vector<16x64xbf16> to vector<16x8xbf16>
    %cst_5 = arith.constant dense<0.000000e+00> : vector<16x16xf32>
    %14 = tpu.matmul %11, %12, %cst_5 {dimension_numbers = #tpu.dot_dimension_numbers<[1], [1], [0], [0], [0, 0, 1, 0], [], []>} : vector<16x8xbf16>, vector<16x8xbf16>, vector<16x16xf32> -> vector<16x16xf32>
    %cst_6 = arith.constant -1.000000e+09 : f32
    %15 = vector.broadcast %cst_6 : f32 to vector<16x16xf32>
    %16 = arith.select %10, %15, %14 : vector<16x16xi1>, vector<16x16xf32>
    %cst_7 = arith.constant dense<0xFF800000> : vector<16xf32>
    %17 = vector.multi_reduction <maximumf>, %16, %cst_7 [1] : vector<16x16xf32> to vector<16xf32>
    %18 = vector.shape_cast %17 : vector<16xf32> to vector<16x1xf32>
    %19 = vector.broadcast %18 : vector<16x1xf32> to vector<16x16xf32>
    %20 = arith.subf %16, %19 : vector<16x16xf32>
    %21 = math.exp %20 : vector<16x16xf32>
    %cst_8 = arith.constant dense<0.000000e+00> : vector<16xf32>
    %22 = vector.multi_reduction <add>, %21, %cst_8 [1] : vector<16x16xf32> to vector<16xf32>
    %23 = vector.shape_cast %22 : vector<16xf32> to vector<16x1xf32>
    %24 = tpu.reciprocal %23 {approx = true} : vector<16x1xf32> -> vector<16x1xf32>
    %25 = vector.broadcast %24 : vector<16x1xf32> to vector<16x16xf32>
    %26 = arith.mulf %21, %25 : vector<16x16xf32>
    %27 = arith.truncf %26 : vector<16x16xf32> to vector<16x16xbf16>
    %cst_9 = arith.constant dense<0.000000e+00> : vector<16x8xf32>
    %28 = tpu.matmul %27, %13, %cst_9 {dimension_numbers = #tpu.dot_dimension_numbers<[1], [0], [0], [1], [0, 0, 1, 1], [], []>} : vector<16x16xbf16>, vector<16x8xbf16>, vector<16x8xf32> -> vector<16x8xf32>
    %29 = vector.extract_strided_slice %5 {offsets = [0, 8], sizes = [16, 8], strides = [1, 1]} : vector<16x32xbf16> to vector<16x8xbf16>
    %30 = vector.extract_strided_slice %7 {offsets = [0, 8], sizes = [16, 8], strides = [1, 1]} : vector<16x64xbf16> to vector<16x8xbf16>
    %31 = vector.extract_strided_slice %7 {offsets = [0, 40], sizes = [16, 8], strides = [1, 1]} : vector<16x64xbf16> to vector<16x8xbf16>
    %cst_10 = arith.constant dense<0.000000e+00> : vector<16x16xf32>
    %32 = tpu.matmul %29, %30, %cst_10 {dimension_numbers = #tpu.dot_dimension_numbers<[1], [1], [0], [0], [0, 0, 1, 0], [], []>} : vector<16x8xbf16>, vector<16x8xbf16>, vector<16x16xf32> -> vector<16x16xf32>
    %cst_11 = arith.constant -1.000000e+09 : f32
    %33 = vector.broadcast %cst_11 : f32 to vector<16x16xf32>
    %34 = arith.select %10, %33, %32 : vector<16x16xi1>, vector<16x16xf32>
    %cst_12 = arith.constant dense<0xFF800000> : vector<16xf32>
    %35 = vector.multi_reduction <maximumf>, %34, %cst_12 [1] : vector<16x16xf32> to vector<16xf32>
    %36 = vector.shape_cast %35 : vector<16xf32> to vector<16x1xf32>
    %37 = vector.broadcast %36 : vector<16x1xf32> to vector<16x16xf32>
    %38 = arith.subf %34, %37 : vector<16x16xf32>
    %39 = math.exp %38 : vector<16x16xf32>
    %cst_13 = arith.constant dense<0.000000e+00> : vector<16xf32>
    %40 = vector.multi_reduction <add>, %39, %cst_13 [1] : vector<16x16xf32> to vector<16xf32>
    %41 = vector.shape_cast %40 : vector<16xf32> to vector<16x1xf32>
    %42 = tpu.reciprocal %41 {approx = true} : vector<16x1xf32> -> vector<16x1xf32>
    %43 = vector.broadcast %42 : vector<16x1xf32> to vector<16x16xf32>
    %44 = arith.mulf %39, %43 : vector<16x16xf32>
    %45 = arith.truncf %44 : vector<16x16xf32> to vector<16x16xbf16>
    %cst_14 = arith.constant dense<0.000000e+00> : vector<16x8xf32>
    %46 = tpu.matmul %45, %31, %cst_14 {dimension_numbers = #tpu.dot_dimension_numbers<[1], [0], [0], [1], [0, 0, 1, 1], [], []>} : vector<16x16xbf16>, vector<16x8xbf16>, vector<16x8xf32> -> vector<16x8xf32>
    %47 = vector.extract_strided_slice %5 {offsets = [0, 16], sizes = [16, 8], strides = [1, 1]} : vector<16x32xbf16> to vector<16x8xbf16>
    %48 = vector.extract_strided_slice %7 {offsets = [0, 16], sizes = [16, 8], strides = [1, 1]} : vector<16x64xbf16> to vector<16x8xbf16>
    %49 = vector.extract_strided_slice %7 {offsets = [0, 48], sizes = [16, 8], strides = [1, 1]} : vector<16x64xbf16> to vector<16x8xbf16>
    %cst_15 = arith.constant dense<0.000000e+00> : vector<16x16xf32>
    %50 = tpu.matmul %47, %48, %cst_15 {dimension_numbers = #tpu.dot_dimension_numbers<[1], [1], [0], [0], [0, 0, 1, 0], [], []>} : vector<16x8xbf16>, vector<16x8xbf16>, vector<16x16xf32> -> vector<16x16xf32>
    %cst_16 = arith.constant -1.000000e+09 : f32
    %51 = vector.broadcast %cst_16 : f32 to vector<16x16xf32>
    %52 = arith.select %10, %51, %50 : vector<16x16xi1>, vector<16x16xf32>
    %cst_17 = arith.constant dense<0xFF800000> : vector<16xf32>
    %53 = vector.multi_reduction <maximumf>, %52, %cst_17 [1] : vector<16x16xf32> to vector<16xf32>
    %54 = vector.shape_cast %53 : vector<16xf32> to vector<16x1xf32>
    %55 = vector.broadcast %54 : vector<16x1xf32> to vector<16x16xf32>
    %56 = arith.subf %52, %55 : vector<16x16xf32>
    %57 = math.exp %56 : vector<16x16xf32>
    %cst_18 = arith.constant dense<0.000000e+00> : vector<16xf32>
    %58 = vector.multi_reduction <add>, %57, %cst_18 [1] : vector<16x16xf32> to vector<16xf32>
    %59 = vector.shape_cast %58 : vector<16xf32> to vector<16x1xf32>
    %60 = tpu.reciprocal %59 {approx = true} : vector<16x1xf32> -> vector<16x1xf32>
    %61 = vector.broadcast %60 : vector<16x1xf32> to vector<16x16xf32>
    %62 = arith.mulf %57, %61 : vector<16x16xf32>
    %63 = arith.truncf %62 : vector<16x16xf32> to vector<16x16xbf16>
    %cst_19 = arith.constant dense<0.000000e+00> : vector<16x8xf32>
    %64 = tpu.matmul %63, %49, %cst_19 {dimension_numbers = #tpu.dot_dimension_numbers<[1], [0], [0], [1], [0, 0, 1, 1], [], []>} : vector<16x16xbf16>, vector<16x8xbf16>, vector<16x8xf32> -> vector<16x8xf32>
    %65 = vector.extract_strided_slice %5 {offsets = [0, 24], sizes = [16, 8], strides = [1, 1]} : vector<16x32xbf16> to vector<16x8xbf16>
    %66 = vector.extract_strided_slice %7 {offsets = [0, 24], sizes = [16, 8], strides = [1, 1]} : vector<16x64xbf16> to vector<16x8xbf16>
    %67 = vector.extract_strided_slice %7 {offsets = [0, 56], sizes = [16, 8], strides = [1, 1]} : vector<16x64xbf16> to vector<16x8xbf16>
    %cst_20 = arith.constant dense<0.000000e+00> : vector<16x16xf32>
    %68 = tpu.matmul %65, %66, %cst_20 {dimension_numbers = #tpu.dot_dimension_numbers<[1], [1], [0], [0], [0, 0, 1, 0], [], []>} : vector<16x8xbf16>, vector<16x8xbf16>, vector<16x16xf32> -> vector<16x16xf32>
    %cst_21 = arith.constant -1.000000e+09 : f32
    %69 = vector.broadcast %cst_21 : f32 to vector<16x16xf32>
    %70 = arith.select %10, %69, %68 : vector<16x16xi1>, vector<16x16xf32>
    %cst_22 = arith.constant dense<0xFF800000> : vector<16xf32>
    %71 = vector.multi_reduction <maximumf>, %70, %cst_22 [1] : vector<16x16xf32> to vector<16xf32>
    %72 = vector.shape_cast %71 : vector<16xf32> to vector<16x1xf32>
    %73 = vector.broadcast %72 : vector<16x1xf32> to vector<16x16xf32>
    %74 = arith.subf %70, %73 : vector<16x16xf32>
    %75 = math.exp %74 : vector<16x16xf32>
    %cst_23 = arith.constant dense<0.000000e+00> : vector<16xf32>
    %76 = vector.multi_reduction <add>, %75, %cst_23 [1] : vector<16x16xf32> to vector<16xf32>
    %77 = vector.shape_cast %76 : vector<16xf32> to vector<16x1xf32>
    %78 = tpu.reciprocal %77 {approx = true} : vector<16x1xf32> -> vector<16x1xf32>
    %79 = vector.broadcast %78 : vector<16x1xf32> to vector<16x16xf32>
    %80 = arith.mulf %75, %79 : vector<16x16xf32>
    %81 = arith.truncf %80 : vector<16x16xf32> to vector<16x16xbf16>
    %cst_24 = arith.constant dense<0.000000e+00> : vector<16x8xf32>
    %82 = tpu.matmul %81, %67, %cst_24 {dimension_numbers = #tpu.dot_dimension_numbers<[1], [0], [0], [1], [0, 0, 1, 1], [], []>} : vector<16x16xbf16>, vector<16x8xbf16>, vector<16x8xf32> -> vector<16x8xf32>
    %83 = tpu.concatenate %28, %46, %64, %82 in 1 : vector<16x8xf32>, vector<16x8xf32>, vector<16x8xf32>, vector<16x8xf32> -> vector<16x32xf32>
    %84 = arith.truncf %83 : vector<16x32xf32> to vector<16x32xbf16>
    %c0_25 = arith.constant 0 : index
    %c0_26 = arith.constant 0 : index
    %c0_27 = arith.constant 0 : index
    %85 = vector.load %arg4[%c0_25, %c0_26, %c0_27] : memref<1x16x32xbf16, #tpu.memory_space<vmem>>, vector<1x16x32xbf16>
    %86 = vector.shape_cast %85 : vector<1x16x32xbf16> to vector<16x32xbf16>
    %87 = vector.shape_cast %84 : vector<16x32xbf16> to vector<1x16x32xbf16>
    tpu.vector_store %arg4[%c0_25, %c0_26, %c0_27], %87 {strides = array<i32>} : memref<1x16x32xbf16, #tpu.memory_space<vmem>>, vector<1x16x32xbf16>,
    return
  }
  func.func @transform_0(%arg0: i32, %arg1: memref<2xi32, #tpu.memory_space<smem>>) -> (i32, i32, i32) {
    %c0_i32 = arith.constant 0 : i32
    %c0_i32_0 = arith.constant 0 : i32
    %c0_i32_1 = arith.constant 0 : i32
    return %arg0, %c0_i32, %c0_i32_0 : i32, i32, i32
  }
  func.func @transform_1(%arg0: i32, %arg1: memref<2xi32, #tpu.memory_space<smem>>) -> (i32, i32, i32) {
    %c0_i32 = arith.constant 0 : i32
    %c0_i32_0 = arith.constant 0 : i32
    %c0_i32_1 = arith.constant 0 : i32
    return %arg0, %c0_i32, %c0_i32_0 : i32, i32, i32
  }
  func.func @transform_2(%arg0: i32, %arg1: memref<2xi32, #tpu.memory_space<smem>>) -> (i32, i32, i32) {
    %c0_i32 = arith.constant 0 : i32
    %c0_i32_0 = arith.constant 0 : i32
    %c0_i32_1 = arith.constant 0 : i32
    return %arg0, %c0_i32, %c0_i32_0 : i32, i32, i32
  }
}

module attributes {stable_mosaic.version = 11 : i64} {
  func.func @_proj_add_ln_kernel(%arg0: i32, %arg1: memref<32x32xbf16, #tpu.memory_space<vmem>>, %arg2: memref<32x32xbf16, #tpu.memory_space<vmem>>, %arg3: memref<1x32xf32, #tpu.memory_space<vmem>>, %arg4: memref<32x32xf32, #tpu.memory_space<vmem>>, %arg5: memref<1x32xf32, #tpu.memory_space<vmem>>, %arg6: memref<1x32xf32, #tpu.memory_space<vmem>>, %arg7: memref<32x32xf32, #tpu.memory_space<vmem>>) attributes {dimension_semantics = [#tpu.dimension_semantics<parallel>], iteration_bounds = array<i64: 1>, scalar_prefetch = 0 : i64, scratch_operands = 0 : i64, tpu.core_type = #tpu.core_type<tc>, window_params = [{transform_indices = @transform_0, window_bounds = array<i64: 32, 32>}, {pipeline_mode = #tpu.pipeline_mode<synchronous>, transform_indices = @transform_1, window_bounds = array<i64: 32, 32>}, {pipeline_mode = #tpu.pipeline_mode<synchronous>, transform_indices = @transform_2, window_bounds = array<i64: 1, 32>}, {transform_indices = @transform_3, window_bounds = array<i64: 32, 32>}, {pipeline_mode = #tpu.pipeline_mode<synchronous>, transform_indices = @transform_4, window_bounds = array<i64: 1, 32>}, {pipeline_mode = #tpu.pipeline_mode<synchronous>, transform_indices = @transform_5, window_bounds = array<i64: 1, 32>}, {transform_indices = @transform_6, window_bounds = array<i64: 32, 32>}]} {
    %c0 = arith.constant 0 : index
    %c0_0 = arith.constant 0 : index
    %0 = vector.load %arg1[%c0, %c0_0] : memref<32x32xbf16, #tpu.memory_space<vmem>>, vector<32x32xbf16>
    %c0_1 = arith.constant 0 : index
    %c0_2 = arith.constant 0 : index
    %1 = vector.load %arg2[%c0_1, %c0_2] : memref<32x32xbf16, #tpu.memory_space<vmem>>, vector<32x32xbf16>
    %cst = arith.constant dense<0.000000e+00> : vector<32x32xf32>
    %2 = tpu.matmul %0, %1, %cst {dimension_numbers = #tpu.dot_dimension_numbers<[1], [0], [0], [1], [0, 0, 1, 1], [], []>} : vector<32x32xbf16>, vector<32x32xbf16>, vector<32x32xf32> -> vector<32x32xf32>
    %c0_3 = arith.constant 0 : index
    %c0_4 = arith.constant 0 : index
    %3 = vector.load %arg3[%c0_3, %c0_4] : memref<1x32xf32, #tpu.memory_space<vmem>>, vector<1x32xf32>
    %4 = vector.broadcast %3 : vector<1x32xf32> to vector<32x32xf32>
    %5 = arith.addf %2, %4 : vector<32x32xf32>
    %c0_5 = arith.constant 0 : index
    %c0_6 = arith.constant 0 : index
    %6 = vector.load %arg4[%c0_5, %c0_6] : memref<32x32xf32, #tpu.memory_space<vmem>>, vector<32x32xf32>
    %7 = arith.addf %5, %6 : vector<32x32xf32>
    %cst_7 = arith.constant dense<0.000000e+00> : vector<32xf32>
    %8 = vector.multi_reduction <add>, %7, %cst_7 [1] : vector<32x32xf32> to vector<32xf32>
    %9 = vector.shape_cast %8 : vector<32xf32> to vector<32x1xf32>
    %cst_8 = arith.constant 3.200000e+01 : f32
    %10 = vector.broadcast %cst_8 : f32 to vector<32x1xf32>
    %11 = arith.divf %9, %10 : vector<32x1xf32>
    %12 = vector.broadcast %11 : vector<32x1xf32> to vector<32x32xf32>
    %13 = arith.subf %7, %12 : vector<32x32xf32>
    %14 = arith.mulf %13, %13 : vector<32x32xf32>
    %cst_9 = arith.constant dense<0.000000e+00> : vector<32xf32>
    %15 = vector.multi_reduction <add>, %14, %cst_9 [1] : vector<32x32xf32> to vector<32xf32>
    %16 = vector.shape_cast %15 : vector<32xf32> to vector<32x1xf32>
    %cst_10 = arith.constant 3.200000e+01 : f32
    %17 = vector.broadcast %cst_10 : f32 to vector<32x1xf32>
    %18 = arith.divf %16, %17 : vector<32x1xf32>
    %19 = vector.broadcast %11 : vector<32x1xf32> to vector<32x32xf32>
    %20 = arith.subf %7, %19 : vector<32x32xf32>
    %cst_11 = arith.constant 9.99999974E-6 : f32
    %21 = vector.broadcast %cst_11 : f32 to vector<32x1xf32>
    %22 = arith.addf %18, %21 : vector<32x1xf32>
    %23 = math.rsqrt %22 : vector<32x1xf32>
    %24 = vector.broadcast %23 : vector<32x1xf32> to vector<32x32xf32>
    %25 = arith.mulf %20, %24 : vector<32x32xf32>
    %c0_12 = arith.constant 0 : index
    %c0_13 = arith.constant 0 : index
    %26 = vector.load %arg5[%c0_12, %c0_13] : memref<1x32xf32, #tpu.memory_space<vmem>>, vector<1x32xf32>
    %27 = vector.broadcast %26 : vector<1x32xf32> to vector<32x32xf32>
    %28 = arith.mulf %25, %27 : vector<32x32xf32>
    %c0_14 = arith.constant 0 : index
    %c0_15 = arith.constant 0 : index
    %29 = vector.load %arg6[%c0_14, %c0_15] : memref<1x32xf32, #tpu.memory_space<vmem>>, vector<1x32xf32>
    %30 = vector.broadcast %29 : vector<1x32xf32> to vector<32x32xf32>
    %31 = arith.addf %28, %30 : vector<32x32xf32>
    %c0_16 = arith.constant 0 : index
    %c0_17 = arith.constant 0 : index
    %32 = vector.load %arg7[%c0_16, %c0_17] : memref<32x32xf32, #tpu.memory_space<vmem>>, vector<32x32xf32>
    tpu.vector_store %arg7[%c0_16, %c0_17], %31 {strides = array<i32>} : memref<32x32xf32, #tpu.memory_space<vmem>>, vector<32x32xf32>,
    return
  }
  func.func @transform_0(%arg0: i32) -> (i32, i32) {
    %c0_i32 = arith.constant 0 : i32
    %c0_i32_0 = arith.constant 0 : i32
    return %arg0, %c0_i32 : i32, i32
  }
  func.func @transform_1(%arg0: i32) -> (i32, i32) {
    %c0_i32 = arith.constant 0 : i32
    %c0_i32_0 = arith.constant 0 : i32
    %c0_i32_1 = arith.constant 0 : i32
    return %c0_i32, %c0_i32_0 : i32, i32
  }
  func.func @transform_2(%arg0: i32) -> (i32, i32) {
    %c0_i32 = arith.constant 0 : i32
    %c0_i32_0 = arith.constant 0 : i32
    %c0_i32_1 = arith.constant 0 : i32
    return %c0_i32, %c0_i32_0 : i32, i32
  }
  func.func @transform_3(%arg0: i32) -> (i32, i32) {
    %c0_i32 = arith.constant 0 : i32
    %c0_i32_0 = arith.constant 0 : i32
    return %arg0, %c0_i32 : i32, i32
  }
  func.func @transform_4(%arg0: i32) -> (i32, i32) {
    %c0_i32 = arith.constant 0 : i32
    %c0_i32_0 = arith.constant 0 : i32
    %c0_i32_1 = arith.constant 0 : i32
    return %c0_i32, %c0_i32_0 : i32, i32
  }
  func.func @transform_5(%arg0: i32) -> (i32, i32) {
    %c0_i32 = arith.constant 0 : i32
    %c0_i32_0 = arith.constant 0 : i32
    %c0_i32_1 = arith.constant 0 : i32
    return %c0_i32, %c0_i32_0 : i32, i32
  }
  func.func @transform_6(%arg0: i32) -> (i32, i32) {
    %c0_i32 = arith.constant 0 : i32
    %c0_i32_0 = arith.constant 0 : i32
    return %arg0, %c0_i32 : i32, i32
  }
}

module attributes {stable_mosaic.version = 11 : i64} {
  func.func @_ffn_add_ln_kernel(%arg0: i32, %arg1: memref<32x32xf32, #tpu.memory_space<vmem>>, %arg2: memref<32x64xbf16, #tpu.memory_space<vmem>>, %arg3: memref<1x64xf32, #tpu.memory_space<vmem>>, %arg4: memref<64x32xbf16, #tpu.memory_space<vmem>>, %arg5: memref<1x32xf32, #tpu.memory_space<vmem>>, %arg6: memref<1x32xf32, #tpu.memory_space<vmem>>, %arg7: memref<1x32xf32, #tpu.memory_space<vmem>>, %arg8: memref<32x32xf32, #tpu.memory_space<vmem>>) attributes {dimension_semantics = [#tpu.dimension_semantics<parallel>], iteration_bounds = array<i64: 1>, scalar_prefetch = 0 : i64, scratch_operands = 0 : i64, tpu.core_type = #tpu.core_type<tc>, window_params = [{transform_indices = @transform_0, window_bounds = array<i64: 32, 32>}, {pipeline_mode = #tpu.pipeline_mode<synchronous>, transform_indices = @transform_1, window_bounds = array<i64: 32, 64>}, {pipeline_mode = #tpu.pipeline_mode<synchronous>, transform_indices = @transform_2, window_bounds = array<i64: 1, 64>}, {pipeline_mode = #tpu.pipeline_mode<synchronous>, transform_indices = @transform_3, window_bounds = array<i64: 64, 32>}, {pipeline_mode = #tpu.pipeline_mode<synchronous>, transform_indices = @transform_4, window_bounds = array<i64: 1, 32>}, {pipeline_mode = #tpu.pipeline_mode<synchronous>, transform_indices = @transform_5, window_bounds = array<i64: 1, 32>}, {pipeline_mode = #tpu.pipeline_mode<synchronous>, transform_indices = @transform_6, window_bounds = array<i64: 1, 32>}, {transform_indices = @transform_7, window_bounds = array<i64: 32, 32>}]} {
    %c0 = arith.constant 0 : index
    %c0_0 = arith.constant 0 : index
    %0 = vector.load %arg1[%c0, %c0_0] : memref<32x32xf32, #tpu.memory_space<vmem>>, vector<32x32xf32>
    %1 = arith.truncf %0 : vector<32x32xf32> to vector<32x32xbf16>
    %c0_1 = arith.constant 0 : index
    %c0_2 = arith.constant 0 : index
    %2 = vector.load %arg2[%c0_1, %c0_2] : memref<32x64xbf16, #tpu.memory_space<vmem>>, vector<32x64xbf16>
    %cst = arith.constant dense<0.000000e+00> : vector<32x64xf32>
    %3 = tpu.matmul %1, %2, %cst {dimension_numbers = #tpu.dot_dimension_numbers<[1], [0], [0], [1], [0, 0, 1, 1], [], []>} : vector<32x32xbf16>, vector<32x64xbf16>, vector<32x64xf32> -> vector<32x64xf32>
    %c0_3 = arith.constant 0 : index
    %c0_4 = arith.constant 0 : index
    %4 = vector.load %arg3[%c0_3, %c0_4] : memref<1x64xf32, #tpu.memory_space<vmem>>, vector<1x64xf32>
    %5 = vector.broadcast %4 : vector<1x64xf32> to vector<32x64xf32>
    %6 = arith.addf %3, %5 : vector<32x64xf32>
    %cst_5 = arith.constant 0.000000e+00 : f32
    %7 = vector.broadcast %cst_5 : f32 to vector<32x64xf32>
    %8 = arith.maximumf %6, %7 : vector<32x64xf32>
    %9 = arith.truncf %8 : vector<32x64xf32> to vector<32x64xbf16>
    %c0_6 = arith.constant 0 : index
    %c0_7 = arith.constant 0 : index
    %10 = vector.load %arg4[%c0_6, %c0_7] : memref<64x32xbf16, #tpu.memory_space<vmem>>, vector<64x32xbf16>
    %cst_8 = arith.constant dense<0.000000e+00> : vector<32x32xf32>
    %11 = tpu.matmul %9, %10, %cst_8 {dimension_numbers = #tpu.dot_dimension_numbers<[1], [0], [0], [1], [0, 0, 1, 1], [], []>} : vector<32x64xbf16>, vector<64x32xbf16>, vector<32x32xf32> -> vector<32x32xf32>
    %c0_9 = arith.constant 0 : index
    %c0_10 = arith.constant 0 : index
    %12 = vector.load %arg5[%c0_9, %c0_10] : memref<1x32xf32, #tpu.memory_space<vmem>>, vector<1x32xf32>
    %13 = vector.broadcast %12 : vector<1x32xf32> to vector<32x32xf32>
    %14 = arith.addf %11, %13 : vector<32x32xf32>
    %15 = arith.addf %14, %0 : vector<32x32xf32>
    %cst_11 = arith.constant dense<0.000000e+00> : vector<32xf32>
    %16 = vector.multi_reduction <add>, %15, %cst_11 [1] : vector<32x32xf32> to vector<32xf32>
    %17 = vector.shape_cast %16 : vector<32xf32> to vector<32x1xf32>
    %cst_12 = arith.constant 3.200000e+01 : f32
    %18 = vector.broadcast %cst_12 : f32 to vector<32x1xf32>
    %19 = arith.divf %17, %18 : vector<32x1xf32>
    %20 = vector.broadcast %19 : vector<32x1xf32> to vector<32x32xf32>
    %21 = arith.subf %15, %20 : vector<32x32xf32>
    %22 = arith.mulf %21, %21 : vector<32x32xf32>
    %cst_13 = arith.constant dense<0.000000e+00> : vector<32xf32>
    %23 = vector.multi_reduction <add>, %22, %cst_13 [1] : vector<32x32xf32> to vector<32xf32>
    %24 = vector.shape_cast %23 : vector<32xf32> to vector<32x1xf32>
    %cst_14 = arith.constant 3.200000e+01 : f32
    %25 = vector.broadcast %cst_14 : f32 to vector<32x1xf32>
    %26 = arith.divf %24, %25 : vector<32x1xf32>
    %27 = vector.broadcast %19 : vector<32x1xf32> to vector<32x32xf32>
    %28 = arith.subf %15, %27 : vector<32x32xf32>
    %cst_15 = arith.constant 9.99999974E-6 : f32
    %29 = vector.broadcast %cst_15 : f32 to vector<32x1xf32>
    %30 = arith.addf %26, %29 : vector<32x1xf32>
    %31 = math.rsqrt %30 : vector<32x1xf32>
    %32 = vector.broadcast %31 : vector<32x1xf32> to vector<32x32xf32>
    %33 = arith.mulf %28, %32 : vector<32x32xf32>
    %c0_16 = arith.constant 0 : index
    %c0_17 = arith.constant 0 : index
    %34 = vector.load %arg6[%c0_16, %c0_17] : memref<1x32xf32, #tpu.memory_space<vmem>>, vector<1x32xf32>
    %35 = vector.broadcast %34 : vector<1x32xf32> to vector<32x32xf32>
    %36 = arith.mulf %33, %35 : vector<32x32xf32>
    %c0_18 = arith.constant 0 : index
    %c0_19 = arith.constant 0 : index
    %37 = vector.load %arg7[%c0_18, %c0_19] : memref<1x32xf32, #tpu.memory_space<vmem>>, vector<1x32xf32>
    %38 = vector.broadcast %37 : vector<1x32xf32> to vector<32x32xf32>
    %39 = arith.addf %36, %38 : vector<32x32xf32>
    %c0_20 = arith.constant 0 : index
    %c0_21 = arith.constant 0 : index
    %40 = vector.load %arg8[%c0_20, %c0_21] : memref<32x32xf32, #tpu.memory_space<vmem>>, vector<32x32xf32>
    tpu.vector_store %arg8[%c0_20, %c0_21], %39 {strides = array<i32>} : memref<32x32xf32, #tpu.memory_space<vmem>>, vector<32x32xf32>,
    return
  }
  func.func @transform_0(%arg0: i32) -> (i32, i32) {
    %c0_i32 = arith.constant 0 : i32
    %c0_i32_0 = arith.constant 0 : i32
    return %arg0, %c0_i32 : i32, i32
  }
  func.func @transform_1(%arg0: i32) -> (i32, i32) {
    %c0_i32 = arith.constant 0 : i32
    %c0_i32_0 = arith.constant 0 : i32
    %c0_i32_1 = arith.constant 0 : i32
    return %c0_i32, %c0_i32_0 : i32, i32
  }
  func.func @transform_2(%arg0: i32) -> (i32, i32) {
    %c0_i32 = arith.constant 0 : i32
    %c0_i32_0 = arith.constant 0 : i32
    %c0_i32_1 = arith.constant 0 : i32
    return %c0_i32, %c0_i32_0 : i32, i32
  }
  func.func @transform_3(%arg0: i32) -> (i32, i32) {
    %c0_i32 = arith.constant 0 : i32
    %c0_i32_0 = arith.constant 0 : i32
    %c0_i32_1 = arith.constant 0 : i32
    return %c0_i32, %c0_i32_0 : i32, i32
  }
  func.func @transform_4(%arg0: i32) -> (i32, i32) {
    %c0_i32 = arith.constant 0 : i32
    %c0_i32_0 = arith.constant 0 : i32
    %c0_i32_1 = arith.constant 0 : i32
    return %c0_i32, %c0_i32_0 : i32, i32
  }
  func.func @transform_5(%arg0: i32) -> (i32, i32) {
    %c0_i32 = arith.constant 0 : i32
    %c0_i32_0 = arith.constant 0 : i32
    %c0_i32_1 = arith.constant 0 : i32
    return %c0_i32, %c0_i32_0 : i32, i32
  }
  func.func @transform_6(%arg0: i32) -> (i32, i32) {
    %c0_i32 = arith.constant 0 : i32
    %c0_i32_0 = arith.constant 0 : i32
    %c0_i32_1 = arith.constant 0 : i32
    return %c0_i32, %c0_i32_0 : i32, i32
  }
  func.func @transform_7(%arg0: i32) -> (i32, i32) {
    %c0_i32 = arith.constant 0 : i32
    %c0_i32_0 = arith.constant 0 : i32
    return %arg0, %c0_i32 : i32, i32
  }
}

module attributes {stable_mosaic.version = 11 : i64} {
  func.func @_matmul_bias_kernel_single_k(%arg0: i32, %arg1: i32, %arg2: memref<32x32xbf16, #tpu.memory_space<vmem>>, %arg3: memref<32x64xbf16, #tpu.memory_space<vmem>>, %arg4: memref<1x64xf32, #tpu.memory_space<vmem>>, %arg5: memref<32x64xbf16, #tpu.memory_space<vmem>>) attributes {dimension_semantics = [#tpu.dimension_semantics<parallel>, #tpu.dimension_semantics<parallel>], iteration_bounds = array<i64: 1, 1>, scalar_prefetch = 0 : i64, scratch_operands = 0 : i64, tpu.core_type = #tpu.core_type<tc>, window_params = [{transform_indices = @transform_0, window_bounds = array<i64: 32, 32>}, {transform_indices = @transform_1, window_bounds = array<i64: 32, 64>}, {transform_indices = @transform_2, window_bounds = array<i64: 1, 64>}, {transform_indices = @transform_3, window_bounds = array<i64: 32, 64>}]} {
    %c0 = arith.constant 0 : index
    %c0_0 = arith.constant 0 : index
    %0 = vector.load %arg2[%c0, %c0_0] : memref<32x32xbf16, #tpu.memory_space<vmem>>, vector<32x32xbf16>
    %c0_1 = arith.constant 0 : index
    %c0_2 = arith.constant 0 : index
    %1 = vector.load %arg3[%c0_1, %c0_2] : memref<32x64xbf16, #tpu.memory_space<vmem>>, vector<32x64xbf16>
    %cst = arith.constant dense<0.000000e+00> : vector<32x64xf32>
    %2 = tpu.matmul %0, %1, %cst {dimension_numbers = #tpu.dot_dimension_numbers<[1], [0], [0], [1], [0, 0, 1, 1], [], []>} : vector<32x32xbf16>, vector<32x64xbf16>, vector<32x64xf32> -> vector<32x64xf32>
    %c0_3 = arith.constant 0 : index
    %c0_4 = arith.constant 0 : index
    %3 = vector.load %arg4[%c0_3, %c0_4] : memref<1x64xf32, #tpu.memory_space<vmem>>, vector<1x64xf32>
    %4 = vector.broadcast %3 : vector<1x64xf32> to vector<32x64xf32>
    %5 = arith.addf %2, %4 : vector<32x64xf32>
    %6 = arith.truncf %5 : vector<32x64xf32> to vector<32x64xbf16>
    %c0_5 = arith.constant 0 : index
    %c0_6 = arith.constant 0 : index
    %7 = vector.load %arg5[%c0_5, %c0_6] : memref<32x64xbf16, #tpu.memory_space<vmem>>, vector<32x64xbf16>
    tpu.vector_store %arg5[%c0_5, %c0_6], %6 {strides = array<i32>} : memref<32x64xbf16, #tpu.memory_space<vmem>>, vector<32x64xbf16>,
    return
  }
  func.func @transform_0(%arg0: i32, %arg1: i32) -> (i32, i32) {
    %c0_i32 = arith.constant 0 : i32
    %c0_i32_0 = arith.constant 0 : i32
    return %arg0, %c0_i32 : i32, i32
  }
  func.func @transform_1(%arg0: i32, %arg1: i32) -> (i32, i32) {
    %c0_i32 = arith.constant 0 : i32
    %c0_i32_0 = arith.constant 0 : i32
    return %c0_i32, %arg1 : i32, i32
  }
  func.func @transform_2(%arg0: i32, %arg1: i32) -> (i32, i32) {
    %c0_i32 = arith.constant 0 : i32
    %c0_i32_0 = arith.constant 0 : i32
    return %c0_i32, %arg1 : i32, i32
  }
  func.func @transform_3(%arg0: i32, %arg1: i32) -> (i32, i32) {
    %c0_i32 = arith.constant 0 : i32
    return %arg0, %arg1 : i32, i32
  }
}

module attributes {stable_mosaic.version = 11 : i64} {
  func.func @_mha_kernel(%arg0: i32, %arg1: memref<2xi32, #tpu.memory_space<smem>>, %arg2: memref<1x8x32xbf16, #tpu.memory_space<vmem>>, %arg3: memref<1x16x64xbf16, #tpu.memory_space<vmem>>, %arg4: memref<1x8x32xbf16, #tpu.memory_space<vmem>>) attributes {dimension_semantics = [#tpu.dimension_semantics<parallel>], iteration_bounds = array<i64: 2>, scalar_prefetch = 1 : i64, scratch_operands = 0 : i64, tpu.core_type = #tpu.core_type<tc>, window_params = [{transform_indices = @transform_0, window_bounds = array<i64: 1, 8, 32>}, {transform_indices = @transform_1, window_bounds = array<i64: 1, 16, 64>}, {transform_indices = @transform_2, window_bounds = array<i64: 1, 8, 32>}]} {
    %0 = arith.index_cast %arg0 : i32 to index
    %1 = memref.load %arg1[%0] : memref<2xi32, #tpu.memory_space<smem>>
    %c0 = arith.constant 0 : index
    %c0_0 = arith.constant 0 : index
    %c0_1 = arith.constant 0 : index
    %2 = vector.load %arg2[%c0, %c0_0, %c0_1] : memref<1x8x32xbf16, #tpu.memory_space<vmem>>, vector<1x8x32xbf16>
    %3 = vector.shape_cast %2 : vector<1x8x32xbf16> to vector<8x32xbf16>
    %cst = arith.constant 3.535160e-01 : bf16
    %4 = vector.broadcast %cst : bf16 to vector<8x32xbf16>
    %5 = arith.mulf %3, %4 : vector<8x32xbf16>
    %c0_2 = arith.constant 0 : index
    %c0_3 = arith.constant 0 : index
    %c0_4 = arith.constant 0 : index
    %6 = vector.load %arg3[%c0_2, %c0_3, %c0_4] : memref<1x16x64xbf16, #tpu.memory_space<vmem>>, vector<1x16x64xbf16>
    %7 = vector.shape_cast %6 : vector<1x16x64xbf16> to vector<16x64xbf16>
    %8 = tpu.iota {dimensions = array<i32: 1>} : vector<8x16xi32>
    %9 = vector.broadcast %1 : i32 to vector<8x16xi32>
    %10 = arith.cmpi sge, %8, %9 : vector<8x16xi32>
    %11 = vector.extract_strided_slice %5 {offsets = [0, 0], sizes = [8, 8], strides = [1, 1]} : vector<8x32xbf16> to vector<8x8xbf16>
    %12 = vector.extract_strided_slice %7 {offsets = [0, 0], sizes = [16, 8], strides = [1, 1]} : vector<16x64xbf16> to vector<16x8xbf16>
    %13 = vector.extract_strided_slice %7 {offsets = [0, 32], sizes = [16, 8], strides = [1, 1]} : vector<16x64xbf16> to vector<16x8xbf16>
    %cst_5 = arith.constant dense<0.000000e+00> : vector<8x16xf32>
    %14 = tpu.matmul %11, %12, %cst_5 {dimension_numbers = #tpu.dot_dimension_numbers<[1], [1], [0], [0], [0, 0, 1, 0], [], []>} : vector<8x8xbf16>, vector<16x8xbf16>, vector<8x16xf32> -> vector<8x16xf32>
    %cst_6 = arith.constant -1.000000e+09 : f32
    %15 = vector.broadcast %cst_6 : f32 to vector<8x16xf32>
    %16 = arith.select %10, %15, %14 : vector<8x16xi1>, vector<8x16xf32>
    %cst_7 = arith.constant dense<0xFF800000> : vector<8xf32>
    %17 = vector.multi_reduction <maximumf>, %16, %cst_7 [1] : vector<8x16xf32> to vector<8xf32>
    %18 = vector.shape_cast %17 : vector<8xf32> to vector<8x1xf32>
    %19 = vector.broadcast %18 : vector<8x1xf32> to vector<8x16xf32>
    %20 = arith.subf %16, %19 : vector<8x16xf32>
    %21 = math.exp %20 : vector<8x16xf32>
    %cst_8 = arith.constant dense<0.000000e+00> : vector<8xf32>
    %22 = vector.multi_reduction <add>, %21, %cst_8 [1] : vector<8x16xf32> to vector<8xf32>
    %23 = vector.shape_cast %22 : vector<8xf32> to vector<8x1xf32>
    %24 = tpu.reciprocal %23 {approx = true} : vector<8x1xf32> -> vector<8x1xf32>
    %25 = vector.broadcast %24 : vector<8x1xf32> to vector<8x16xf32>
    %26 = arith.mulf %21, %25 : vector<8x16xf32>
    %27 = arith.truncf %26 : vector<8x16xf32> to vector<8x16xbf16>
    %cst_9 = arith.constant dense<0.000000e+00> : vector<8x8xf32>
    %28 = tpu.matmul %27, %13, %cst_9 {dimension_numbers = #tpu.dot_dimension_numbers<[1], [0], [0], [1], [0, 0, 1, 1], [], []>} : vector<8x16xbf16>, vector<16x8xbf16>, vector<8x8xf32> -> vector<8x8xf32>
    %29 = vector.extract_strided_slice %5 {offsets = [0, 8], sizes = [8, 8], strides = [1, 1]} : vector<8x32xbf16> to vector<8x8xbf16>
    %30 = vector.extract_strided_slice %7 {offsets = [0, 8], sizes = [16, 8], strides = [1, 1]} : vector<16x64xbf16> to vector<16x8xbf16>
    %31 = vector.extract_strided_slice %7 {offsets = [0, 40], sizes = [16, 8], strides = [1, 1]} : vector<16x64xbf16> to vector<16x8xbf16>
    %cst_10 = arith.constant dense<0.000000e+00> : vector<8x16xf32>
    %32 = tpu.matmul %29, %30, %cst_10 {dimension_numbers = #tpu.dot_dimension_numbers<[1], [1], [0], [0], [0, 0, 1, 0], [], []>} : vector<8x8xbf16>, vector<16x8xbf16>, vector<8x16xf32> -> vector<8x16xf32>
    %cst_11 = arith.constant -1.000000e+09 : f32
    %33 = vector.broadcast %cst_11 : f32 to vector<8x16xf32>
    %34 = arith.select %10, %33, %32 : vector<8x16xi1>, vector<8x16xf32>
    %cst_12 = arith.constant dense<0xFF800000> : vector<8xf32>
    %35 = vector.multi_reduction <maximumf>, %34, %cst_12 [1] : vector<8x16xf32> to vector<8xf32>
    %36 = vector.shape_cast %35 : vector<8xf32> to vector<8x1xf32>
    %37 = vector.broadcast %36 : vector<8x1xf32> to vector<8x16xf32>
    %38 = arith.subf %34, %37 : vector<8x16xf32>
    %39 = math.exp %38 : vector<8x16xf32>
    %cst_13 = arith.constant dense<0.000000e+00> : vector<8xf32>
    %40 = vector.multi_reduction <add>, %39, %cst_13 [1] : vector<8x16xf32> to vector<8xf32>
    %41 = vector.shape_cast %40 : vector<8xf32> to vector<8x1xf32>
    %42 = tpu.reciprocal %41 {approx = true} : vector<8x1xf32> -> vector<8x1xf32>
    %43 = vector.broadcast %42 : vector<8x1xf32> to vector<8x16xf32>
    %44 = arith.mulf %39, %43 : vector<8x16xf32>
    %45 = arith.truncf %44 : vector<8x16xf32> to vector<8x16xbf16>
    %cst_14 = arith.constant dense<0.000000e+00> : vector<8x8xf32>
    %46 = tpu.matmul %45, %31, %cst_14 {dimension_numbers = #tpu.dot_dimension_numbers<[1], [0], [0], [1], [0, 0, 1, 1], [], []>} : vector<8x16xbf16>, vector<16x8xbf16>, vector<8x8xf32> -> vector<8x8xf32>
    %47 = vector.extract_strided_slice %5 {offsets = [0, 16], sizes = [8, 8], strides = [1, 1]} : vector<8x32xbf16> to vector<8x8xbf16>
    %48 = vector.extract_strided_slice %7 {offsets = [0, 16], sizes = [16, 8], strides = [1, 1]} : vector<16x64xbf16> to vector<16x8xbf16>
    %49 = vector.extract_strided_slice %7 {offsets = [0, 48], sizes = [16, 8], strides = [1, 1]} : vector<16x64xbf16> to vector<16x8xbf16>
    %cst_15 = arith.constant dense<0.000000e+00> : vector<8x16xf32>
    %50 = tpu.matmul %47, %48, %cst_15 {dimension_numbers = #tpu.dot_dimension_numbers<[1], [1], [0], [0], [0, 0, 1, 0], [], []>} : vector<8x8xbf16>, vector<16x8xbf16>, vector<8x16xf32> -> vector<8x16xf32>
    %cst_16 = arith.constant -1.000000e+09 : f32
    %51 = vector.broadcast %cst_16 : f32 to vector<8x16xf32>
    %52 = arith.select %10, %51, %50 : vector<8x16xi1>, vector<8x16xf32>
    %cst_17 = arith.constant dense<0xFF800000> : vector<8xf32>
    %53 = vector.multi_reduction <maximumf>, %52, %cst_17 [1] : vector<8x16xf32> to vector<8xf32>
    %54 = vector.shape_cast %53 : vector<8xf32> to vector<8x1xf32>
    %55 = vector.broadcast %54 : vector<8x1xf32> to vector<8x16xf32>
    %56 = arith.subf %52, %55 : vector<8x16xf32>
    %57 = math.exp %56 : vector<8x16xf32>
    %cst_18 = arith.constant dense<0.000000e+00> : vector<8xf32>
    %58 = vector.multi_reduction <add>, %57, %cst_18 [1] : vector<8x16xf32> to vector<8xf32>
    %59 = vector.shape_cast %58 : vector<8xf32> to vector<8x1xf32>
    %60 = tpu.reciprocal %59 {approx = true} : vector<8x1xf32> -> vector<8x1xf32>
    %61 = vector.broadcast %60 : vector<8x1xf32> to vector<8x16xf32>
    %62 = arith.mulf %57, %61 : vector<8x16xf32>
    %63 = arith.truncf %62 : vector<8x16xf32> to vector<8x16xbf16>
    %cst_19 = arith.constant dense<0.000000e+00> : vector<8x8xf32>
    %64 = tpu.matmul %63, %49, %cst_19 {dimension_numbers = #tpu.dot_dimension_numbers<[1], [0], [0], [1], [0, 0, 1, 1], [], []>} : vector<8x16xbf16>, vector<16x8xbf16>, vector<8x8xf32> -> vector<8x8xf32>
    %65 = vector.extract_strided_slice %5 {offsets = [0, 24], sizes = [8, 8], strides = [1, 1]} : vector<8x32xbf16> to vector<8x8xbf16>
    %66 = vector.extract_strided_slice %7 {offsets = [0, 24], sizes = [16, 8], strides = [1, 1]} : vector<16x64xbf16> to vector<16x8xbf16>
    %67 = vector.extract_strided_slice %7 {offsets = [0, 56], sizes = [16, 8], strides = [1, 1]} : vector<16x64xbf16> to vector<16x8xbf16>
    %cst_20 = arith.constant dense<0.000000e+00> : vector<8x16xf32>
    %68 = tpu.matmul %65, %66, %cst_20 {dimension_numbers = #tpu.dot_dimension_numbers<[1], [1], [0], [0], [0, 0, 1, 0], [], []>} : vector<8x8xbf16>, vector<16x8xbf16>, vector<8x16xf32> -> vector<8x16xf32>
    %cst_21 = arith.constant -1.000000e+09 : f32
    %69 = vector.broadcast %cst_21 : f32 to vector<8x16xf32>
    %70 = arith.select %10, %69, %68 : vector<8x16xi1>, vector<8x16xf32>
    %cst_22 = arith.constant dense<0xFF800000> : vector<8xf32>
    %71 = vector.multi_reduction <maximumf>, %70, %cst_22 [1] : vector<8x16xf32> to vector<8xf32>
    %72 = vector.shape_cast %71 : vector<8xf32> to vector<8x1xf32>
    %73 = vector.broadcast %72 : vector<8x1xf32> to vector<8x16xf32>
    %74 = arith.subf %70, %73 : vector<8x16xf32>
    %75 = math.exp %74 : vector<8x16xf32>
    %cst_23 = arith.constant dense<0.000000e+00> : vector<8xf32>
    %76 = vector.multi_reduction <add>, %75, %cst_23 [1] : vector<8x16xf32> to vector<8xf32>
    %77 = vector.shape_cast %76 : vector<8xf32> to vector<8x1xf32>
    %78 = tpu.reciprocal %77 {approx = true} : vector<8x1xf32> -> vector<8x1xf32>
    %79 = vector.broadcast %78 : vector<8x1xf32> to vector<8x16xf32>
    %80 = arith.mulf %75, %79 : vector<8x16xf32>
    %81 = arith.truncf %80 : vector<8x16xf32> to vector<8x16xbf16>
    %cst_24 = arith.constant dense<0.000000e+00> : vector<8x8xf32>
    %82 = tpu.matmul %81, %67, %cst_24 {dimension_numbers = #tpu.dot_dimension_numbers<[1], [0], [0], [1], [0, 0, 1, 1], [], []>} : vector<8x16xbf16>, vector<16x8xbf16>, vector<8x8xf32> -> vector<8x8xf32>
    %83 = tpu.concatenate %28, %46, %64, %82 in 1 : vector<8x8xf32>, vector<8x8xf32>, vector<8x8xf32>, vector<8x8xf32> -> vector<8x32xf32>
    %84 = arith.truncf %83 : vector<8x32xf32> to vector<8x32xbf16>
    %c0_25 = arith.constant 0 : index
    %c0_26 = arith.constant 0 : index
    %c0_27 = arith.constant 0 : index
    %85 = vector.load %arg4[%c0_25, %c0_26, %c0_27] : memref<1x8x32xbf16, #tpu.memory_space<vmem>>, vector<1x8x32xbf16>
    %86 = vector.shape_cast %85 : vector<1x8x32xbf16> to vector<8x32xbf16>
    %87 = vector.shape_cast %84 : vector<8x32xbf16> to vector<1x8x32xbf16>
    tpu.vector_store %arg4[%c0_25, %c0_26, %c0_27], %87 {strides = array<i32>} : memref<1x8x32xbf16, #tpu.memory_space<vmem>>, vector<1x8x32xbf16>,
    return
  }
  func.func @transform_0(%arg0: i32, %arg1: memref<2xi32, #tpu.memory_space<smem>>) -> (i32, i32, i32) {
    %c0_i32 = arith.constant 0 : i32
    %c0_i32_0 = arith.constant 0 : i32
    %c0_i32_1 = arith.constant 0 : i32
    return %arg0, %c0_i32, %c0_i32_0 : i32, i32, i32
  }
  func.func @transform_1(%arg0: i32, %arg1: memref<2xi32, #tpu.memory_space<smem>>) -> (i32, i32, i32) {
    %c0_i32 = arith.constant 0 : i32
    %c0_i32_0 = arith.constant 0 : i32
    %c0_i32_1 = arith.constant 0 : i32
    return %arg0, %c0_i32, %c0_i32_0 : i32, i32, i32
  }
  func.func @transform_2(%arg0: i32, %arg1: memref<2xi32, #tpu.memory_space<smem>>) -> (i32, i32, i32) {
    %c0_i32 = arith.constant 0 : i32
    %c0_i32_0 = arith.constant 0 : i32
    %c0_i32_1 = arith.constant 0 : i32
    return %arg0, %c0_i32, %c0_i32_0 : i32, i32, i32
  }
}

module attributes {stable_mosaic.version = 11 : i64} {
  func.func @_ffn_add_ln_kernel(%arg0: i32, %arg1: memref<16x32xf32, #tpu.memory_space<vmem>>, %arg2: memref<32x64xbf16, #tpu.memory_space<vmem>>, %arg3: memref<1x64xf32, #tpu.memory_space<vmem>>, %arg4: memref<64x32xbf16, #tpu.memory_space<vmem>>, %arg5: memref<1x32xf32, #tpu.memory_space<vmem>>, %arg6: memref<1x32xf32, #tpu.memory_space<vmem>>, %arg7: memref<1x32xf32, #tpu.memory_space<vmem>>, %arg8: memref<16x32xf32, #tpu.memory_space<vmem>>) attributes {dimension_semantics = [#tpu.dimension_semantics<parallel>], iteration_bounds = array<i64: 1>, scalar_prefetch = 0 : i64, scratch_operands = 0 : i64, tpu.core_type = #tpu.core_type<tc>, window_params = [{transform_indices = @transform_0, window_bounds = array<i64: 16, 32>}, {pipeline_mode = #tpu.pipeline_mode<synchronous>, transform_indices = @transform_1, window_bounds = array<i64: 32, 64>}, {pipeline_mode = #tpu.pipeline_mode<synchronous>, transform_indices = @transform_2, window_bounds = array<i64: 1, 64>}, {pipeline_mode = #tpu.pipeline_mode<synchronous>, transform_indices = @transform_3, window_bounds = array<i64: 64, 32>}, {pipeline_mode = #tpu.pipeline_mode<synchronous>, transform_indices = @transform_4, window_bounds = array<i64: 1, 32>}, {pipeline_mode = #tpu.pipeline_mode<synchronous>, transform_indices = @transform_5, window_bounds = array<i64: 1, 32>}, {pipeline_mode = #tpu.pipeline_mode<synchronous>, transform_indices = @transform_6, window_bounds = array<i64: 1, 32>}, {transform_indices = @transform_7, window_bounds = array<i64: 16, 32>}]} {
    %c0 = arith.constant 0 : index
    %c0_0 = arith.constant 0 : index
    %0 = vector.load %arg1[%c0, %c0_0] : memref<16x32xf32, #tpu.memory_space<vmem>>, vector<16x32xf32>
    %1 = arith.truncf %0 : vector<16x32xf32> to vector<16x32xbf16>
    %c0_1 = arith.constant 0 : index
    %c0_2 = arith.constant 0 : index
    %2 = vector.load %arg2[%c0_1, %c0_2] : memref<32x64xbf16, #tpu.memory_space<vmem>>, vector<32x64xbf16>
    %cst = arith.constant dense<0.000000e+00> : vector<16x64xf32>
    %3 = tpu.matmul %1, %2, %cst {dimension_numbers = #tpu.dot_dimension_numbers<[1], [0], [0], [1], [0, 0, 1, 1], [], []>} : vector<16x32xbf16>, vector<32x64xbf16>, vector<16x64xf32> -> vector<16x64xf32>
    %c0_3 = arith.constant 0 : index
    %c0_4 = arith.constant 0 : index
    %4 = vector.load %arg3[%c0_3, %c0_4] : memref<1x64xf32, #tpu.memory_space<vmem>>, vector<1x64xf32>
    %5 = vector.broadcast %4 : vector<1x64xf32> to vector<16x64xf32>
    %6 = arith.addf %3, %5 : vector<16x64xf32>
    %cst_5 = arith.constant 0.000000e+00 : f32
    %7 = vector.broadcast %cst_5 : f32 to vector<16x64xf32>
    %8 = arith.maximumf %6, %7 : vector<16x64xf32>
    %9 = arith.truncf %8 : vector<16x64xf32> to vector<16x64xbf16>
    %c0_6 = arith.constant 0 : index
    %c0_7 = arith.constant 0 : index
    %10 = vector.load %arg4[%c0_6, %c0_7] : memref<64x32xbf16, #tpu.memory_space<vmem>>, vector<64x32xbf16>
    %cst_8 = arith.constant dense<0.000000e+00> : vector<16x32xf32>
    %11 = tpu.matmul %9, %10, %cst_8 {dimension_numbers = #tpu.dot_dimension_numbers<[1], [0], [0], [1], [0, 0, 1, 1], [], []>} : vector<16x64xbf16>, vector<64x32xbf16>, vector<16x32xf32> -> vector<16x32xf32>
    %c0_9 = arith.constant 0 : index
    %c0_10 = arith.constant 0 : index
    %12 = vector.load %arg5[%c0_9, %c0_10] : memref<1x32xf32, #tpu.memory_space<vmem>>, vector<1x32xf32>
    %13 = vector.broadcast %12 : vector<1x32xf32> to vector<16x32xf32>
    %14 = arith.addf %11, %13 : vector<16x32xf32>
    %15 = arith.addf %14, %0 : vector<16x32xf32>
    %cst_11 = arith.constant dense<0.000000e+00> : vector<16xf32>
    %16 = vector.multi_reduction <add>, %15, %cst_11 [1] : vector<16x32xf32> to vector<16xf32>
    %17 = vector.shape_cast %16 : vector<16xf32> to vector<16x1xf32>
    %cst_12 = arith.constant 3.200000e+01 : f32
    %18 = vector.broadcast %cst_12 : f32 to vector<16x1xf32>
    %19 = arith.divf %17, %18 : vector<16x1xf32>
    %20 = vector.broadcast %19 : vector<16x1xf32> to vector<16x32xf32>
    %21 = arith.subf %15, %20 : vector<16x32xf32>
    %22 = arith.mulf %21, %21 : vector<16x32xf32>
    %cst_13 = arith.constant dense<0.000000e+00> : vector<16xf32>
    %23 = vector.multi_reduction <add>, %22, %cst_13 [1] : vector<16x32xf32> to vector<16xf32>
    %24 = vector.shape_cast %23 : vector<16xf32> to vector<16x1xf32>
    %cst_14 = arith.constant 3.200000e+01 : f32
    %25 = vector.broadcast %cst_14 : f32 to vector<16x1xf32>
    %26 = arith.divf %24, %25 : vector<16x1xf32>
    %27 = vector.broadcast %19 : vector<16x1xf32> to vector<16x32xf32>
    %28 = arith.subf %15, %27 : vector<16x32xf32>
    %cst_15 = arith.constant 9.99999974E-6 : f32
    %29 = vector.broadcast %cst_15 : f32 to vector<16x1xf32>
    %30 = arith.addf %26, %29 : vector<16x1xf32>
    %31 = math.rsqrt %30 : vector<16x1xf32>
    %32 = vector.broadcast %31 : vector<16x1xf32> to vector<16x32xf32>
    %33 = arith.mulf %28, %32 : vector<16x32xf32>
    %c0_16 = arith.constant 0 : index
    %c0_17 = arith.constant 0 : index
    %34 = vector.load %arg6[%c0_16, %c0_17] : memref<1x32xf32, #tpu.memory_space<vmem>>, vector<1x32xf32>
    %35 = vector.broadcast %34 : vector<1x32xf32> to vector<16x32xf32>
    %36 = arith.mulf %33, %35 : vector<16x32xf32>
    %c0_18 = arith.constant 0 : index
    %c0_19 = arith.constant 0 : index
    %37 = vector.load %arg7[%c0_18, %c0_19] : memref<1x32xf32, #tpu.memory_space<vmem>>, vector<1x32xf32>
    %38 = vector.broadcast %37 : vector<1x32xf32> to vector<16x32xf32>
    %39 = arith.addf %36, %38 : vector<16x32xf32>
    %c0_20 = arith.constant 0 : index
    %c0_21 = arith.constant 0 : index
    %40 = vector.load %arg8[%c0_20, %c0_21] : memref<16x32xf32, #tpu.memory_space<vmem>>, vector<16x32xf32>
    tpu.vector_store %arg8[%c0_20, %c0_21], %39 {strides = array<i32>} : memref<16x32xf32, #tpu.memory_space<vmem>>, vector<16x32xf32>,
    return
  }
  func.func @transform_0(%arg0: i32) -> (i32, i32) {
    %c0_i32 = arith.constant 0 : i32
    %c0_i32_0 = arith.constant 0 : i32
    return %arg0, %c0_i32 : i32, i32
  }
  func.func @transform_1(%arg0: i32) -> (i32, i32) {
    %c0_i32 = arith.constant 0 : i32
    %c0_i32_0 = arith.constant 0 : i32
    %c0_i32_1 = arith.constant 0 : i32
    return %c0_i32, %c0_i32_0 : i32, i32
  }
  func.func @transform_2(%arg0: i32) -> (i32, i32) {
    %c0_i32 = arith.constant 0 : i32
    %c0_i32_0 = arith.constant 0 : i32
    %c0_i32_1 = arith.constant 0 : i32
    return %c0_i32, %c0_i32_0 : i32, i32
  }
  func.func @transform_3(%arg0: i32) -> (i32, i32) {
    %c0_i32 = arith.constant 0 : i32
    %c0_i32_0 = arith.constant 0 : i32
    %c0_i32_1 = arith.constant 0 : i32
    return %c0_i32, %c0_i32_0 : i32, i32
  }
  func.func @transform_4(%arg0: i32) -> (i32, i32) {
    %c0_i32 = arith.constant 0 : i32
    %c0_i32_0 = arith.constant 0 : i32
    %c0_i32_1 = arith.constant 0 : i32
    return %c0_i32, %c0_i32_0 : i32, i32
  }
  func.func @transform_5(%arg0: i32) -> (i32, i32) {
    %c0_i32 = arith.constant 0 : i32
    %c0_i32_0 = arith.constant 0 : i32
    %c0_i32_1 = arith.constant 0 : i32
    return %c0_i32, %c0_i32_0 : i32, i32
  }
  func.func @transform_6(%arg0: i32) -> (i32, i32) {
    %c0_i32 = arith.constant 0 : i32
    %c0_i32_0 = arith.constant 0 : i32
    %c0_i32_1 = arith.constant 0 : i32
    return %c0_i32, %c0_i32_0 : i32, i32
  }
  func.func @transform_7(%arg0: i32) -> (i32, i32) {
    %c0_i32 = arith.constant 0 : i32
    %c0_i32_0 = arith.constant 0 : i32
    return %arg0, %c0_i32 : i32, i32
  }
}

module attributes {stable_mosaic.version = 11 : i64} {
  func.func @_matmul_bias_kernel_single_k(%arg0: i32, %arg1: i32, %arg2: memref<16x32xbf16, #tpu.memory_space<vmem>>, %arg3: memref<32x16xbf16, #tpu.memory_space<vmem>>, %arg4: memref<1x16xf32, #tpu.memory_space<vmem>>, %arg5: memref<16x16xf32, #tpu.memory_space<vmem>>) attributes {dimension_semantics = [#tpu.dimension_semantics<parallel>, #tpu.dimension_semantics<parallel>], iteration_bounds = array<i64: 1, 1>, scalar_prefetch = 0 : i64, scratch_operands = 0 : i64, tpu.core_type = #tpu.core_type<tc>, window_params = [{transform_indices = @transform_0, window_bounds = array<i64: 16, 32>}, {transform_indices = @transform_1, window_bounds = array<i64: 32, 16>}, {transform_indices = @transform_2, window_bounds = array<i64: 1, 16>}, {transform_indices = @transform_3, window_bounds = array<i64: 16, 16>}]} {
    %c0 = arith.constant 0 : index
    %c0_0 = arith.constant 0 : index
    %0 = vector.load %arg2[%c0, %c0_0] : memref<16x32xbf16, #tpu.memory_space<vmem>>, vector<16x32xbf16>
    %c0_1 = arith.constant 0 : index
    %c0_2 = arith.constant 0 : index
    %1 = vector.load %arg3[%c0_1, %c0_2] : memref<32x16xbf16, #tpu.memory_space<vmem>>, vector<32x16xbf16>
    %cst = arith.constant dense<0.000000e+00> : vector<16x16xf32>
    %2 = tpu.matmul %0, %1, %cst {dimension_numbers = #tpu.dot_dimension_numbers<[1], [0], [0], [1], [0, 0, 1, 1], [], []>} : vector<16x32xbf16>, vector<32x16xbf16>, vector<16x16xf32> -> vector<16x16xf32>
    %c0_3 = arith.constant 0 : index
    %c0_4 = arith.constant 0 : index
    %3 = vector.load %arg4[%c0_3, %c0_4] : memref<1x16xf32, #tpu.memory_space<vmem>>, vector<1x16xf32>
    %4 = vector.broadcast %3 : vector<1x16xf32> to vector<16x16xf32>
    %5 = arith.addf %2, %4 : vector<16x16xf32>
    %c0_5 = arith.constant 0 : index
    %c0_6 = arith.constant 0 : index
    %6 = vector.load %arg5[%c0_5, %c0_6] : memref<16x16xf32, #tpu.memory_space<vmem>>, vector<16x16xf32>
    tpu.vector_store %arg5[%c0_5, %c0_6], %5 {strides = array<i32>} : memref<16x16xf32, #tpu.memory_space<vmem>>, vector<16x16xf32>,
    return
  }
  func.func @transform_0(%arg0: i32, %arg1: i32) -> (i32, i32) {
    %c0_i32 = arith.constant 0 : i32
    %c0_i32_0 = arith.constant 0 : i32
    return %arg0, %c0_i32 : i32, i32
  }
  func.func @transform_1(%arg0: i32, %arg1: i32) -> (i32, i32) {
    %c0_i32 = arith.constant 0 : i32
    %c0_i32_0 = arith.constant 0 : i32
    return %c0_i32, %arg1 : i32, i32
  }
  func.func @transform_2(%arg0: i32, %arg1: i32) -> (i32, i32) {
    %c0_i32 = arith.constant 0 : i32
    %c0_i32_0 = arith.constant 0 : i32
    return %c0_i32, %arg1 : i32, i32
  }
  func.func @transform_3(%arg0: i32, %arg1: i32) -> (i32, i32) {
    %c0_i32 = arith.constant 0 : i32
    return %arg0, %arg1 : i32, i32
  }
}

</mosaic_0001>

<bundles_post_ra>
// kernel: transformer_forward.19
= control target key start
LH: loop header
LB: loop body
LE: loop exit
PB: predicated region body
PF: predicated region fallthrough
CT: control target
= control target key end

     0   :  { %v130_v0 = vmov 0.0   ;;  %vm131_vm0 = vmmov 0   ;;  %vm45_vm1 = vcmask 261120   ;;  %vm98_vm2 = vcmask 781312   ;;  %s170_s1 = inlined_call_operand.vmem [shape: bf16[32,96], index: 1, kind: input, shape index: {}]   ;;  %s171_s0 = inlined_call_operand.vmem [shape: bf16[16,32], index: 0, kind: input, shape index: {}]   ;;  %s172_s2 = inlined_call_operand.vmem [shape: f32[1,96], index: 2, kind: input, shape index: {}]   ;;  %s173_s3 = inlined_call_operand.vmem [shape: bf16[16,96], index: 3, kind: output, shape index: {}]  }
   0x1   :  { %117 = vmatprep.subr.bf16.mxu0 %v130_v0  ;;  %v127_v1 = vld [vmem:[%s170_s1] sm:$0xff]   ;;  %121 = vmatprep.mubr.msk.bf16.mxu0 %vm131_vm0, %v130_v0  ;;  %v128_v2 = vld [vmem:[%s170_s1 + $0x8] sm:$0xff]  }
   0x2   :  { %118 = vmatpush3.bf16.msra.mxu0 %v127_v1  ;;  %v129_v3 = vld [vmem:[%s171_s0] sm:$0xff]  }
   0x3   :  { %119 = vmatprep.subr.bf16.mxu0 %v130_v0  ;;  %v105_v4 = vld [vmem:[%s172_s2] ss:$0 sm:$0xff] }
   0x6   :  { %120 = vmatpush3.bf16.msra.mxu0 %v128_v2 }
   0x9   :  { %122 = vmatmul.mubr.msk.bf16.vlgmr.msra.gmra.mrb[0].mxu0 %vm45_vm1, %v129_v3 }
  0xdc   :  { %v83_v5 = vpop.f32.mrb[0].mxu0 }
  0xdd   :  { %v84_v6 = vadd.f32 %v105_v4, %v83_v5  ;;  %v123_v7 = vpop.f32.mrb[1].mxu0 }
  0xde   :  { %v86_v8 = vpop.f32.mrb[2].mxu0 }
  0xdf   :  { %v112_v9 = vpack.c.bf16 %v84_v6, %v84_v6  ;;  %v87_v10 = vadd.f32 %v105_v4, %v86_v8  ;;  %v124_v11 = vpop.f32.mrb[3].mxu0 }
  0xe1   :  { %99 = vst.msk [vmem:[%s173_s3] sm:$0xf] %vm98_vm2, %v112_v9  ;;  %v113_v12 = vpack.c.bf16 %v87_v10, %v87_v10 }
  0xe3   :  { %100 = vst.msk [vmem:[%s173_s3 + $0x4] sm:$0xf] %vm98_vm2, %v113_v12 }

// kernel: transformer_forward.22
= control target key start
LH: loop header
LB: loop body
LE: loop exit
PB: predicated region body
PF: predicated region fallthrough
CT: control target
= control target key end

     0   :  { %v130_v0 = vmov 0.0   ;;  %vm131_vm0 = vmmov 0   ;;  %vm45_vm1 = vcmask 261120   ;;  %vm98_vm2 = vcmask 257024   ;;  %s170_s1 = inlined_call_operand.vmem [shape: bf16[32,32], index: 1, kind: input, shape index: {}]   ;;  %s171_s0 = inlined_call_operand.vmem [shape: bf16[16,32], index: 0, kind: input, shape index: {}]   ;;  %s172_s2 = inlined_call_operand.vmem [shape: f32[1,32], index: 2, kind: input, shape index: {}]   ;;  %s173_s3 = inlined_call_operand.vmem [shape: bf16[16,32], index: 3, kind: output, shape index: {}]  }
   0x1   :  { %117 = vmatprep.subr.bf16.mxu0 %v130_v0  ;;  %v127_v1 = vld [vmem:[%s170_s1] sm:$0xff]   ;;  %121 = vmatprep.mubr.msk.bf16.mxu0 %vm131_vm0, %v130_v0  ;;  %v128_v2 = vld [vmem:[%s170_s1 + $0x8] sm:$0xff]  }
   0x2   :  { %118 = vmatpush3.bf16.msra.mxu0 %v127_v1  ;;  %v129_v3 = vld [vmem:[%s171_s0] sm:$0xff]  }
   0x3   :  { %119 = vmatprep.subr.bf16.mxu0 %v130_v0  ;;  %v105_v4 = vld [vmem:[%s172_s2] ss:$0 sm:$0xff] }
   0x6   :  { %120 = vmatpush3.bf16.msra.mxu0 %v128_v2 }
   0x9   :  { %122 = vmatmul.mubr.msk.bf16.vlgmr.msra.gmra.mrb[0].mxu0 %vm45_vm1, %v129_v3 }
  0xdc   :  { %v83_v5 = vpop.f32.mrb[0].mxu0 }
  0xdd   :  { %v84_v6 = vadd.f32 %v105_v4, %v83_v5  ;;  %v123_v7 = vpop.f32.mrb[1].mxu0 }
  0xde   :  { %v86_v8 = vpop.f32.mrb[2].mxu0 }
  0xdf   :  { %v112_v9 = vpack.c.bf16 %v84_v6, %v84_v6  ;;  %v87_v10 = vadd.f32 %v105_v4, %v86_v8  ;;  %v124_v11 = vpop.f32.mrb[3].mxu0 }
  0xe1   :  { %99 = vst.msk [vmem:[%s173_s3] sm:$0xf] %vm98_vm2, %v112_v9  ;;  %v113_v12 = vpack.c.bf16 %v87_v10, %v87_v10 }
  0xe3   :  { %100 = vst.msk [vmem:[%s173_s3 + $0x4] sm:$0xf] %vm98_vm2, %v113_v12 }

// kernel: transformer_forward.21
= control target key start
LH: loop header
LB: loop body
LE: loop exit
PB: predicated region body
PF: predicated region fallthrough
CT: control target
= control target key end

     0   :  { %v181_v0 = vmov 0.0   ;;  %vm182_vm0 = vmmov 0   ;;  %vm54_vm1 = vcmask 261120   ;;  %s255_s1 = inlined_call_operand.vmem [shape: bf16[32,32], index: 1, kind: input, shape index: {}]   ;;  %s256_s0 = inlined_call_operand.vmem [shape: bf16[16,32], index: 0, kind: input, shape index: {}]   ;;  %s257_s2 = inlined_call_operand.vmem [shape: f32[1,32], index: 2, kind: input, shape index: {}]   ;;  %s258_s3 = inlined_call_operand.vmem [shape: f32[16,32], index: 3, kind: input, shape index: {}]   ;;  %s259_s4 = inlined_call_operand.vmem [shape: f32[1,32], index: 4, kind: input, shape index: {}]   ;;  %s260_s5 = inlined_call_operand.vmem [shape: f32[1,32], index: 5, kind: input, shape index: {}]   ;;  %s261_s6 = inlined_call_operand.vmem [shape: f32[16,32], index: 6, kind: output, shape index: {}]  }
   0x1   :  { %164 = vmatprep.subr.bf16.mxu0 %v181_v0  ;;  %v174_v1 = vld [vmem:[%s255_s1] sm:$0xff]   ;;  %168 = vmatprep.mubr.msk.bf16.mxu0 %vm182_vm0, %v181_v0  ;;  %v175_v2 = vld [vmem:[%s255_s1 + $0x8] sm:$0xff]  }
   0x2   :  { %165 = vmatpush3.bf16.msra.mxu0 %v174_v1  ;;  %v176_v3 = vld [vmem:[%s256_s0] sm:$0xff]   ;;  %v100_v10 = vld [vmem:[%s258_s3 + $0x8] sm:$0xff] }
   0x3   :  { %166 = vmatprep.subr.bf16.mxu0 %v181_v0  ;;  %v154_v4 = vld [vmem:[%s257_s2] ss:$0 sm:$0xff] }
   0x4   :  { %v99_v6 = vld [vmem:[%s258_s3] sm:$0xff] }
   0x5   :  { %v159_v34 = vld [vmem:[%s259_s4] ss:$0 sm:$0xff] }
   0x6   :  { %167 = vmatpush3.bf16.msra.mxu0 %v175_v2  ;;  %v160_v36 = vld [vmem:[%s260_s5] ss:$0 sm:$0xff] }
   0x9   :  { %169 = vmatmul.mubr.msk.bf16.vlgmr.msra.gmra.mrb[0].mxu0 %vm54_vm1, %v176_v3 }
  0xdc   :  { %v92_v5 = vpop.f32.mrb[0].mxu0 }
  0xdd   :  { %v93_v7 = vadd.f32 %v154_v4, %v92_v5  ;;  %v170_v8 = vpop.f32.mrb[1].mxu0 }
  0xde   :  { %v95_v9 = vpop.f32.mrb[2].mxu0 }
  0xdf   :  { %v96_v11 = vadd.f32 %v154_v4, %v95_v9  ;;  %v171_v12 = vpop.f32.mrb[3].mxu0  ;;  %v101_v13 = vadd.f32 %v99_v6, %v93_v7 }
  0xe1   :  { %v103_v14 = vsel %vm54_vm1, %v101_v13, 0.0  ;;  %v102_v15 = vadd.f32 %v100_v10, %v96_v11 }
  0xe2   :  { %104 = vadd.xlane.f32.xlu0 %v103_v14 }
  0xe3   :  { %v106_v16 = vsel %vm54_vm1, %v102_v15, 0.0 }
  0xe6   :  { %107 = vadd.xlane.f32.xlu0 %v106_v16 }
 0x16f   :  { %v105_v17 = vpop.xlane.xlu0 %104 }
 0x170   :  { %v110_v18 = vmul.f32 0.03125, %v105_v17 }
 0x172   :  { %v112_v19 = vsub.f32 %v101_v13, %v110_v18 }
 0x173   :  { %v108_v20 = vpop.xlane.xlu0 %107 }
 0x174   :  { %v111_v21 = vmul.f32 0.03125, %v108_v20  ;;  %v114_v22 = vmul.f32 %v112_v19, %v112_v19 }
 0x176   :  { %v113_v23 = vsub.f32 %v102_v15, %v111_v21  ;;  %v116_v24 = vsel %vm54_vm1, %v114_v22, 0.0 }
 0x177   :  { %117 = vadd.xlane.f32.xlu1 %v116_v24 }
 0x178   :  { %v115_v25 = vmul.f32 %v113_v23, %v113_v23 }
 0x17a   :  { %v119_v26 = vsel %vm54_vm1, %v115_v25, 0.0 }
 0x17b   :  { %120 = vadd.xlane.f32.xlu1 %v119_v26 }
 0x204   :  { %v118_v27 = vpop.xlane.xlu1 %117 }
 0x205   :  { %v122_v28 = vmul.f32 0.03125, %v118_v27 }
 0x207   :  { %v124_v29 = vadd.f32 1e-05, %v122_v28 }
 0x208   :  { %v121_v30 = vpop.xlane.xlu1 %120 }
 0x209   :  { %177 = vrsqrt.f32 %v124_v29  ;;  %v123_v31 = vmul.f32 0.03125, %v121_v30 }
 0x20b   :  { %v125_v32 = vadd.f32 1e-05, %v123_v31 }
 0x20d   :  { %179 = vrsqrt.f32 %v125_v32 }
 0x213   :  { %v178_v33 = vpop.eup %177 }
 0x214   :  { %v128_v35 = vmul.f32 %v178_v33, %v112_v19 }
 0x216   :  { %v137_v37 = vmul.f32 %v159_v34, %v128_v35 }
 0x217   :  { %v180_v38 = vpop.eup %179 }
 0x218   :  { %v146_v39 = vadd.f32 %v160_v36, %v137_v37  ;;  %v129_v40 = vmul.f32 %v180_v38, %v113_v23 }
 0x21a   :  { %148 = vst.msk [vmem:[%s261_s6] sm:$0xff] %vm54_vm1, %v146_v39  ;;  %v138_v41 = vmul.f32 %v159_v34, %v129_v40 }
 0x21c   :  { %v147_v42 = vadd.f32 %v160_v36, %v138_v41 }
 0x21e   :  { %149 = vst.msk [vmem:[%s261_s6 + $0x8] sm:$0xff] %vm54_vm1, %v147_v42 }

// kernel: transformer_forward.20
= control target key start
LH: loop header
LB: loop body
LE: loop exit
PB: predicated region body
PF: predicated region fallthrough
CT: control target
= control target key end

     0   :  { %s988_s0 = inlined_call_operand.vmem [shape: s32[2], index: 0, kind: input, shape index: {}]   ;;  %s989_s1 = inlined_call_operand.vmem [shape: bf16[2,8,32], index: 1, kind: input, shape index: {}]   ;;  %s990_s2 = inlined_call_operand.vmem [shape: bf16[2,8,64], index: 2, kind: input, shape index: {}]   ;;  %s991_s3 = inlined_call_operand.vmem [shape: bf16[2,8,32], index: 3, kind: output, shape index: {}]  }
   0x1   :  { %s8_s14 = sshll.u32 %s988_s0, 4  ;;  %s9_s14 = int_to_ptr.vmem [resolvable:$true] %s8_s14 }
   0x2   :  { %s832_s15 = scalar_lea.vmem %s9_s14, 16  ;;  %p837_p1 = scmp.lt.s32.totalorder %s9_s14, %s9_s14 }
   0x3   :  { %p833_p0 = scmp.ne.s32.totalorder %s9_s14, %s832_s15  ;;  %p838_p2 = scmp.lt.s32.totalorder %s832_s15, %s832_s15 }
   0x5   :  { %p839_p3 = por %p838_p2, %p837_p1 }
   0x7   :  { %p840_p4 = pnand %p839_p3, %p833_p0 }
   0x9   :  { %843 = shalt.err (!%p840_p4)  }
   0xa   :  { %s854_s16 = smov [#allocation3]  }
   0xb   :  { %11 = dma.vmem_to_smem %s9_s14, 16, %s854_s16, [#allocation2] }
   0xc   :  { %848 = dma.done.wait [#allocation2], 16 }
   0xd   :  { %849 = vsyncadd [#allocation2], 4294967280 }
   0xe   :  { %13 = sfence }
   0xf   :  { %s890_s17 = smov 0  }
  0x10 LB: > { %s710_s0 = sadd.s32 4294967295, %s852_s17   ;;  %p714_p5 = scmp.ge.s32.totalorder %s852_s17, 1  ;;  %s852_s17 = sphi %s890_s17, %s19_s17  }
  0x11   : > { %p127_p6 = scmp.lt.s32.totalorder %s852_s17, 3 }
  0x13   : > { %p128_p7 = pnand %p714_p5, %p127_p6 }
  0x14   : > { %p151_p8 = scmp.lt.s32.totalorder (!%p128_p7), %s710_s0, 1  ;;  %v855_v0 = vmov (!%p128_p7), 0.0   ;;  %vm856_vm0 = vmmov (!%p128_p7), 0   ;;  %vm177_vm1 = vcmask (!%p128_p7), 64512   ;;  %s165_s26 = sld [smem:[#allocation3 + %s710_s0]] (!%p128_p7)  ;;  %v169_v5 = vlaneseq (!%p128_p7) }
  0x15   : > { %131 = sbr.rel (%p128_p7) target bundleno = 1455 (0x5af), region = 28  ;;  %746 = vmatprep.subr.bf16.mxu0 (!%p128_p7), %v855_v0  ;;  %748 = vmatprep.mubr.msk.bf16.mxu0 (!%p128_p7), %vm856_vm0, %v855_v0  ;;  %s857_s27 = smov (!%p128_p7), 96   ;;  %vm245_vm5 = vcmask (!%p128_p7), 1043456   ;;  %vm638_vm6 = vcmask (!%p128_p7), 130048   ;;  %vm640_vm7 = vcmask (!%p128_p7), 195584   ;;  %vm643_vm8 = vcmask (!%p128_p7), 257024  }
  0x16   : > { %752 = vmatprep.subr.bf16.mxu1 (!%p128_p7), %v855_v0  ;;  %754 = vmatprep.mubr.msk.bf16.mxu1 (!%p128_p7), %vm856_vm0, %v855_v0  ;;  %v170_v6 = vand.u32 (!%p128_p7), 127, %v169_v5  ;;  %v174_v7 = vshrl.u32 (!%p128_p7), %v169_v5, 7  ;;  %s858_s28 = smov (!%p128_p7), 120   ;;  %s859_s29 = smov (!%p128_p7), 112  }
  0x17   : > { %s860_s30 = smov (!%p128_p7), 104   ;;  %s861_s4 = smov (!%p128_p7), 88  }
  0x18   : > { %vm175_vm3 = vcmp.gt.s32.totalorder (!%p128_p7), %v170_v6, %v174_v7  ;;  %s862_s5 = smov (!%p128_p7), 72   ;;  %s863_s6 = smov (!%p128_p7), 80  }
  0x19   : > { %s864_s7 = smov (!%p128_p7), 8   ;;  %s865_s8 = smov (!%p128_p7), 16  }
  0x1a   : > { %v171_v8 = vstv (!%p128_p7), %s165_s26  ;;  %s866_s9 = smov (!%p128_p7), 24  }
  0x1b   : > { %vm172_vm2 = vcmp.ge.s32.totalorder (!%p128_p7), %v170_v6, %v171_v8 }
  0x1c   : > { %s152_s18 = scalar_select %p151_p8, %s710_s0, 1  ;;  %vm919_vm4 = vmor %vm172_vm2, %vm175_vm3 }
  0x1e   : > { %s904_s19 = sshll.u32 %s152_s18, 2 }
  0x1f   : > { %s154_s22 = scalar_lea.vmem %s989_s1, %s904_s19  ;;  %s158_s25 = scalar_lea.vmem %s990_s2, %s904_s19 }
  0x20   : > { %v168_v1 = vld [vmem:[%s158_s25] sm:$0xf]  ;;  %s162_s12 = scalar_lea.vmem %s991_s3, %s904_s19 }
  0x21   : > { %v182_v2 = vsel %vm177_vm1, %v168_v1, 0  ;;  %v166_v3 = vld [vmem:[%s154_s22] sm:$0xf]  ;;  %v926_v16 = vcombine.low %v168_v1, %v168_v1 }
  0x22   : > { %747 = vmatpush3.bf16.xpose.msra.mxu0 %v182_v2  ;;  %v167_v4 = vmul.bf16 1052065461, %v166_v3 }
  0x23   : > { %764 = vmatprep.subr.bf16.mxu0 %v855_v0  ;;  %240 = vrot.lane.b32.xlu1 %v926_v16, %s857_s27 }
  0x24   : > { %v721_v17 = vcombine.low %v167_v4, %v167_v4 }
  0x27   : > { %294 = vrot.lane.b32.xlu1 %v926_v16, %s858_s28 }
  0x29   : > { %749 = vmatmul.mubr.msk.bf16.vlgmr.msra.gmra.mrb[0].mxu0 %vm177_vm1, %v167_v4 }
  0x2a   : > { %766 = vmatprep.mubr.msk.bf16.mxu0 %vm856_vm0, %v855_v0 }
  0x2b   : > { %405 = vrot.lane.b32.xlu1 %v926_v16, %s859_s29 }
  0x2f   : > { %403 = vrot.lane.b32.xlu1 %v721_v17, %s859_s29 }
  0x33   : > { %516 = vrot.lane.b32.xlu1 %v926_v16, %s860_s30 }
  0x37   : > { %514 = vrot.lane.b32.xlu1 %v721_v17, %s860_s30 }
  0x95   : > { %v241_v23 = vpop.permute.xlu1 %240 }
  0x96   : > { %v247_v24 = vsel %vm245_vm5, %v241_v23, 0 }
  0x97   : > { %753 = vmatpush3.bf16.msra.mxu1 %v247_v24 }
  0x98   : > { %758 = vmatprep.subr.bf16.mxu1 %v855_v0 }
  0x99   : > { %v295_v27 = vpop.permute.xlu1 %294 }
  0x9a   : > { %v300_v29 = vsel %vm177_vm1, %v295_v27, 0 }
  0x9d   : > { %v406_v31 = vpop.permute.xlu1 %405 }
  0x9e   : > { %v411_v34 = vsel %vm177_vm1, %v406_v31, 0 }
  0xa1   : > { %v404_v33 = vpop.permute.xlu1 %403 }
  0xa5   : > { %v517_v35 = vpop.permute.xlu1 %516 }
  0xa6   : > { %v522_v36 = vsel %vm177_vm1, %v517_v35, 0 }
  0xa9   : > { %v515_v37 = vpop.permute.xlu1 %514 }
  0xfc   : > { %v218_v10 = vpop.f32.mrb[0].mxu0 }
  0xfd   : > { %v224_v11 = vsel %vm919_vm4, -1e+09, %v218_v10  ;;  %v750_v12 = vpop.f32.mrb[1].mxu0 }
  0xfe   : > { %v221_v13 = vpop.f32.mrb[2].mxu0  ;;  %v225_v14 = vsel %vm177_vm1, %v224_v11, -inf }
  0xff   : > { %226 = vmax.xlane.f32.xlu0 %v225_v14  ;;  %v751_v15 = vpop.f32.mrb[3].mxu0 }
 0x18c   : > { %v227_v18 = vpop.xlane.xlu0 %226 }
 0x18d   : > { %v228_v19 = vsub.f32 %v224_v11, %v227_v18 }
 0x18f   : > { %v229_v20 = vmul.f32 1.442695, %v228_v19 }
 0x191   : > { %816 = vpow2.f32 %v229_v20 }
 0x19b   : > { %v817_v21 = vpop.eup %816 }
 0x19c   : > { %v231_v22 = vsel %vm177_vm1, %v817_v21, 0.0 }
 0x19d   : > { %232 = vadd.xlane.f32.xlu0 %v231_v22 }
 0x1b3   : > { %292 = vrot.lane.b32.xlu0 %v721_v17, %s858_s28 }
 0x22a   : > { %v233_v25 = vpop.xlane.xlu0 %232 }
 0x22b   : > { %818 = vrcp.f32 %v233_v25 }
 0x22e   : > { %v293_v32 = vpop.permute.xlu0 %292 }
 0x235   : > { %v819_v26 = vpop.eup %818 }
 0x236   : > { %v235_v28 = vmul.f32 %v819_v26, %v817_v21 }
 0x238   : > { %v236_v30 = vpack.c.bf16 %v235_v28, %v235_v28 }
 0x23a   : > { %755 = vmatmul.mubr.msk.bf16.vlgmr.msra.gmra.mrb[0].mxu1 %vm177_vm1, %v236_v30 }
 0x23b   : > { %759 = vmatpush3.bf16.xpose.msra.mxu1 %v300_v29  ;;  %760 = vmatprep.mubr.msk.bf16.mxu1 %vm856_vm0, %v855_v0 }
 0x23c   : > { %770 = vmatprep.subr.bf16.mxu1 %v855_v0 }
 0x242   : > { %761 = vmatmul.mubr.msk.bf16.vlgmr.msra.gmra.mrb[4].mxu1 %vm177_vm1, %v293_v32 }
 0x243   : > { %771 = vmatpush3.bf16.xpose.msra.mxu1 %v411_v34  ;;  %772 = vmatprep.mubr.msk.bf16.mxu1 %vm856_vm0, %v855_v0 }
 0x244   : > { %782 = vmatprep.subr.bf16.mxu1 %v855_v0 }
 0x24a   : > { %773 = vmatmul.mubr.msk.bf16.vlgmr.msra.gmra.mrb[8].mxu1 %vm177_vm1, %v404_v33 }
 0x24b   : > { %783 = vmatpush3.bf16.xpose.msra.mxu1 %v522_v36  ;;  %784 = vmatprep.mubr.msk.bf16.mxu1 %vm856_vm0, %v855_v0 }
 0x252   : > { %785 = vmatmul.mubr.msk.bf16.vlgmr.msra.gmra.mrb[12].mxu1 %vm177_vm1, %v515_v37 }
 0x30d   : > { %v950_v38 = vpop.f32.mrb[0].mxu1 }
 0x30e   : > { %v756_v39 = vpop.f32.mrb[1].mxu1 }
 0x30f   : > { %v286_v40 = vpop.f32.mrb[2].mxu1 }
 0x310   : > { %v757_v41 = vpop.f32.mrb[3].mxu1 }
 0x315   : > { %v336_v42 = vpop.f32.mrb[4].mxu1 }
 0x316   : > { %v342_v43 = vsel %vm919_vm4, -1e+09, %v336_v42  ;;  %v762_v44 = vpop.f32.mrb[5].mxu1 }
 0x317   : > { %v339_v45 = vpop.f32.mrb[6].mxu1  ;;  %v343_v46 = vsel %vm177_vm1, %v342_v43, -inf }
 0x318   : > { %344 = vmax.xlane.f32.xlu1 %v343_v46  ;;  %v763_v47 = vpop.f32.mrb[7].mxu1 }
 0x31d   : > { %v447_v48 = vpop.f32.mrb[8].mxu1 }
 0x31e   : > { %v453_v49 = vsel %vm919_vm4, -1e+09, %v447_v48  ;;  %v774_v50 = vpop.f32.mrb[9].mxu1 }
 0x31f   : > { %v450_v51 = vpop.f32.mrb[10].mxu1  ;;  %v454_v52 = vsel %vm177_vm1, %v453_v49, -inf }
 0x320   : > { %455 = vmax.xlane.f32.xlu0 %v454_v52  ;;  %v775_v53 = vpop.f32.mrb[11].mxu1 }
 0x325   : > { %v558_v54 = vpop.f32.mrb[12].mxu1 }
 0x326   : > { %v564_v55 = vsel %vm919_vm4, -1e+09, %v558_v54  ;;  %v786_v56 = vpop.f32.mrb[13].mxu1 }
 0x327   : > { %v561_v57 = vpop.f32.mrb[14].mxu1  ;;  %v565_v58 = vsel %vm177_vm1, %v564_v55, -inf }
 0x328   : > { %566 = vmax.xlane.f32.xlu1 %v565_v58  ;;  %v787_v59 = vpop.f32.mrb[15].mxu1 }
 0x339   : > { %355 = vrot.lane.b32.xlu1 %v926_v16, %s861_s4 }
 0x3a5   : > { %v345_v60 = vpop.xlane.xlu1 %344 }
 0x3a6   : > { %v346_v61 = vsub.f32 %v342_v43, %v345_v60 }
 0x3a8   : > { %v347_v62 = vmul.f32 1.442695, %v346_v61 }
 0x3aa   : > { %820 = vpow2.f32 %v347_v62 }
 0x3ad   : > { %v456_v63 = vpop.xlane.xlu0 %455 }
 0x3ae   : > { %v457_v1 = vsub.f32 %v453_v49, %v456_v63 }
 0x3b0   : > { %v458_v2 = vmul.f32 1.442695, %v457_v1 }
 0x3b2   : > { %822 = vpow2.f32 %v458_v2 }
 0x3b4   : > { %v821_v3 = vpop.eup %820 }
 0x3b5   : > { %v567_v4 = vpop.xlane.xlu1 %566  ;;  %v349_v5 = vsel %vm177_vm1, %v821_v3, 0.0 }
 0x3b6   : > { %v568_v6 = vsub.f32 %v564_v55, %v567_v4  ;;  %350 = vadd.xlane.f32.xlu0 %v349_v5 }
 0x3b8   : > { %v569_v7 = vmul.f32 1.442695, %v568_v6 }
 0x3b9   : > { %v356_v8 = vpop.permute.xlu1 %355 }
 0x3ba   : > { %824 = vpow2.f32 %v569_v7  ;;  %v361_v9 = vsel %vm245_vm5, %v356_v8, 0 }
 0x3bb   : > { %765 = vmatpush3.bf16.msra.mxu0 %v361_v9 }
 0x3bc   : > { %v823_v10 = vpop.eup %822  ;;  %776 = vmatprep.subr.bf16.mxu0 %v855_v0 }
 0x3bd   : > { %v460_v11 = vsel %vm177_vm1, %v823_v10, 0.0 }
 0x3be   : > { %461 = vadd.xlane.f32.xlu1 %v460_v11 }
 0x3c4   : > { %v825_v12 = vpop.eup %824 }
 0x3c5   : > { %v571_v13 = vsel %vm177_vm1, %v825_v12, 0.0 }
 0x3c6   : > { %572 = vadd.xlane.f32.xlu0 %v571_v13 }
 0x3cf   : > { %577 = vrot.lane.b32.xlu1 %v926_v16, %s862_s5 }
 0x3dc   : > { %466 = vrot.lane.b32.xlu0 %v926_v16, %s863_s6 }
 0x443   : > { %v351_v14 = vpop.xlane.xlu0 %350 }
 0x444   : > { %826 = vrcp.f32 %v351_v14 }
 0x44b   : > { %v462_v15 = vpop.xlane.xlu1 %461 }
 0x44c   : > { %828 = vrcp.f32 %v462_v15 }
 0x44e   : > { %v827_v17 = vpop.eup %826 }
 0x44f   : > { %v353_v18 = vmul.f32 %v827_v17, %v821_v3  ;;  %v578_v24 = vpop.permute.xlu1 %577 }
 0x450   : > { %v583_v26 = vsel %vm245_vm5, %v578_v24, 0 }
 0x451   : > { %v354_v19 = vpack.c.bf16 %v353_v18, %v353_v18 }
 0x453   : > { %v573_v20 = vpop.xlane.xlu0 %572  ;;  %767 = vmatmul.mubr.msk.bf16.vlgmr.msra.gmra.mrb[4].mxu0 %vm177_vm1, %v354_v19 }
 0x454   : > { %830 = vrcp.f32 %v573_v20  ;;  %778 = vmatprep.mubr.msk.bf16.mxu0 %vm856_vm0, %v855_v0 }
 0x456   : > { %v829_v21 = vpop.eup %828 }
 0x457   : > { %v464_v22 = vmul.f32 %v829_v21, %v823_v10  ;;  %v467_v23 = vpop.permute.xlu0 %466 }
 0x458   : > { %v472_v16 = vsel %vm245_vm5, %v467_v23, 0 }
 0x459   : > { %777 = vmatpush3.bf16.msra.mxu0 %v472_v16  ;;  %v465_v25 = vpack.c.bf16 %v464_v22, %v464_v22 }
 0x45a   : > { %788 = vmatprep.subr.bf16.mxu0 %v855_v0 }
 0x45c   : > { %779 = vmatmul.mubr.msk.bf16.vlgmr.msra.gmra.mrb[8].mxu0 %vm177_vm1, %v465_v25 }
 0x45d   : > { %789 = vmatpush3.bf16.msra.mxu0 %v583_v26  ;;  %790 = vmatprep.mubr.msk.bf16.mxu0 %vm856_vm0, %v855_v0 }
 0x45e   : > { %v831_v27 = vpop.eup %830 }
 0x45f   : > { %v575_v28 = vmul.f32 %v831_v27, %v825_v12 }
 0x461   : > { %v576_v29 = vpack.c.bf16 %v575_v28, %v575_v28 }
 0x464   : > { %791 = vmatmul.mubr.msk.bf16.vlgmr.msra.gmra.mrb[12].mxu0 %vm177_vm1, %v576_v29 }
 0x526   : > { %v397_v30 = vpop.f32.mrb[4].mxu0 }
 0x527   : > { %626 = vrot.lane.b32.xlu1 %v397_v30, %s864_s7  ;;  %v768_v31 = vpop.f32.mrb[5].mxu0 }
 0x528   : > { %v400_v32 = vpop.f32.mrb[6].mxu0 }
 0x529   : > { %v769_v33 = vpop.f32.mrb[7].mxu0 }
 0x52f   : > { %v508_v34 = vpop.f32.mrb[8].mxu0 }
 0x530   : > { %630 = vrot.lane.b32.xlu0 %v508_v34, %s865_s8  ;;  %v780_v35 = vpop.f32.mrb[9].mxu0 }
 0x531   : > { %v511_v36 = vpop.f32.mrb[10].mxu0 }
 0x532   : > { %v781_v37 = vpop.f32.mrb[11].mxu0 }
 0x537   : > { %v619_v39 = vpop.f32.mrb[12].mxu0 }
 0x538   : > { %634 = vrot.lane.b32.xlu1 %v619_v39, %s866_s9  ;;  %v792_v0 = vpop.f32.mrb[13].mxu0 }
 0x539   : > { %v622_v40 = vpop.f32.mrb[14].mxu0 }
 0x53a   : > { %v793_v41 = vpop.f32.mrb[15].mxu0 }
 0x599   : > { %v627_v42 = vpop.permute.xlu1 %626 }
 0x59a   : > { %v637_v44 = vsel %vm177_vm1, %v950_v38, %v627_v42 }
 0x5a2   : > { %v631_v43 = vpop.permute.xlu0 %630 }
 0x5a3   : > { %v639_v45 = vsel %vm638_vm6, %v637_v44, %v631_v43 }
 0x5aa   : > { %v635_v46 = vpop.permute.xlu1 %634 }
 0x5ab   : > { %v641_v47 = vsel %vm640_vm7, %v639_v45, %v635_v46 }
 0x5ac   : > { %v642_v48 = vpack.c.bf16 %v641_v47, %v641_v47 }
 0x5ae   : > { %644 = vst.msk [vmem:[%s162_s12] sm:$0xf] %vm643_vm8, %v642_v48 }
 0x5af PF: > { %s19_s17 = sadd.s32 1, %s852_s17  }
 0x5b0   : > { %p16_p9 = scmp.ge.s32.totalorder %s19_s17, 4  }
 0x5b2   :  { %18 = sbr.rel (!%p16_p9) target bundleno = 16 (0x10), region = 61 }

// kernel: transformer_forward.15
= control target key start
LH: loop header
LB: loop body
LE: loop exit
PB: predicated region body
PF: predicated region fallthrough
CT: control target
= control target key end

     0   :  { %vm52_vm0 = vcmask 261120   ;;  %vm124_vm1 = vcmask 781312   ;;  %s211_s1 = inlined_call_operand.vmem [shape: bf16[32,96], index: 1, kind: input, shape index: {}]   ;;  %s212_s0 = inlined_call_operand.vmem [shape: bf16[32,32], index: 0, kind: input, shape index: {}]   ;;  %s213_s2 = inlined_call_operand.vmem [shape: f32[1,96], index: 2, kind: input, shape index: {}]   ;;  %s214_s3 = inlined_call_operand.vmem [shape: bf16[32,96], index: 3, kind: output, shape index: {}]  }
   0x1   :  { %v160_v0 = vld [vmem:[%s211_s1] sm:$0xff]   ;;  %v161_v1 = vld [vmem:[%s211_s1 + $0x8] sm:$0xff]  }
   0x2   :  { %152 = vmatprep.subr.bf16.mxu0 %v160_v0  ;;  %v162_v2 = vld [vmem:[%s212_s0] sm:$0xff]   ;;  %v163_v3 = vld [vmem:[%s212_s0 + $0x8] sm:$0xff]  }
   0x3   :  { %153 = vmatpush3.bf16.msra.mxu0 %v160_v0  ;;  %156 = vmatprep.mubr.msk.bf16.mxu0 %vm52_vm0, %v162_v2  ;;  %v133_v4 = vld [vmem:[%s213_s2] ss:$0 sm:$0xff] }
   0x4   :  { %154 = vmatprep.subr.bf16.mxu0 %v161_v1 }
   0x7   :  { %155 = vmatpush3.bf16.msra.mxu0 %v161_v1 }
   0xa   :  { %157 = vmatmul.mubr.msk.bf16.vlgmr.msra.gmra.mrb[0].mxu0 %vm52_vm0, %v163_v3 }
  0xdd   :  { %v158_v5 = vpop.f32.mrb[0].mxu0 }
  0xde   :  { %v102_v6 = vadd.f32 %v158_v5, %v133_v4  ;;  %v93_v7 = vpop.f32.mrb[1].mxu0 }
  0xdf   :  { %v94_v8 = vadd.f32 %v133_v4, %v93_v7  ;;  %v159_v9 = vpop.f32.mrb[2].mxu0 }
  0xe0   :  { %v146_v10 = vpack.c.bf16 %v102_v6, %v102_v6  ;;  %v105_v11 = vadd.f32 %v159_v9, %v133_v4  ;;  %v96_v12 = vpop.f32.mrb[3].mxu0 }
  0xe1   :  { %v144_v13 = vpack.c.bf16 %v94_v8, %v94_v8  ;;  %v97_v14 = vadd.f32 %v133_v4, %v96_v12 }
  0xe2   :  { %127 = vst.msk [vmem:[%s214_s3 + $0x8] sm:$0xf] %vm124_vm1, %v146_v10  ;;  %v147_v15 = vpack.c.bf16 %v105_v11, %v105_v11 }
  0xe3   :  { %125 = vst.msk [vmem:[%s214_s3] sm:$0xf] %vm124_vm1, %v144_v13  ;;  %v145_v16 = vpack.c.bf16 %v97_v14, %v97_v14 }
  0xe4   :  { %128 = vst.msk [vmem:[%s214_s3 + $0xc] sm:$0xf] %vm124_vm1, %v147_v15 }
  0xe5   :  { %126 = vst.msk [vmem:[%s214_s3 + $0x4] sm:$0xf] %vm124_vm1, %v145_v16 }

// kernel: transformer_forward.14
= control target key start
LH: loop header
LB: loop body
LE: loop exit
PB: predicated region body
PF: predicated region fallthrough
CT: control target
= control target key end

     0   :  { %vm44_vm0 = vcmask 1043456   ;;  %vm37_vm1 = vcmask 64512   ;;  %vm97_vm2 = vcmask 261120   ;;  %s167_s1 = inlined_call_operand.vmem [shape: bf16[8,32], index: 1, kind: input, shape index: {}]   ;;  %s168_s0 = inlined_call_operand.vmem [shape: bf16[32,8], index: 0, kind: input, shape index: {}]   ;;  %s169_s2 = inlined_call_operand.vmem [shape: f32[1,32], index: 2, kind: input, shape index: {}]   ;;  %s170_s3 = inlined_call_operand.vmem [shape: f32[32,32], index: 3, kind: output, shape index: {}]  }
   0x1   :  { %v19_v0 = vld [vmem:[%s167_s1] sm:$0xf]  ;;  %v122_v3 = vld [vmem:[%s168_s0 + $0x8] sm:$0xff]  }
   0x2   :  { %120 = vmatprep.subr.msk.bf16.mxu0 %vm44_vm0, %v19_v0  ;;  %v46_v1 = vsel %vm44_vm0, %v19_v0, 0  ;;  %v121_v2 = vld [vmem:[%s168_s0] sm:$0xff]  }
   0x3   :  { %115 = vmatpush3.bf16.msra.mxu0 %v46_v1  ;;  %116 = vmatprep.mubr.msk.bf16.mxu0 %vm37_vm1, %v121_v2  ;;  %v106_v4 = vld [vmem:[%s169_s2] ss:$0 sm:$0xff] }
   0x6   :  { %117 = vmatmul.mubr.msk.bf16.vlgmr.msra.gmra.mrb[0].mxu0 %vm37_vm1, %v122_v3 }
  0xd9   :  { %v118_v5 = vpop.f32.mrb[0].mxu0 }
  0xda   :  { %v91_v6 = vadd.f32 %v118_v5, %v106_v4  ;;  %v82_v7 = vpop.f32.mrb[1].mxu0 }
  0xdb   :  { %v83_v8 = vadd.f32 %v106_v4, %v82_v7  ;;  %v119_v9 = vpop.f32.mrb[2].mxu0 }
  0xdc   :  { %100 = vst.msk [vmem:[%s170_s3 + $0x10] sm:$0xff] %vm97_vm2, %v91_v6  ;;  %v94_v10 = vadd.f32 %v119_v9, %v106_v4  ;;  %v85_v11 = vpop.f32.mrb[3].mxu0 }
  0xdd   :  { %98 = vst.msk [vmem:[%s170_s3] sm:$0xff] %vm97_vm2, %v83_v8  ;;  %v86_v12 = vadd.f32 %v106_v4, %v85_v11 }
  0xde   :  { %101 = vst.msk [vmem:[%s170_s3 + $0x18] sm:$0xff] %vm97_vm2, %v94_v10 }
  0xdf   :  { %99 = vst.msk [vmem:[%s170_s3 + $0x8] sm:$0xff] %vm97_vm2, %v86_v12 }

// kernel: transformer_forward.17
= control target key start
LH: loop header
LB: loop body
LE: loop exit
PB: predicated region body
PF: predicated region fallthrough
CT: control target
= control target key end

     0   :  { %vm61_vm0 = vcmask 261120   ;;  %s335_s1 = inlined_call_operand.vmem [shape: bf16[32,32], index: 1, kind: input, shape index: {}]   ;;  %s336_s0 = inlined_call_operand.vmem [shape: bf16[32,32], index: 0, kind: input, shape index: {}]   ;;  %s337_s2 = inlined_call_operand.vmem [shape: f32[1,32], index: 2, kind: input, shape index: {}]   ;;  %s338_s3 = inlined_call_operand.vmem [shape: f32[32,32], index: 3, kind: input, shape index: {}]   ;;  %s339_s4 = inlined_call_operand.vmem [shape: f32[1,32], index: 4, kind: input, shape index: {}]   ;;  %s340_s5 = inlined_call_operand.vmem [shape: f32[1,32], index: 5, kind: input, shape index: {}]   ;;  %s341_s6 = inlined_call_operand.vmem [shape: f32[32,32], index: 6, kind: output, shape index: {}]  }
   0x1   :  { %v229_v0 = vld [vmem:[%s335_s1] sm:$0xff]   ;;  %v230_v1 = vld [vmem:[%s335_s1 + $0x8] sm:$0xff]   ;;  %v119_v6 = vld [vmem:[%s338_s3 + $0x10] sm:$0xff] }
   0x2   :  { %221 = vmatprep.subr.bf16.mxu0 %v229_v0  ;;  %v231_v2 = vld [vmem:[%s336_s0] sm:$0xff]   ;;  %v232_v3 = vld [vmem:[%s336_s0 + $0x8] sm:$0xff]   ;;  %v120_v12 = vld [vmem:[%s338_s3 + $0x18] sm:$0xff] }
   0x3   :  { %222 = vmatpush3.bf16.msra.mxu0 %v229_v0  ;;  %225 = vmatprep.mubr.msk.bf16.mxu0 %vm61_vm0, %v231_v2  ;;  %v208_v4 = vld [vmem:[%s337_s2] ss:$0 sm:$0xff]  ;;  %v118_v16 = vld [vmem:[%s338_s3 + $0x8] sm:$0xff] }
   0x4   :  { %223 = vmatprep.subr.bf16.mxu0 %v230_v1  ;;  %v117_v9 = vld [vmem:[%s338_s3] sm:$0xff] }
   0x5   :  { %v215_v58 = vld [vmem:[%s339_s4] ss:$0 sm:$0xff] }
   0x6   :  { %v216_v60 = vld [vmem:[%s340_s5] ss:$0 sm:$0xff] }
   0x7   :  { %224 = vmatpush3.bf16.msra.mxu0 %v230_v1 }
   0xa   :  { %226 = vmatmul.mubr.msk.bf16.vlgmr.msra.gmra.mrb[0].mxu0 %vm61_vm0, %v232_v3 }
  0xdd   :  { %v227_v5 = vpop.f32.mrb[0].mxu0 }
  0xde   :  { %v111_v7 = vadd.f32 %v227_v5, %v208_v4  ;;  %v102_v8 = vpop.f32.mrb[1].mxu0 }
  0xdf   :  { %v103_v10 = vadd.f32 %v208_v4, %v102_v8  ;;  %v228_v11 = vpop.f32.mrb[2].mxu0 }
  0xe0   :  { %v114_v13 = vadd.f32 %v228_v11, %v208_v4  ;;  %v105_v14 = vpop.f32.mrb[3].mxu0  ;;  %v123_v15 = vadd.f32 %v119_v6, %v111_v7 }
  0xe1   :  { %v106_v17 = vadd.f32 %v208_v4, %v105_v14  ;;  %v121_v18 = vadd.f32 %v117_v9, %v103_v10 }
  0xe2   :  { %v131_v19 = vsel %vm61_vm0, %v123_v15, 0.0  ;;  %v124_v20 = vadd.f32 %v120_v12, %v114_v13 }
  0xe3   :  { %132 = vadd.xlane.f32.xlu1 %v131_v19  ;;  %v125_v21 = vsel %vm61_vm0, %v121_v18, 0.0  ;;  %v122_v22 = vadd.f32 %v118_v16, %v106_v17 }
  0xe4   :  { %126 = vadd.xlane.f32.xlu0 %v125_v21  ;;  %v134_v23 = vsel %vm61_vm0, %v124_v20, 0.0 }
  0xe5   :  { %v128_v24 = vsel %vm61_vm0, %v122_v22, 0.0 }
  0xe7   :  { %135 = vadd.xlane.f32.xlu1 %v134_v23 }
  0xe8   :  { %129 = vadd.xlane.f32.xlu0 %v128_v24 }
 0x170   :  { %v133_v25 = vpop.xlane.xlu1 %132 }
 0x171   :  { %v140_v26 = vmul.f32 0.03125, %v133_v25  ;;  %v127_v27 = vpop.xlane.xlu0 %126 }
 0x172   :  { %v138_v28 = vmul.f32 0.03125, %v127_v27 }
 0x173   :  { %v144_v29 = vsub.f32 %v123_v15, %v140_v26 }
 0x174   :  { %v142_v30 = vsub.f32 %v121_v18, %v138_v28  ;;  %v136_v31 = vpop.xlane.xlu1 %135 }
 0x175   :  { %v141_v32 = vmul.f32 0.03125, %v136_v31  ;;  %v130_v33 = vpop.xlane.xlu0 %129  ;;  %v148_v39 = vmul.f32 %v144_v29, %v144_v29 }
 0x176   :  { %v139_v34 = vmul.f32 0.03125, %v130_v33  ;;  %v146_v35 = vmul.f32 %v142_v30, %v142_v30 }
 0x177   :  { %v145_v36 = vsub.f32 %v124_v20, %v141_v32  ;;  %v156_v41 = vsel %vm61_vm0, %v148_v39, 0.0 }
 0x178   :  { %v143_v37 = vsub.f32 %v122_v22, %v139_v34  ;;  %v150_v38 = vsel %vm61_vm0, %v146_v35, 0.0 }
 0x179   :  { %151 = vadd.xlane.f32.xlu0 %v150_v38  ;;  %v149_v43 = vmul.f32 %v145_v36, %v145_v36 }
 0x17a   :  { %v147_v40 = vmul.f32 %v143_v37, %v143_v37 }
 0x17b   :  { %v159_v44 = vsel %vm61_vm0, %v149_v43, 0.0 }
 0x17c   :  { %v153_v42 = vsel %vm61_vm0, %v147_v40, 0.0 }
 0x17d   :  { %157 = vadd.xlane.f32.xlu0 %v156_v41  ;;  %154 = vadd.xlane.f32.xlu1 %v153_v42 }
 0x181   :  { %160 = vadd.xlane.f32.xlu1 %v159_v44 }
 0x206   :  { %v152_v45 = vpop.xlane.xlu0 %151 }
 0x207   :  { %v162_v46 = vmul.f32 0.03125, %v152_v45 }
 0x209   :  { %v166_v47 = vadd.f32 1e-05, %v162_v46 }
 0x20a   :  { %v155_v48 = vpop.xlane.xlu1 %154  ;;  %v158_v49 = vpop.xlane.xlu0 %157 }
 0x20b   :  { %233 = vrsqrt.f32 %v166_v47  ;;  %v163_v50 = vmul.f32 0.03125, %v155_v48  ;;  %v164_v51 = vmul.f32 0.03125, %v158_v49 }
 0x20d   :  { %v167_v52 = vadd.f32 1e-05, %v163_v50  ;;  %v168_v53 = vadd.f32 1e-05, %v164_v51 }
 0x20e   :  { %v161_v54 = vpop.xlane.xlu1 %160 }
 0x20f   :  { %235 = vrsqrt.f32 %v167_v52  ;;  %v165_v55 = vmul.f32 0.03125, %v161_v54 }
 0x210   :  { %237 = vrsqrt.f32 %v168_v53 }
 0x211   :  { %v169_v56 = vadd.f32 1e-05, %v165_v55 }
 0x213   :  { %239 = vrsqrt.f32 %v169_v56 }
 0x215   :  { %v234_v57 = vpop.eup %233 }
 0x216   :  { %v174_v59 = vmul.f32 %v234_v57, %v142_v30 }
 0x218   :  { %v185_v61 = vmul.f32 %v215_v58, %v174_v59 }
 0x219   :  { %v236_v62 = vpop.eup %235 }
 0x21a   :  { %v238_v63 = vpop.eup %237  ;;  %v196_v0 = vadd.f32 %v216_v60, %v185_v61  ;;  %v175_v1 = vmul.f32 %v236_v62, %v143_v37 }
 0x21b   :  { %v176_v2 = vmul.f32 %v238_v63, %v144_v29 }
 0x21c   :  { %200 = vst.msk [vmem:[%s341_s6] sm:$0xff] %vm61_vm0, %v196_v0  ;;  %v186_v3 = vmul.f32 %v215_v58, %v175_v1 }
 0x21d   :  { %v240_v4 = vpop.eup %239  ;;  %v187_v5 = vmul.f32 %v215_v58, %v176_v2 }
 0x21e   :  { %v197_v6 = vadd.f32 %v216_v60, %v186_v3  ;;  %v177_v7 = vmul.f32 %v240_v4, %v145_v36 }
 0x21f   :  { %v198_v8 = vadd.f32 %v216_v60, %v187_v5 }
 0x220   :  { %201 = vst.msk [vmem:[%s341_s6 + $0x8] sm:$0xff] %vm61_vm0, %v197_v6  ;;  %v188_v9 = vmul.f32 %v215_v58, %v177_v7 }
 0x221   :  { %202 = vst.msk [vmem:[%s341_s6 + $0x10] sm:$0xff] %vm61_vm0, %v198_v8 }
 0x222   :  { %v199_v10 = vadd.f32 %v216_v60, %v188_v9 }
 0x224   :  { %203 = vst.msk [vmem:[%s341_s6 + $0x18] sm:$0xff] %vm61_vm0, %v199_v10 }

// kernel: transformer_forward.16
= control target key start
LH: loop header
LB: loop body
LE: loop exit
PB: predicated region body
PF: predicated region fallthrough
CT: control target
= control target key end

     0   :  { %s1138_s0 = inlined_call_operand.vmem [shape: s32[2], index: 0, kind: input, shape index: {}]   ;;  %s1139_s1 = inlined_call_operand.vmem [shape: bf16[2,16,32], index: 1, kind: input, shape index: {}]   ;;  %s1140_s2 = inlined_call_operand.vmem [shape: bf16[2,16,64], index: 2, kind: input, shape index: {}]   ;;  %s1141_s3 = inlined_call_operand.vmem [shape: bf16[2,16,32], index: 3, kind: output, shape index: {}]  }
   0x1   :  { %s8_s14 = sshll.u32 %s1138_s0, 4  ;;  %s9_s14 = int_to_ptr.vmem [resolvable:$true] %s8_s14 }
   0x2   :  { %s956_s15 = scalar_lea.vmem %s9_s14, 16  ;;  %p961_p1 = scmp.lt.s32.totalorder %s9_s14, %s9_s14 }
   0x3   :  { %p957_p0 = scmp.ne.s32.totalorder %s9_s14, %s956_s15  ;;  %p962_p2 = scmp.lt.s32.totalorder %s956_s15, %s956_s15 }
   0x5   :  { %p963_p3 = por %p962_p2, %p961_p1 }
   0x7   :  { %p964_p4 = pnand %p963_p3, %p957_p0 }
   0x9   :  { %967 = shalt.err (!%p964_p4)  }
   0xa   :  { %s978_s16 = smov [#allocation3]  }
   0xb   :  { %11 = dma.vmem_to_smem %s9_s14, 16, %s978_s16, [#allocation2] }
   0xc   :  { %972 = dma.done.wait [#allocation2], 16 }
   0xd   :  { %973 = vsyncadd [#allocation2], 4294967280 }
   0xe   :  { %13 = sfence }
   0xf   :  { %s1014_s17 = smov 0  }
  0x10 LB: > { %s1020_s0 = sadd.s32 4294967295, %s976_s17   ;;  %p797_p5 = scmp.ge.s32.totalorder %s976_s17, 1  ;;  %s976_s17 = sphi %s1014_s17, %s19_s17  }
  0x11   : > { %p129_p6 = scmp.lt.s32.totalorder %s976_s17, 3 }
  0x13   : > { %p130_p7 = pnand %p797_p5, %p129_p6 }
  0x14   : > { %p156_p8 = scmp.lt.s32.totalorder (!%p130_p7), %s1020_s0, 1  ;;  %v979_v0 = vmov (!%p130_p7), 0.0   ;;  %vm980_vm0 = vmmov (!%p130_p7), 0   ;;  %vm194_vm1 = vcmask (!%p130_p7), 64512   ;;  %s981_s26 = smov (!%p130_p7), 120   ;;  %v180_v8 = vlaneseq (!%p130_p7) }
  0x15   : > { %133 = sbr.rel (%p130_p7) target bundleno = 1468 (0x5bc), region = 28  ;;  %839 = vmatprep.subr.bf16.mxu0 (!%p130_p7), %v979_v0  ;;  %841 = vmatprep.mubr.msk.bf16.mxu0 (!%p130_p7), %vm980_vm0, %v979_v0  ;;  %s173_s27 = sld [smem:[#allocation3 + %s1020_s0]] (!%p130_p7)  ;;  %vm244_vm3 = vcmask (!%p130_p7), 130048   ;;  %vm712_vm4 = vcmask (!%p130_p7), 195584   ;;  %vm723_vm5 = vcmask (!%p130_p7), 257024  }
  0x16   : > { %845 = vmatprep.subr.bf16.mxu1 (!%p130_p7), %v979_v0  ;;  %847 = vmatprep.mubr.msk.bf16.mxu1 (!%p130_p7), %vm980_vm0, %v979_v0  ;;  %v181_v9 = vand.u32 (!%p130_p7), 127, %v180_v8  ;;  %s982_s28 = smov (!%p130_p7), 96   ;;  %s983_s29 = smov (!%p130_p7), 112  }
  0x17   : > { %s984_s30 = smov (!%p130_p7), 104   ;;  %s985_s4 = smov (!%p130_p7), 88  }
  0x18   : > { %s986_s5 = smov (!%p130_p7), 72   ;;  %s987_s6 = smov (!%p130_p7), 80  }
  0x19   : > { %s988_s7 = smov (!%p130_p7), 8   ;;  %s989_s8 = smov (!%p130_p7), 16  }
  0x1a   : > { %s990_s9 = smov (!%p130_p7), 24  }
  0x1b   : > { %v182_v10 = vstv (!%p130_p7), %s173_s27 }
  0x1c   : > { %s157_s18 = scalar_select %p156_p8, %s1020_s0, 1  ;;  %vm1053_vm2 = vcmp.ge.s32.totalorder %v181_v9, %v182_v10 }
  0x1e   : > { %s1032_s19 = sshll.u32 %s157_s18, 3 }
  0x1f   : > { %s165_s22 = scalar_lea.vmem %s1140_s2, %s1032_s19  ;;  %s160_s25 = scalar_lea.vmem %s1139_s1, %s1032_s19 }
  0x20   : > { %v1042_v1 = vld [vmem:[%s165_s22] sm:$0xff]   ;;  %s170_s12 = scalar_lea.vmem %s1141_s3, %s1032_s19 }
  0x21   : > { %v174_v2 = vld [vmem:[%s160_s25] sm:$0xf]  ;;  %v175_v3 = vld [vmem:[%s160_s25 + $0x4] sm:$0xf]  ;;  %v199_v4 = vsel %vm194_vm1, %v1042_v1, 0  ;;  %317 = vrot.lane.b32.xlu1 %v1042_v1, %s981_s26 }
  0x22   : > { %v176_v5 = vmul.bf16 1052065461, %v174_v2  ;;  %v177_v6 = vmul.bf16 1052065461, %v175_v3  ;;  %840 = vmatpush3.bf16.xpose.msra.mxu0 %v199_v4 }
  0x23   : > { %857 = vmatprep.subr.bf16.mxu0 %v979_v0 }
  0x24   : > { %v804_v7 = vcombine.low %v176_v5, %v177_v6 }
  0x29   : > { %842 = vmatmul.mubr.msk.bf16.vlgmr.msra.gmra.mrb[0].mxu0 %vm194_vm1, %v804_v7 }
  0x2a   : > { %859 = vmatprep.mubr.msk.bf16.mxu0 %vm980_vm0, %v979_v0 }
  0x93   : > { %v318_v31 = vpop.permute.xlu1 %317 }
  0x94   : > { %v323_v40 = vsel %vm194_vm1, %v318_v31, 0 }
  0xfc   : > { %v235_v12 = vpop.f32.mrb[0].mxu0 }
  0xfd   : > { %v242_v13 = vsel %vm1053_vm2, -1e+09, %v235_v12  ;;  %v843_v14 = vpop.f32.mrb[1].mxu0 }
  0xfe   : > { %v238_v15 = vpop.f32.mrb[2].mxu0  ;;  %v245_v16 = vsel %vm244_vm3, %v242_v13, -inf }
  0xff   : > { %v243_v17 = vsel %vm1053_vm2, -1e+09, %v238_v15  ;;  %246 = vmax.xlane.f32.xlu0 %v245_v16  ;;  %v844_v18 = vpop.f32.mrb[3].mxu0 }
 0x100   : > { %v248_v19 = vsel %vm244_vm3, %v243_v17, -inf }
 0x103   : > { %249 = vmax.xlane.f32.xlu0 %v248_v19 }
 0x119   : > { %268 = vrot.lane.b32.xlu0 %v1042_v1, %s982_s28 }
 0x11d   : > { %438 = vrot.lane.b32.xlu0 %v804_v7, %s983_s29 }
 0x121   : > { %561 = vrot.lane.b32.xlu0 %v804_v7, %s984_s30 }
 0x18c   : > { %v247_v20 = vpop.xlane.xlu0 %246 }
 0x18d   : > { %v251_v21 = vsub.f32 %v242_v13, %v247_v20 }
 0x18f   : > { %v253_v22 = vmul.f32 1.442695, %v251_v21 }
 0x190   : > { %v250_v23 = vpop.xlane.xlu0 %249 }
 0x191   : > { %924 = vpow2.f32 %v253_v22  ;;  %v252_v24 = vsub.f32 %v243_v17, %v250_v23 }
 0x193   : > { %v255_v25 = vmul.f32 1.442695, %v252_v24 }
 0x194   : > { %v269_v30 = vpop.permute.xlu0 %268 }
 0x195   : > { %926 = vpow2.f32 %v255_v25  ;;  %846 = vmatpush3.bf16.msra.mxu1 %v269_v30 }
 0x196   : > { %851 = vmatprep.subr.bf16.mxu1 %v979_v0 }
 0x198   : > { %v439_v44 = vpop.permute.xlu0 %438 }
 0x19b   : > { %v925_v26 = vpop.eup %924 }
 0x19c   : > { %v257_v27 = vsel %vm244_vm3, %v925_v26, 0.0  ;;  %v562_v46 = vpop.permute.xlu0 %561 }
 0x19d   : > { %258 = vadd.xlane.f32.xlu1 %v257_v27 }
 0x19f   : > { %v927_v28 = vpop.eup %926 }
 0x1a0   : > { %v260_v29 = vsel %vm244_vm3, %v927_v28, 0.0 }
 0x1a1   : > { %261 = vadd.xlane.f32.xlu1 %v260_v29 }
 0x1b2   : > { %315 = vrot.lane.b32.xlu1 %v804_v7, %s981_s26 }
 0x1b6   : > { %440 = vrot.lane.b32.xlu1 %v1042_v1, %s983_s29 }
 0x1ba   : > { %563 = vrot.lane.b32.xlu1 %v1042_v1, %s984_s30 }
 0x22a   : > { %v259_v32 = vpop.xlane.xlu1 %258 }
 0x22b   : > { %928 = vrcp.f32 %v259_v32 }
 0x22e   : > { %v262_v33 = vpop.xlane.xlu1 %261 }
 0x22f   : > { %930 = vrcp.f32 %v262_v33 }
 0x232   : > { %v316_v38 = vpop.permute.xlu1 %315 }
 0x235   : > { %v929_v34 = vpop.eup %928 }
 0x236   : > { %v265_v36 = vmul.f32 %v929_v34, %v925_v26  ;;  %v441_v41 = vpop.permute.xlu1 %440 }
 0x237   : > { %v446_v42 = vsel %vm194_vm1, %v441_v41, 0 }
 0x239   : > { %v931_v35 = vpop.eup %930 }
 0x23a   : > { %v266_v37 = vmul.f32 %v931_v35, %v927_v28  ;;  %v564_v43 = vpop.permute.xlu1 %563 }
 0x23b   : > { %v569_v45 = vsel %vm194_vm1, %v564_v43, 0 }
 0x23c   : > { %v267_v39 = vpack.c.bf16 %v266_v37, %v265_v36 }
 0x23e   : > { %848 = vmatmul.mubr.msk.bf16.vlgmr.msra.gmra.mrb[0].mxu1 %vm244_vm3, %v267_v39 }
 0x23f   : > { %852 = vmatpush3.bf16.xpose.msra.mxu1 %v323_v40  ;;  %853 = vmatprep.mubr.msk.bf16.mxu1 %vm980_vm0, %v979_v0 }
 0x240   : > { %863 = vmatprep.subr.bf16.mxu1 %v979_v0 }
 0x246   : > { %854 = vmatmul.mubr.msk.bf16.vlgmr.msra.gmra.mrb[4].mxu1 %vm194_vm1, %v316_v38 }
 0x247   : > { %864 = vmatpush3.bf16.xpose.msra.mxu1 %v446_v42  ;;  %865 = vmatprep.mubr.msk.bf16.mxu1 %vm980_vm0, %v979_v0 }
 0x248   : > { %875 = vmatprep.subr.bf16.mxu1 %v979_v0 }
 0x24e   : > { %866 = vmatmul.mubr.msk.bf16.vlgmr.msra.gmra.mrb[8].mxu1 %vm194_vm1, %v439_v44 }
 0x24f   : > { %876 = vmatpush3.bf16.xpose.msra.mxu1 %v569_v45  ;;  %877 = vmatprep.mubr.msk.bf16.mxu1 %vm980_vm0, %v979_v0 }
 0x256   : > { %878 = vmatmul.mubr.msk.bf16.vlgmr.msra.gmra.mrb[12].mxu1 %vm194_vm1, %v562_v46 }
 0x311   : > { %v1085_v47 = vpop.f32.mrb[0].mxu1 }
 0x312   : > { %v849_v48 = vpop.f32.mrb[1].mxu1 }
 0x313   : > { %v1087_v49 = vpop.f32.mrb[2].mxu1 }
 0x314   : > { %v850_v50 = vpop.f32.mrb[3].mxu1 }
 0x319   : > { %v359_v51 = vpop.f32.mrb[4].mxu1 }
 0x31a   : > { %v366_v52 = vsel %vm1053_vm2, -1e+09, %v359_v51  ;;  %v855_v53 = vpop.f32.mrb[5].mxu1 }
 0x31b   : > { %v362_v54 = vpop.f32.mrb[6].mxu1  ;;  %v368_v55 = vsel %vm244_vm3, %v366_v52, -inf }
 0x31c   : > { %v367_v56 = vsel %vm1053_vm2, -1e+09, %v362_v54  ;;  %369 = vmax.xlane.f32.xlu1 %v368_v55  ;;  %v856_v57 = vpop.f32.mrb[7].mxu1 }
 0x31d   : > { %v371_v58 = vsel %vm244_vm3, %v367_v56, -inf }
 0x31e   : > { %372 = vmax.xlane.f32.xlu0 %v371_v58 }
 0x321   : > { %v482_v59 = vpop.f32.mrb[8].mxu1 }
 0x322   : > { %v489_v60 = vsel %vm1053_vm2, -1e+09, %v482_v59  ;;  %v867_v61 = vpop.f32.mrb[9].mxu1 }
 0x323   : > { %v485_v62 = vpop.f32.mrb[10].mxu1  ;;  %v491_v63 = vsel %vm244_vm3, %v489_v60, -inf }
 0x324   : > { %v490_v2 = vsel %vm1053_vm2, -1e+09, %v485_v62  ;;  %492 = vmax.xlane.f32.xlu0 %v491_v63  ;;  %v868_v3 = vpop.f32.mrb[11].mxu1 }
 0x325   : > { %v494_v4 = vsel %vm244_vm3, %v490_v2, -inf }
 0x328   : > { %495 = vmax.xlane.f32.xlu0 %v494_v4 }
 0x329   : > { %v605_v5 = vpop.f32.mrb[12].mxu1 }
 0x32a   : > { %v612_v6 = vsel %vm1053_vm2, -1e+09, %v605_v5  ;;  %v879_v7 = vpop.f32.mrb[13].mxu1 }
 0x32b   : > { %v608_v8 = vpop.f32.mrb[14].mxu1  ;;  %v614_v9 = vsel %vm244_vm3, %v612_v6, -inf }
 0x32c   : > { %v613_v10 = vsel %vm1053_vm2, -1e+09, %v608_v8  ;;  %615 = vmax.xlane.f32.xlu1 %v614_v9  ;;  %v880_v12 = vpop.f32.mrb[15].mxu1 }
 0x32d   : > { %v617_v13 = vsel %vm244_vm3, %v613_v10, -inf }
 0x32e   : > { %618 = vmax.xlane.f32.xlu0 %v617_v13 }
 0x33d   : > { %391 = vrot.lane.b32.xlu1 %v1042_v1, %s985_s4 }
 0x3a9   : > { %v370_v14 = vpop.xlane.xlu1 %369 }
 0x3aa   : > { %v374_v15 = vsub.f32 %v366_v52, %v370_v14 }
 0x3ab   : > { %v373_v16 = vpop.xlane.xlu0 %372 }
 0x3ac   : > { %v376_v17 = vmul.f32 1.442695, %v374_v15  ;;  %v375_v18 = vsub.f32 %v367_v56, %v373_v16 }
 0x3ae   : > { %932 = vpow2.f32 %v376_v17  ;;  %v378_v19 = vmul.f32 1.442695, %v375_v18 }
 0x3b0   : > { %934 = vpow2.f32 %v378_v19 }
 0x3b1   : > { %v493_v20 = vpop.xlane.xlu0 %492 }
 0x3b2   : > { %v497_v21 = vsub.f32 %v489_v60, %v493_v20 }
 0x3b4   : > { %v499_v11 = vmul.f32 1.442695, %v497_v21 }
 0x3b5   : > { %v496_v22 = vpop.xlane.xlu0 %495 }
 0x3b6   : > { %936 = vpow2.f32 %v499_v11  ;;  %v498_v23 = vsub.f32 %v490_v2, %v496_v22 }
 0x3b8   : > { %v933_v24 = vpop.eup %932  ;;  %v501_v25 = vmul.f32 1.442695, %v498_v23 }
 0x3b9   : > { %v616_v26 = vpop.xlane.xlu1 %615  ;;  %v380_v27 = vsel %vm244_vm3, %v933_v24, 0.0 }
 0x3ba   : > { %v935_v28 = vpop.eup %934  ;;  %938 = vpow2.f32 %v501_v25  ;;  %v620_v29 = vsub.f32 %v612_v6, %v616_v26  ;;  %381 = vadd.xlane.f32.xlu1 %v380_v27 }
 0x3bb   : > { %v619_v30 = vpop.xlane.xlu0 %618  ;;  %v383_v31 = vsel %vm244_vm3, %v935_v28, 0.0 }
 0x3bc   : > { %v622_v32 = vmul.f32 1.442695, %v620_v29  ;;  %v621_v33 = vsub.f32 %v613_v10, %v619_v30  ;;  %384 = vadd.xlane.f32.xlu0 %v383_v31 }
 0x3bd   : > { %v392_v34 = vpop.permute.xlu1 %391 }
 0x3be   : > { %940 = vpow2.f32 %v622_v32  ;;  %v624_v35 = vmul.f32 1.442695, %v621_v33  ;;  %858 = vmatpush3.bf16.msra.mxu0 %v392_v34 }
 0x3bf   : > { %869 = vmatprep.subr.bf16.mxu0 %v979_v0 }
 0x3c0   : > { %v937_v36 = vpop.eup %936  ;;  %942 = vpow2.f32 %v624_v35 }
 0x3c1   : > { %v503_v37 = vsel %vm244_vm3, %v937_v36, 0.0 }
 0x3c2   : > { %504 = vadd.xlane.f32.xlu1 %v503_v37 }
 0x3c4   : > { %v939_v38 = vpop.eup %938 }
 0x3c5   : > { %v506_v39 = vsel %vm244_vm3, %v939_v38, 0.0 }
 0x3c6   : > { %507 = vadd.xlane.f32.xlu0 %v506_v39 }
 0x3c8   : > { %v941_v40 = vpop.eup %940 }
 0x3c9   : > { %v626_v41 = vsel %vm244_vm3, %v941_v40, 0.0 }
 0x3ca   : > { %v943_v42 = vpop.eup %942  ;;  %627 = vadd.xlane.f32.xlu1 %v626_v41 }
 0x3cb   : > { %v629_v43 = vsel %vm244_vm3, %v943_v42, 0.0 }
 0x3cc   : > { %630 = vadd.xlane.f32.xlu0 %v629_v43 }
 0x3db   : > { %637 = vrot.lane.b32.xlu1 %v1042_v1, %s986_s5 }
 0x3e2   : > { %514 = vrot.lane.b32.xlu0 %v1042_v1, %s987_s6 }
 0x447   : > { %v382_v44 = vpop.xlane.xlu1 %381 }
 0x448   : > { %944 = vrcp.f32 %v382_v44 }
 0x449   : > { %v385_v45 = vpop.xlane.xlu0 %384 }
 0x44a   : > { %946 = vrcp.f32 %v385_v45 }
 0x44f   : > { %v505_v46 = vpop.xlane.xlu1 %504 }
 0x450   : > { %948 = vrcp.f32 %v505_v46 }
 0x452   : > { %v945_v48 = vpop.eup %944 }
 0x453   : > { %v508_v50 = vpop.xlane.xlu0 %507  ;;  %v388_v52 = vmul.f32 %v945_v48, %v933_v24 }
 0x454   : > { %v947_v51 = vpop.eup %946  ;;  %950 = vrcp.f32 %v508_v50 }
 0x455   : > { %v389_v53 = vmul.f32 %v947_v51, %v935_v28 }
 0x457   : > { %v628_v54 = vpop.xlane.xlu1 %627  ;;  %v390_v55 = vpack.c.bf16 %v389_v53, %v388_v52 }
 0x458   : > { %952 = vrcp.f32 %v628_v54 }
 0x459   : > { %860 = vmatmul.mubr.msk.bf16.vlgmr.msra.gmra.mrb[4].mxu0 %vm244_vm3, %v390_v55  ;;  %v631_v56 = vpop.xlane.xlu0 %630 }
 0x45a   : > { %954 = vrcp.f32 %v631_v56  ;;  %871 = vmatprep.mubr.msk.bf16.mxu0 %vm980_vm0, %v979_v0  ;;  %v949_v1 = vpop.eup %948 }
 0x45b   : > { %v511_v59 = vmul.f32 %v949_v1, %v937_v36  ;;  %v638_v62 = vpop.permute.xlu1 %637 }
 0x45d   : > { %v515_v57 = vpop.permute.xlu0 %514 }
 0x45e   : > { %v951_v58 = vpop.eup %950  ;;  %870 = vmatpush3.bf16.msra.mxu0 %v515_v57 }
 0x45f   : > { %v512_v60 = vmul.f32 %v951_v58, %v939_v38  ;;  %881 = vmatprep.subr.bf16.mxu0 %v979_v0 }
 0x461   : > { %v513_v61 = vpack.c.bf16 %v512_v60, %v511_v59 }
 0x462   : > { %v953_v63 = vpop.eup %952 }
 0x463   : > { %872 = vmatmul.mubr.msk.bf16.vlgmr.msra.gmra.mrb[8].mxu0 %vm244_vm3, %v513_v61  ;;  %v634_v4 = vmul.f32 %v953_v63, %v941_v40 }
 0x464   : > { %v955_v2 = vpop.eup %954  ;;  %882 = vmatpush3.bf16.msra.mxu0 %v638_v62  ;;  %883 = vmatprep.mubr.msk.bf16.mxu0 %vm980_vm0, %v979_v0 }
 0x465   : > { %v635_v3 = vmul.f32 %v955_v2, %v943_v42 }
 0x467   : > { %v636_v5 = vpack.c.bf16 %v635_v3, %v634_v4 }
 0x46b   : > { %884 = vmatmul.mubr.msk.bf16.vlgmr.msra.gmra.mrb[12].mxu0 %vm244_vm3, %v636_v5 }
 0x52c   : > { %v431_v6 = vpop.f32.mrb[4].mxu0 }
 0x52d   : > { %v861_v7 = vpop.f32.mrb[5].mxu0 }
 0x52e   : > { %v434_v8 = vpop.f32.mrb[6].mxu0 }
 0x52f   : > { %v908_v9 = vpack.i.bf16 %v434_v8, %v431_v6  ;;  %v862_v10 = vpop.f32.mrb[7].mxu0 }
 0x531   : > { %909 = vrot.lane.b32.xlu1 %v908_v9, %s988_s7 }
 0x536   : > { %v554_v12 = vpop.f32.mrb[8].mxu0 }
 0x537   : > { %v873_v13 = vpop.f32.mrb[9].mxu0 }
 0x538   : > { %v557_v14 = vpop.f32.mrb[10].mxu0 }
 0x539   : > { %v913_v15 = vpack.i.bf16 %v557_v14, %v554_v12  ;;  %v874_v16 = vpop.f32.mrb[11].mxu0 }
 0x53b   : > { %914 = vrot.lane.b32.xlu1 %v913_v15, %s989_s8 }
 0x53e   : > { %v677_v0 = vpop.f32.mrb[12].mxu0 }
 0x53f   : > { %v885_v17 = vpop.f32.mrb[13].mxu0 }
 0x540   : > { %v680_v18 = vpop.f32.mrb[14].mxu0 }
 0x541   : > { %v918_v19 = vpack.i.bf16 %v680_v18, %v677_v0  ;;  %v886_v20 = vpop.f32.mrb[15].mxu0 }
 0x543   : > { %919 = vrot.lane.b32.xlu0 %v918_v19, %s990_s9 }
 0x5a3   : > { %v910_v21 = vpop.permute.xlu1 %909 }
 0x5a4   : > { %v912_v22 = vunpack.i.h.bf16 %v910_v21  ;;  %v911_v23 = vunpack.i.l.bf16 %v910_v21 }
 0x5a6   : > { %v709_v27 = vsel %vm194_vm1, %v1087_v49, %v912_v22  ;;  %v708_v28 = vsel %vm194_vm1, %v1085_v47, %v911_v23 }
 0x5ad   : > { %v915_v11 = vpop.permute.xlu1 %914 }
 0x5ae   : > { %v917_v24 = vunpack.i.h.bf16 %v915_v11  ;;  %v916_v25 = vunpack.i.l.bf16 %v915_v11 }
 0x5b0   : > { %v711_v31 = vsel %vm244_vm3, %v709_v27, %v917_v24  ;;  %v710_v32 = vsel %vm244_vm3, %v708_v28, %v916_v25 }
 0x5b5   : > { %v920_v26 = vpop.permute.xlu0 %919 }
 0x5b6   : > { %v922_v29 = vunpack.i.h.bf16 %v920_v26  ;;  %v921_v30 = vunpack.i.l.bf16 %v920_v26 }
 0x5b8   : > { %v714_v33 = vsel %vm712_vm4, %v711_v31, %v922_v29  ;;  %v713_v34 = vsel %vm712_vm4, %v710_v32, %v921_v30 }
 0x5b9   : > { %v822_v35 = vpack.c.bf16 %v714_v33, %v714_v33  ;;  %v821_v36 = vpack.c.bf16 %v713_v34, %v713_v34 }
 0x5bb   : > { %725 = vst.msk [vmem:[%s170_s12 + $0x4] sm:$0xf] %vm723_vm5, %v822_v35  ;;  %724 = vst.msk [vmem:[%s170_s12] sm:$0xf] %vm723_vm5, %v821_v36 }
 0x5bc PF: > { %s19_s17 = sadd.s32 1, %s976_s17  }
 0x5bd   : > { %p16_p9 = scmp.ge.s32.totalorder %s19_s17, 4  }
 0x5bf   :  { %18 = sbr.rel (!%p16_p9) target bundleno = 16 (0x10), region = 61 }

// kernel: transformer_forward.23
= control target key start
LH: loop header
LB: loop body
LE: loop exit
PB: predicated region body
PF: predicated region fallthrough
CT: control target
= control target key end

     0   :  { %vm52_vm0 = vcmask 261120   ;;  %vm124_vm1 = vcmask 519168   ;;  %s211_s1 = inlined_call_operand.vmem [shape: bf16[32,64], index: 1, kind: input, shape index: {}]   ;;  %s212_s0 = inlined_call_operand.vmem [shape: bf16[32,32], index: 0, kind: input, shape index: {}]   ;;  %s213_s2 = inlined_call_operand.vmem [shape: f32[1,64], index: 2, kind: input, shape index: {}]   ;;  %s214_s3 = inlined_call_operand.vmem [shape: bf16[32,64], index: 3, kind: output, shape index: {}]  }
   0x1   :  { %v160_v0 = vld [vmem:[%s211_s1] sm:$0xff]   ;;  %v161_v1 = vld [vmem:[%s211_s1 + $0x8] sm:$0xff]  }
   0x2   :  { %152 = vmatprep.subr.bf16.mxu0 %v160_v0  ;;  %v162_v2 = vld [vmem:[%s212_s0] sm:$0xff]   ;;  %v163_v3 = vld [vmem:[%s212_s0 + $0x8] sm:$0xff]  }
   0x3   :  { %153 = vmatpush3.bf16.msra.mxu0 %v160_v0  ;;  %156 = vmatprep.mubr.msk.bf16.mxu0 %vm52_vm0, %v162_v2  ;;  %v133_v4 = vld [vmem:[%s213_s2] ss:$0 sm:$0xff] }
   0x4   :  { %154 = vmatprep.subr.bf16.mxu0 %v161_v1 }
   0x7   :  { %155 = vmatpush3.bf16.msra.mxu0 %v161_v1 }
   0xa   :  { %157 = vmatmul.mubr.msk.bf16.vlgmr.msra.gmra.mrb[0].mxu0 %vm52_vm0, %v163_v3 }
  0xdd   :  { %v158_v5 = vpop.f32.mrb[0].mxu0 }
  0xde   :  { %v102_v6 = vadd.f32 %v158_v5, %v133_v4  ;;  %v93_v7 = vpop.f32.mrb[1].mxu0 }
  0xdf   :  { %v94_v8 = vadd.f32 %v133_v4, %v93_v7  ;;  %v159_v9 = vpop.f32.mrb[2].mxu0 }
  0xe0   :  { %v146_v10 = vpack.c.bf16 %v102_v6, %v102_v6  ;;  %v105_v11 = vadd.f32 %v159_v9, %v133_v4  ;;  %v96_v12 = vpop.f32.mrb[3].mxu0 }
  0xe1   :  { %v144_v13 = vpack.c.bf16 %v94_v8, %v94_v8  ;;  %v97_v14 = vadd.f32 %v133_v4, %v96_v12 }
  0xe2   :  { %127 = vst.msk [vmem:[%s214_s3 + $0x8] sm:$0xf] %vm124_vm1, %v146_v10  ;;  %v147_v15 = vpack.c.bf16 %v105_v11, %v105_v11 }
  0xe3   :  { %125 = vst.msk [vmem:[%s214_s3] sm:$0xf] %vm124_vm1, %v144_v13  ;;  %v145_v16 = vpack.c.bf16 %v97_v14, %v97_v14 }
  0xe4   :  { %128 = vst.msk [vmem:[%s214_s3 + $0xc] sm:$0xf] %vm124_vm1, %v147_v15 }
  0xe5   :  { %126 = vst.msk [vmem:[%s214_s3 + $0x4] sm:$0xf] %vm124_vm1, %v145_v16 }

// kernel: transformer_forward.18
= control target key start
LH: loop header
LB: loop body
LE: loop exit
PB: predicated region body
PF: predicated region fallthrough
CT: control target
= control target key end

     0   :  { %vm56_vm0 = vcmask 261120   ;;  %vm157_vm1 = vcmask 523264   ;;  %s466_s1 = inlined_call_operand.vmem [shape: bf16[32,64], index: 1, kind: input, shape index: {}]   ;;  %s467_s0 = inlined_call_operand.vmem [shape: f32[32,32], index: 0, kind: input, shape index: {}]   ;;  %s468_s3 = inlined_call_operand.vmem [shape: bf16[64,32], index: 3, kind: input, shape index: {}]   ;;  %s469_s2 = inlined_call_operand.vmem [shape: f32[1,64], index: 2, kind: input, shape index: {}]   ;;  %s470_s4 = inlined_call_operand.vmem [shape: f32[1,32], index: 4, kind: input, shape index: {}]   ;;  %s471_s5 = inlined_call_operand.vmem [shape: f32[1,32], index: 5, kind: input, shape index: {}]   ;;  %s472_s6 = inlined_call_operand.vmem [shape: f32[1,32], index: 6, kind: input, shape index: {}]   ;;  %s473_s7 = inlined_call_operand.vmem [shape: f32[32,32], index: 7, kind: output, shape index: {}]  }
   0x1   :  { %v344_v0 = vld [vmem:[%s466_s1] sm:$0xff]   ;;  %v345_v1 = vld [vmem:[%s466_s1 + $0x8] sm:$0xff]   ;;  %v29_v4 = vld [vmem:[%s467_s0 + $0x10] sm:$0xff] }
   0x2   :  { %324 = vmatprep.subr.bf16.mxu0 %v344_v0  ;;  %v27_v2 = vld [vmem:[%s467_s0] sm:$0xff]  ;;  %v28_v3 = vld [vmem:[%s467_s0 + $0x8] sm:$0xff]  ;;  %v30_v6 = vld [vmem:[%s467_s0 + $0x18] sm:$0xff] }
   0x3   :  { %325 = vmatpush3.bf16.msra.mxu0 %v344_v0  ;;  %v31_v5 = vpack.c.bf16 %v28_v3, %v27_v2  ;;  %v346_v7 = vld [vmem:[%s468_s3] sm:$0xff]   ;;  %v347_v8 = vld [vmem:[%s468_s3 + $0x8] sm:$0xff]   ;;  %v32_v9 = vpack.c.bf16 %v30_v6, %v29_v4  ;;  %v348_v10 = vld [vmem:[%s468_s3 + $0x10] sm:$0xff]  }
   0x4   :  { %326 = vmatprep.subr.bf16.mxu0 %v345_v1  ;;  %332 = vmatprep.subr.bf16.mxu1 %v346_v7  ;;  %v349_v11 = vld [vmem:[%s468_s3 + $0x18] sm:$0xff]   ;;  %v300_v12 = vld [vmem:[%s469_s2] ss:$0 sm:$0xff] }
   0x5   :  { %328 = vmatprep.mubr.msk.bf16.mxu0 %vm56_vm0, %v31_v5  ;;  %333 = vmatpush3.bf16.msra.mxu1 %v346_v7  ;;  %v305_v27 = vld [vmem:[%s470_s4] ss:$0 sm:$0xff] }
   0x6   :  { %334 = vmatprep.subr.bf16.mxu1 %v347_v8 }
   0x7   :  { %327 = vmatpush3.bf16.msra.mxu0 %v345_v1 }
   0x9   :  { %335 = vmatpush3.bf16.msra.mxu1 %v347_v8 }
   0xa   :  { %329 = vmatmul.mubr.msk.bf16.vlgmr.msra.gmra.mrb[0].mxu0 %vm56_vm0, %v32_v9  ;;  %336 = vmatprep.subr.bf16.mxu1 %v348_v10 }
   0xd   :  { %337 = vmatpush3.bf16.msra.mxu1 %v348_v10 }
   0xe   :  { %338 = vmatprep.subr.bf16.mxu1 %v349_v11 }
  0x11   :  { %339 = vmatpush3.bf16.msra.mxu1 %v349_v11 }
  0xdd   :  { %v330_v13 = vpop.f32.mrb[0].mxu0 }
  0xde   :  { %v106_v14 = vadd.f32 %v330_v13, %v300_v12  ;;  %v97_v15 = vpop.f32.mrb[1].mxu0  ;;  %v312_v13 = vld [vmem:[%s471_s5] ss:$0 sm:$0xff] }
  0xdf   :  { %v98_v16 = vadd.f32 %v300_v12, %v97_v15  ;;  %v331_v17 = vpop.f32.mrb[2].mxu0  ;;  %v313_v15 = vld [vmem:[%s472_s6] ss:$0 sm:$0xff] }
  0xe0   :  { %v109_v18 = vadd.f32 %v331_v17, %v300_v12  ;;  %v100_v19 = vpop.f32.mrb[3].mxu0  ;;  %v114_v21 = vmax.f32 %v106_v14, 0.0 }
  0xe1   :  { %v101_v20 = vadd.f32 %v300_v12, %v100_v19  ;;  %v112_v23 = vmax.f32 %v98_v16, 0.0 }
  0xe2   :  { %v115_v22 = vmax.f32 %v109_v18, 0.0 }
  0xe3   :  { %v113_v24 = vmax.f32 %v101_v20, 0.0 }
  0xe4   :  { %v117_v25 = vpack.c.bf16 %v115_v22, %v114_v21 }
  0xe5   :  { %v116_v26 = vpack.c.bf16 %v113_v24, %v112_v23 }
  0xe7   :  { %340 = vmatprep.mubr.msk.bf16.mxu1 %vm157_vm1, %v116_v26 }
  0xe8   :  { %341 = vmatmul.mubr.msk.bf16.vlgmr.msra.gmra.mrb[0].mxu1 %vm157_vm1, %v117_v25 }
 0x1bb   :  { %v342_v28 = vpop.f32.mrb[0].mxu1 }
 0x1bc   :  { %v207_v29 = vadd.f32 %v342_v28, %v305_v27  ;;  %v198_v30 = vpop.f32.mrb[1].mxu1 }
 0x1bd   :  { %v199_v31 = vadd.f32 %v305_v27, %v198_v30  ;;  %v343_v32 = vpop.f32.mrb[2].mxu1 }
 0x1be   :  { %v210_v33 = vadd.f32 %v343_v32, %v305_v27  ;;  %v201_v34 = vpop.f32.mrb[3].mxu1  ;;  %v215_v35 = vadd.f32 %v207_v29, %v29_v4 }
 0x1bf   :  { %v202_v36 = vadd.f32 %v305_v27, %v201_v34  ;;  %v213_v37 = vadd.f32 %v199_v31, %v27_v2 }
 0x1c0   :  { %v223_v38 = vsel %vm56_vm0, %v215_v35, 0.0  ;;  %v216_v39 = vadd.f32 %v210_v33, %v30_v6 }
 0x1c1   :  { %224 = vadd.xlane.f32.xlu1 %v223_v38  ;;  %v217_v40 = vsel %vm56_vm0, %v213_v37, 0.0  ;;  %v214_v41 = vadd.f32 %v202_v36, %v28_v3 }
 0x1c2   :  { %218 = vadd.xlane.f32.xlu0 %v217_v40  ;;  %v226_v42 = vsel %vm56_vm0, %v216_v39, 0.0 }
 0x1c3   :  { %v220_v43 = vsel %vm56_vm0, %v214_v41, 0.0 }
 0x1c5   :  { %227 = vadd.xlane.f32.xlu1 %v226_v42 }
 0x1c6   :  { %221 = vadd.xlane.f32.xlu0 %v220_v43 }
 0x24e   :  { %v225_v44 = vpop.xlane.xlu1 %224 }
 0x24f   :  { %v232_v45 = vmul.f32 0.03125, %v225_v44  ;;  %v219_v46 = vpop.xlane.xlu0 %218 }
 0x250   :  { %v230_v47 = vmul.f32 0.03125, %v219_v46 }
 0x251   :  { %v236_v48 = vsub.f32 %v215_v35, %v232_v45 }
 0x252   :  { %v234_v49 = vsub.f32 %v213_v37, %v230_v47  ;;  %v228_v50 = vpop.xlane.xlu1 %227 }
 0x253   :  { %v233_v51 = vmul.f32 0.03125, %v228_v50  ;;  %v222_v52 = vpop.xlane.xlu0 %221  ;;  %v240_v58 = vmul.f32 %v236_v48, %v236_v48 }
 0x254   :  { %v231_v53 = vmul.f32 0.03125, %v222_v52  ;;  %v238_v54 = vmul.f32 %v234_v49, %v234_v49 }
 0x255   :  { %v237_v55 = vsub.f32 %v216_v39, %v233_v51  ;;  %v248_v60 = vsel %vm56_vm0, %v240_v58, 0.0 }
 0x256   :  { %v235_v56 = vsub.f32 %v214_v41, %v231_v53  ;;  %v242_v57 = vsel %vm56_vm0, %v238_v54, 0.0 }
 0x257   :  { %243 = vadd.xlane.f32.xlu0 %v242_v57  ;;  %v241_v62 = vmul.f32 %v237_v55, %v237_v55 }
 0x258   :  { %v239_v59 = vmul.f32 %v235_v56, %v235_v56 }
 0x259   :  { %v251_v63 = vsel %vm56_vm0, %v241_v62, 0.0 }
 0x25a   :  { %v245_v61 = vsel %vm56_vm0, %v239_v59, 0.0 }
 0x25b   :  { %249 = vadd.xlane.f32.xlu0 %v248_v60  ;;  %246 = vadd.xlane.f32.xlu1 %v245_v61 }
 0x25f   :  { %252 = vadd.xlane.f32.xlu1 %v251_v63 }
 0x2e4   :  { %v244_v0 = vpop.xlane.xlu0 %243 }
 0x2e5   :  { %v254_v1 = vmul.f32 0.03125, %v244_v0 }
 0x2e7   :  { %v258_v2 = vadd.f32 1e-05, %v254_v1 }
 0x2e8   :  { %v247_v3 = vpop.xlane.xlu1 %246  ;;  %v250_v4 = vpop.xlane.xlu0 %249 }
 0x2e9   :  { %350 = vrsqrt.f32 %v258_v2  ;;  %v255_v5 = vmul.f32 0.03125, %v247_v3  ;;  %v256_v6 = vmul.f32 0.03125, %v250_v4 }
 0x2eb   :  { %v259_v7 = vadd.f32 1e-05, %v255_v5  ;;  %v260_v8 = vadd.f32 1e-05, %v256_v6 }
 0x2ec   :  { %v253_v9 = vpop.xlane.xlu1 %252 }
 0x2ed   :  { %352 = vrsqrt.f32 %v259_v7  ;;  %v257_v10 = vmul.f32 0.03125, %v253_v9 }
 0x2ee   :  { %354 = vrsqrt.f32 %v260_v8 }
 0x2ef   :  { %v261_v11 = vadd.f32 1e-05, %v257_v10 }
 0x2f1   :  { %356 = vrsqrt.f32 %v261_v11 }
 0x2f3   :  { %v351_v12 = vpop.eup %350 }
 0x2f4   :  { %v266_v14 = vmul.f32 %v351_v12, %v234_v49 }
 0x2f6   :  { %v277_v16 = vmul.f32 %v312_v13, %v266_v14 }
 0x2f7   :  { %v353_v17 = vpop.eup %352 }
 0x2f8   :  { %v355_v18 = vpop.eup %354  ;;  %v288_v19 = vadd.f32 %v313_v15, %v277_v16  ;;  %v267_v20 = vmul.f32 %v353_v17, %v235_v56 }
 0x2f9   :  { %v268_v21 = vmul.f32 %v355_v18, %v236_v48 }
 0x2fa   :  { %292 = vst.msk [vmem:[%s473_s7] sm:$0xff] %vm56_vm0, %v288_v19  ;;  %v278_v22 = vmul.f32 %v312_v13, %v267_v20 }
 0x2fb   :  { %v357_v23 = vpop.eup %356  ;;  %v279_v24 = vmul.f32 %v312_v13, %v268_v21 }
 0x2fc   :  { %v289_v25 = vadd.f32 %v313_v15, %v278_v22  ;;  %v269_v26 = vmul.f32 %v357_v23, %v237_v55 }
 0x2fd   :  { %v290_v27 = vadd.f32 %v313_v15, %v279_v24 }
 0x2fe   :  { %293 = vst.msk [vmem:[%s473_s7 + $0x8] sm:$0xff] %vm56_vm0, %v289_v25  ;;  %v280_v28 = vmul.f32 %v312_v13, %v269_v26 }
 0x2ff   :  { %294 = vst.msk [vmem:[%s473_s7 + $0x10] sm:$0xff] %vm56_vm0, %v290_v27 }
 0x300   :  { %v291_v29 = vadd.f32 %v313_v15, %v280_v28 }
 0x302   :  { %295 = vst.msk [vmem:[%s473_s7 + $0x18] sm:$0xff] %vm56_vm0, %v291_v29 }

// kernel: transformer_forward.24
= control target key start
LH: loop header
LB: loop body
LE: loop exit
PB: predicated region body
PF: predicated region fallthrough
CT: control target
= control target key end

     0   :  { %s984_s0 = inlined_call_operand.vmem [shape: s32[2], index: 0, kind: input, shape index: {}]   ;;  %s985_s1 = inlined_call_operand.vmem [shape: bf16[2,8,32], index: 1, kind: input, shape index: {}]   ;;  %s986_s2 = inlined_call_operand.vmem [shape: bf16[2,16,64], index: 2, kind: input, shape index: {}]   ;;  %s987_s3 = inlined_call_operand.vmem [shape: bf16[2,8,32], index: 3, kind: output, shape index: {}]  }
   0x1   :  { %s8_s14 = sshll.u32 %s984_s0, 4  ;;  %s9_s14 = int_to_ptr.vmem [resolvable:$true] %s8_s14 }
   0x2   :  { %s827_s15 = scalar_lea.vmem %s9_s14, 16  ;;  %p832_p1 = scmp.lt.s32.totalorder %s9_s14, %s9_s14 }
   0x3   :  { %p828_p0 = scmp.ne.s32.totalorder %s9_s14, %s827_s15  ;;  %p833_p2 = scmp.lt.s32.totalorder %s827_s15, %s827_s15 }
   0x5   :  { %p834_p3 = por %p833_p2, %p832_p1 }
   0x7   :  { %p835_p4 = pnand %p834_p3, %p828_p0 }
   0x9   :  { %838 = shalt.err (!%p835_p4)  }
   0xa   :  { %s849_s16 = smov [#allocation3]  }
   0xb   :  { %11 = dma.vmem_to_smem %s9_s14, 16, %s849_s16, [#allocation2] }
   0xc   :  { %843 = dma.done.wait [#allocation2], 16 }
   0xd   :  { %844 = vsyncadd [#allocation2], 4294967280 }
   0xe   :  { %13 = sfence }
   0xf   :  { %s885_s17 = smov 0  }
  0x10 LB: > { %s703_s0 = sadd.s32 4294967295, %s847_s17   ;;  %p707_p5 = scmp.ge.s32.totalorder %s847_s17, 1  ;;  %s847_s17 = sphi %s885_s17, %s19_s17  }
  0x11   : > { %p128_p6 = scmp.lt.s32.totalorder %s847_s17, 3 }
  0x13   : > { %p129_p7 = pnand %p707_p5, %p128_p6 }
  0x14   : > { %p153_p8 = scmp.lt.s32.totalorder (!%p129_p7), %s703_s0, 1  ;;  %v850_v0 = vmov (!%p129_p7), 0.0   ;;  %vm851_vm0 = vmmov (!%p129_p7), 0   ;;  %vm182_vm1 = vcmask (!%p129_p7), 64512   ;;  %s168_s27 = sld [smem:[#allocation3 + %s703_s0]] (!%p129_p7)  ;;  %v173_v5 = vlaneseq (!%p129_p7) }
  0x15   : > { %132 = sbr.rel (%p129_p7) target bundleno = 1454 (0x5ae), region = 28  ;;  %741 = vmatprep.subr.bf16.mxu0 (!%p129_p7), %v850_v0  ;;  %743 = vmatprep.mubr.msk.bf16.mxu0 (!%p129_p7), %vm851_vm0, %v850_v0  ;;  %vm230_vm3 = vcmask (!%p129_p7), 130048   ;;  %s852_s28 = smov (!%p129_p7), 96   ;;  %vm633_vm4 = vcmask (!%p129_p7), 195584   ;;  %vm636_vm5 = vcmask (!%p129_p7), 257024  }
  0x16   : > { %747 = vmatprep.subr.bf16.mxu1 (!%p129_p7), %v850_v0  ;;  %749 = vmatprep.mubr.msk.bf16.mxu1 (!%p129_p7), %vm851_vm0, %v850_v0  ;;  %v174_v6 = vand.u32 (!%p129_p7), 127, %v173_v5  ;;  %s853_s29 = smov (!%p129_p7), 120   ;;  %s854_s30 = smov (!%p129_p7), 112  }
  0x17   : > { %s855_s4 = smov (!%p129_p7), 104   ;;  %s856_s5 = smov (!%p129_p7), 88  }
  0x18   : > { %s857_s6 = smov (!%p129_p7), 72   ;;  %s858_s7 = smov (!%p129_p7), 80  }
  0x19   : > { %s859_s8 = smov (!%p129_p7), 8   ;;  %s860_s9 = smov (!%p129_p7), 16  }
  0x1a   : > { %v175_v7 = vstv (!%p129_p7), %s168_s27  ;;  %s861_s10 = smov (!%p129_p7), 24  }
  0x1b   : > { %vm919_vm2 = vcmp.ge.s32.totalorder (!%p129_p7), %v174_v6, %v175_v7 }
  0x1c   : > { %s896_s18 = scalar_select %p153_p8, %s703_s0, 1 }
  0x1e   : > { %s724_s19 = sshll.u32 %s896_s18, 3  ;;  %s708_s20 = sshll.u32 %s896_s18, 2 }
  0x1f   : > { %s161_s23 = scalar_lea.vmem %s986_s2, %s724_s19  ;;  %s156_s26 = scalar_lea.vmem %s985_s1, %s708_s20 }
  0x20   : > { %v906_v1 = vld [vmem:[%s161_s23] sm:$0xff]   ;;  %s165_s13 = scalar_lea.vmem %s987_s3, %s708_s20 }
  0x21   : > { %v187_v2 = vsel %vm182_vm1, %v906_v1, 0  ;;  %v169_v3 = vld [vmem:[%s156_s26] sm:$0xf]  ;;  %243 = vrot.lane.b32.xlu1 %v906_v1, %s852_s28 }
  0x22   : > { %742 = vmatpush3.bf16.xpose.msra.mxu0 %v187_v2  ;;  %v170_v4 = vmul.bf16 1052065461, %v169_v3 }
  0x23   : > { %759 = vmatprep.subr.bf16.mxu0 %v850_v0 }
  0x24   : > { %v715_v15 = vcombine.low %v170_v4, %v170_v4 }
  0x25   : > { %294 = vrot.lane.b32.xlu1 %v906_v1, %s853_s29 }
  0x29   : > { %744 = vmatmul.mubr.msk.bf16.vlgmr.msra.gmra.mrb[0].mxu0 %vm182_vm1, %v170_v4  ;;  %403 = vrot.lane.b32.xlu1 %v906_v1, %s854_s30 }
  0x2a   : > { %761 = vmatprep.mubr.msk.bf16.mxu0 %vm851_vm0, %v850_v0 }
  0x2d   : > { %401 = vrot.lane.b32.xlu1 %v715_v15, %s854_s30 }
  0x31   : > { %512 = vrot.lane.b32.xlu1 %v906_v1, %s855_s4 }
  0x35   : > { %510 = vrot.lane.b32.xlu1 %v715_v15, %s855_s4 }
  0x93   : > { %v244_v21 = vpop.permute.xlu1 %243 }
  0x94   : > { %748 = vmatpush3.bf16.msra.mxu1 %v244_v21 }
  0x95   : > { %753 = vmatprep.subr.bf16.mxu1 %v850_v0 }
  0x97   : > { %v295_v24 = vpop.permute.xlu1 %294 }
  0x98   : > { %v300_v26 = vsel %vm182_vm1, %v295_v24, 0 }
  0x9b   : > { %v404_v28 = vpop.permute.xlu1 %403 }
  0x9c   : > { %v409_v31 = vsel %vm182_vm1, %v404_v28, 0 }
  0x9f   : > { %v402_v30 = vpop.permute.xlu1 %401 }
  0xa3   : > { %v513_v32 = vpop.permute.xlu1 %512 }
  0xa4   : > { %v518_v33 = vsel %vm182_vm1, %v513_v32, 0 }
  0xa7   : > { %v511_v34 = vpop.permute.xlu1 %510 }
  0xfc   : > { %v223_v9 = vpop.f32.mrb[0].mxu0 }
  0xfd   : > { %v229_v10 = vsel %vm919_vm2, -1e+09, %v223_v9  ;;  %v745_v11 = vpop.f32.mrb[1].mxu0 }
  0xfe   : > { %v226_v12 = vpop.f32.mrb[2].mxu0  ;;  %v231_v13 = vsel %vm230_vm3, %v229_v10, -inf }
  0xff   : > { %232 = vmax.xlane.f32.xlu0 %v231_v13  ;;  %v746_v14 = vpop.f32.mrb[3].mxu0 }
 0x18c   : > { %v233_v16 = vpop.xlane.xlu0 %232 }
 0x18d   : > { %v234_v17 = vsub.f32 %v229_v10, %v233_v16 }
 0x18f   : > { %v235_v18 = vmul.f32 1.442695, %v234_v17 }
 0x191   : > { %811 = vpow2.f32 %v235_v18 }
 0x19b   : > { %v812_v19 = vpop.eup %811 }
 0x19c   : > { %v237_v20 = vsel %vm230_vm3, %v812_v19, 0.0 }
 0x19d   : > { %238 = vadd.xlane.f32.xlu0 %v237_v20 }
 0x1b3   : > { %292 = vrot.lane.b32.xlu0 %v715_v15, %s853_s29 }
 0x22a   : > { %v239_v22 = vpop.xlane.xlu0 %238 }
 0x22b   : > { %813 = vrcp.f32 %v239_v22 }
 0x22e   : > { %v293_v29 = vpop.permute.xlu0 %292 }
 0x235   : > { %v814_v23 = vpop.eup %813 }
 0x236   : > { %v241_v25 = vmul.f32 %v814_v23, %v812_v19 }
 0x238   : > { %v242_v27 = vpack.c.bf16 %v241_v25, %v241_v25 }
 0x23a   : > { %750 = vmatmul.mubr.msk.bf16.vlgmr.msra.gmra.mrb[0].mxu1 %vm230_vm3, %v242_v27 }
 0x23b   : > { %754 = vmatpush3.bf16.xpose.msra.mxu1 %v300_v26  ;;  %755 = vmatprep.mubr.msk.bf16.mxu1 %vm851_vm0, %v850_v0 }
 0x23c   : > { %765 = vmatprep.subr.bf16.mxu1 %v850_v0 }
 0x242   : > { %756 = vmatmul.mubr.msk.bf16.vlgmr.msra.gmra.mrb[4].mxu1 %vm182_vm1, %v293_v29 }
 0x243   : > { %766 = vmatpush3.bf16.xpose.msra.mxu1 %v409_v31  ;;  %767 = vmatprep.mubr.msk.bf16.mxu1 %vm851_vm0, %v850_v0 }
 0x244   : > { %777 = vmatprep.subr.bf16.mxu1 %v850_v0 }
 0x24a   : > { %768 = vmatmul.mubr.msk.bf16.vlgmr.msra.gmra.mrb[8].mxu1 %vm182_vm1, %v402_v30 }
 0x24b   : > { %778 = vmatpush3.bf16.xpose.msra.mxu1 %v518_v33  ;;  %779 = vmatprep.mubr.msk.bf16.mxu1 %vm851_vm0, %v850_v0 }
 0x252   : > { %780 = vmatmul.mubr.msk.bf16.vlgmr.msra.gmra.mrb[12].mxu1 %vm182_vm1, %v511_v34 }
 0x30d   : > { %v947_v35 = vpop.f32.mrb[0].mxu1 }
 0x30e   : > { %v751_v36 = vpop.f32.mrb[1].mxu1 }
 0x30f   : > { %v286_v37 = vpop.f32.mrb[2].mxu1 }
 0x310   : > { %v752_v38 = vpop.f32.mrb[3].mxu1 }
 0x315   : > { %v336_v39 = vpop.f32.mrb[4].mxu1 }
 0x316   : > { %v342_v40 = vsel %vm919_vm2, -1e+09, %v336_v39  ;;  %v757_v41 = vpop.f32.mrb[5].mxu1 }
 0x317   : > { %v339_v42 = vpop.f32.mrb[6].mxu1  ;;  %v343_v43 = vsel %vm230_vm3, %v342_v40, -inf }
 0x318   : > { %344 = vmax.xlane.f32.xlu1 %v343_v43  ;;  %v758_v44 = vpop.f32.mrb[7].mxu1 }
 0x31d   : > { %v445_v45 = vpop.f32.mrb[8].mxu1 }
 0x31e   : > { %v451_v46 = vsel %vm919_vm2, -1e+09, %v445_v45  ;;  %v769_v47 = vpop.f32.mrb[9].mxu1 }
 0x31f   : > { %v448_v48 = vpop.f32.mrb[10].mxu1  ;;  %v452_v49 = vsel %vm230_vm3, %v451_v46, -inf }
 0x320   : > { %453 = vmax.xlane.f32.xlu0 %v452_v49  ;;  %v770_v50 = vpop.f32.mrb[11].mxu1 }
 0x325   : > { %v554_v51 = vpop.f32.mrb[12].mxu1 }
 0x326   : > { %v560_v52 = vsel %vm919_vm2, -1e+09, %v554_v51  ;;  %v781_v53 = vpop.f32.mrb[13].mxu1 }
 0x327   : > { %v557_v54 = vpop.f32.mrb[14].mxu1  ;;  %v561_v55 = vsel %vm230_vm3, %v560_v52, -inf }
 0x328   : > { %562 = vmax.xlane.f32.xlu1 %v561_v55  ;;  %v782_v56 = vpop.f32.mrb[15].mxu1 }
 0x339   : > { %355 = vrot.lane.b32.xlu1 %v906_v1, %s856_s5 }
 0x3a5   : > { %v345_v57 = vpop.xlane.xlu1 %344 }
 0x3a6   : > { %v346_v58 = vsub.f32 %v342_v40, %v345_v57 }
 0x3a8   : > { %v347_v59 = vmul.f32 1.442695, %v346_v58 }
 0x3aa   : > { %815 = vpow2.f32 %v347_v59 }
 0x3ad   : > { %v454_v60 = vpop.xlane.xlu0 %453 }
 0x3ae   : > { %v455_v61 = vsub.f32 %v451_v46, %v454_v60 }
 0x3b0   : > { %v456_v62 = vmul.f32 1.442695, %v455_v61 }
 0x3b2   : > { %817 = vpow2.f32 %v456_v62 }
 0x3b4   : > { %v816_v63 = vpop.eup %815 }
 0x3b5   : > { %v563_v2 = vpop.xlane.xlu1 %562  ;;  %v349_v3 = vsel %vm230_vm3, %v816_v63, 0.0 }
 0x3b6   : > { %v564_v4 = vsub.f32 %v560_v52, %v563_v2  ;;  %350 = vadd.xlane.f32.xlu0 %v349_v3 }
 0x3b8   : > { %v565_v5 = vmul.f32 1.442695, %v564_v4 }
 0x3b9   : > { %v356_v6 = vpop.permute.xlu1 %355 }
 0x3ba   : > { %819 = vpow2.f32 %v565_v5  ;;  %760 = vmatpush3.bf16.msra.mxu0 %v356_v6 }
 0x3bb   : > { %771 = vmatprep.subr.bf16.mxu0 %v850_v0 }
 0x3bc   : > { %v818_v7 = vpop.eup %817 }
 0x3bd   : > { %v458_v8 = vsel %vm230_vm3, %v818_v7, 0.0 }
 0x3be   : > { %459 = vadd.xlane.f32.xlu1 %v458_v8 }
 0x3c4   : > { %v820_v9 = vpop.eup %819 }
 0x3c5   : > { %v567_v10 = vsel %vm230_vm3, %v820_v9, 0.0 }
 0x3c6   : > { %568 = vadd.xlane.f32.xlu0 %v567_v10 }
 0x3cf   : > { %573 = vrot.lane.b32.xlu1 %v906_v1, %s857_s6 }
 0x3dc   : > { %464 = vrot.lane.b32.xlu0 %v906_v1, %s858_s7 }
 0x443   : > { %v351_v11 = vpop.xlane.xlu0 %350 }
 0x444   : > { %821 = vrcp.f32 %v351_v11 }
 0x44b   : > { %v460_v12 = vpop.xlane.xlu1 %459 }
 0x44c   : > { %823 = vrcp.f32 %v460_v12 }
 0x44e   : > { %v822_v13 = vpop.eup %821 }
 0x44f   : > { %v353_v14 = vmul.f32 %v822_v13, %v816_v63  ;;  %v574_v1 = vpop.permute.xlu1 %573 }
 0x451   : > { %v354_v15 = vpack.c.bf16 %v353_v14, %v353_v14 }
 0x453   : > { %v569_v16 = vpop.xlane.xlu0 %568  ;;  %762 = vmatmul.mubr.msk.bf16.vlgmr.msra.gmra.mrb[4].mxu0 %vm230_vm3, %v354_v15 }
 0x454   : > { %825 = vrcp.f32 %v569_v16  ;;  %773 = vmatprep.mubr.msk.bf16.mxu0 %vm851_vm0, %v850_v0 }
 0x456   : > { %v824_v17 = vpop.eup %823 }
 0x457   : > { %v462_v18 = vmul.f32 %v824_v17, %v818_v7  ;;  %v465_v19 = vpop.permute.xlu0 %464 }
 0x458   : > { %772 = vmatpush3.bf16.msra.mxu0 %v465_v19 }
 0x459   : > { %v463_v20 = vpack.c.bf16 %v462_v18, %v462_v18  ;;  %783 = vmatprep.subr.bf16.mxu0 %v850_v0 }
 0x45b   : > { %774 = vmatmul.mubr.msk.bf16.vlgmr.msra.gmra.mrb[8].mxu0 %vm230_vm3, %v463_v20 }
 0x45c   : > { %784 = vmatpush3.bf16.msra.mxu0 %v574_v1  ;;  %785 = vmatprep.mubr.msk.bf16.mxu0 %vm851_vm0, %v850_v0 }
 0x45e   : > { %v826_v21 = vpop.eup %825 }
 0x45f   : > { %v571_v22 = vmul.f32 %v826_v21, %v820_v9 }
 0x461   : > { %v572_v23 = vpack.c.bf16 %v571_v22, %v571_v22 }
 0x463   : > { %786 = vmatmul.mubr.msk.bf16.vlgmr.msra.gmra.mrb[12].mxu0 %vm230_vm3, %v572_v23 }
 0x526   : > { %v395_v24 = vpop.f32.mrb[4].mxu0 }
 0x527   : > { %620 = vrot.lane.b32.xlu1 %v395_v24, %s859_s8  ;;  %v763_v25 = vpop.f32.mrb[5].mxu0 }
 0x528   : > { %v398_v26 = vpop.f32.mrb[6].mxu0 }
 0x529   : > { %v764_v27 = vpop.f32.mrb[7].mxu0 }
 0x52e   : > { %v504_v28 = vpop.f32.mrb[8].mxu0 }
 0x52f   : > { %624 = vrot.lane.b32.xlu0 %v504_v28, %s860_s9  ;;  %v775_v29 = vpop.f32.mrb[9].mxu0 }
 0x530   : > { %v507_v30 = vpop.f32.mrb[10].mxu0 }
 0x531   : > { %v776_v31 = vpop.f32.mrb[11].mxu0 }
 0x536   : > { %v613_v32 = vpop.f32.mrb[12].mxu0 }
 0x537   : > { %628 = vrot.lane.b32.xlu1 %v613_v32, %s861_s10  ;;  %v787_v0 = vpop.f32.mrb[13].mxu0 }
 0x538   : > { %v616_v33 = vpop.f32.mrb[14].mxu0 }
 0x539   : > { %v788_v34 = vpop.f32.mrb[15].mxu0 }
 0x599   : > { %v621_v36 = vpop.permute.xlu1 %620 }
 0x59a   : > { %v631_v38 = vsel %vm182_vm1, %v947_v35, %v621_v36 }
 0x5a1   : > { %v625_v37 = vpop.permute.xlu0 %624 }
 0x5a2   : > { %v632_v39 = vsel %vm230_vm3, %v631_v38, %v625_v37 }
 0x5a9   : > { %v629_v40 = vpop.permute.xlu1 %628 }
 0x5aa   : > { %v634_v41 = vsel %vm633_vm4, %v632_v39, %v629_v40 }
 0x5ab   : > { %v635_v42 = vpack.c.bf16 %v634_v41, %v634_v41 }
 0x5ad   : > { %637 = vst.msk [vmem:[%s165_s13] sm:$0xf] %vm636_vm5, %v635_v42 }
 0x5ae PF: > { %s19_s17 = sadd.s32 1, %s847_s17  }
 0x5af   : > { %p16_p9 = scmp.ge.s32.totalorder %s19_s17, 4  }
 0x5b1   :  { %18 = sbr.rel (!%p16_p9) target bundleno = 16 (0x10), region = 61 }

// kernel: transformer_forward.26
= control target key start
LH: loop header
LB: loop body
LE: loop exit
PB: predicated region body
PF: predicated region fallthrough
CT: control target
= control target key end

     0   :  { %v290_v0 = vmov 0.0   ;;  %vm291_vm0 = vmmov 0   ;;  %vm53_vm1 = vcmask 261120   ;;  %vm140_vm2 = vcmask 523264   ;;  %s381_s1 = inlined_call_operand.vmem [shape: bf16[32,64], index: 1, kind: input, shape index: {}]   ;;  %s382_s0 = inlined_call_operand.vmem [shape: f32[16,32], index: 0, kind: input, shape index: {}]   ;;  %s383_s3 = inlined_call_operand.vmem [shape: bf16[64,32], index: 3, kind: input, shape index: {}]   ;;  %s384_s2 = inlined_call_operand.vmem [shape: f32[1,64], index: 2, kind: input, shape index: {}]   ;;  %s385_s4 = inlined_call_operand.vmem [shape: f32[1,32], index: 4, kind: input, shape index: {}]   ;;  %s386_s5 = inlined_call_operand.vmem [shape: f32[1,32], index: 5, kind: input, shape index: {}]   ;;  %s387_s6 = inlined_call_operand.vmem [shape: f32[1,32], index: 6, kind: input, shape index: {}]   ;;  %s388_s7 = inlined_call_operand.vmem [shape: f32[16,32], index: 7, kind: output, shape index: {}]  }
   0x1   :  { %258 = vmatprep.subr.bf16.mxu0 %v290_v0  ;;  %v280_v1 = vld [vmem:[%s381_s1] sm:$0xff]   ;;  %262 = vmatprep.mubr.msk.bf16.mxu0 %vm291_vm0, %v290_v0  ;;  %v281_v2 = vld [vmem:[%s381_s1 + $0x8] sm:$0xff]   ;;  %v284_v8 = vld [vmem:[%s383_s3 + $0x10] sm:$0xff]  }
   0x2   :  { %266 = vmatprep.subr.bf16.mxu1 %v290_v0  ;;  %274 = vmatprep.mubr.msk.bf16.mxu1 %vm291_vm0, %v290_v0  ;;  %v27_v3 = vld [vmem:[%s382_s0] sm:$0xff]  ;;  %v28_v4 = vld [vmem:[%s382_s0 + $0x8] sm:$0xff]  ;;  %v285_v9 = vld [vmem:[%s383_s3 + $0x18] sm:$0xff]  }
   0x3   :  { %259 = vmatpush3.bf16.msra.mxu0 %v280_v1  ;;  %v282_v5 = vld [vmem:[%s383_s3] sm:$0xff]   ;;  %v283_v6 = vld [vmem:[%s383_s3 + $0x8] sm:$0xff]   ;;  %v29_v7 = vpack.c.bf16 %v28_v4, %v27_v3 }
   0x4   :  { %260 = vmatprep.subr.bf16.mxu0 %v290_v0  ;;  %267 = vmatpush3.bf16.msra.mxu1 %v282_v5  ;;  %v238_v10 = vld [vmem:[%s384_s2] ss:$0 sm:$0xff] }
   0x5   :  { %268 = vmatprep.subr.bf16.mxu1 %v290_v0  ;;  %v242_v20 = vld [vmem:[%s385_s4] ss:$0 sm:$0xff] }
   0x6   :  { %v248_v48 = vld [vmem:[%s386_s5] ss:$0 sm:$0xff] }
   0x7   :  { %261 = vmatpush3.bf16.msra.mxu0 %v281_v2  ;;  %v249_v50 = vld [vmem:[%s387_s6] ss:$0 sm:$0xff] }
   0x8   :  { %269 = vmatpush3.bf16.msra.mxu1 %v283_v6 }
   0x9   :  { %270 = vmatprep.subr.bf16.mxu1 %v290_v0 }
   0xa   :  { %263 = vmatmul.mubr.msk.bf16.vlgmr.msra.gmra.mrb[0].mxu0 %vm53_vm1, %v29_v7 }
   0xc   :  { %271 = vmatpush3.bf16.msra.mxu1 %v284_v8 }
   0xd   :  { %272 = vmatprep.subr.bf16.mxu1 %v290_v0 }
  0x10   :  { %273 = vmatpush3.bf16.msra.mxu1 %v285_v9 }
  0xdd   :  { %v91_v11 = vpop.f32.mrb[0].mxu0 }
  0xde   :  { %v92_v12 = vadd.f32 %v238_v10, %v91_v11  ;;  %v264_v13 = vpop.f32.mrb[1].mxu0 }
  0xdf   :  { %v94_v14 = vpop.f32.mrb[2].mxu0 }
  0xe0   :  { %v95_v15 = vadd.f32 %v238_v10, %v94_v14  ;;  %v265_v16 = vpop.f32.mrb[3].mxu0  ;;  %v98_v17 = vmax.f32 %v92_v12, 0.0 }
  0xe2   :  { %v99_v18 = vmax.f32 %v95_v15, 0.0 }
  0xe4   :  { %v100_v19 = vpack.c.bf16 %v99_v18, %v98_v17 }
  0xe6   :  { %275 = vmatmul.mubr.msk.bf16.vlgmr.msra.gmra.mrb[0].mxu1 %vm140_vm2, %v100_v19 }
 0x1b9   :  { %v178_v21 = vpop.f32.mrb[0].mxu1 }
 0x1ba   :  { %v179_v22 = vadd.f32 %v242_v20, %v178_v21  ;;  %v276_v23 = vpop.f32.mrb[1].mxu1 }
 0x1bb   :  { %v181_v24 = vpop.f32.mrb[2].mxu1 }
 0x1bc   :  { %v182_v25 = vadd.f32 %v242_v20, %v181_v24  ;;  %v277_v26 = vpop.f32.mrb[3].mxu1  ;;  %v185_v27 = vadd.f32 %v179_v22, %v27_v3 }
 0x1be   :  { %v187_v28 = vsel %vm53_vm1, %v185_v27, 0.0  ;;  %v186_v29 = vadd.f32 %v182_v25, %v28_v4 }
 0x1bf   :  { %188 = vadd.xlane.f32.xlu0 %v187_v28 }
 0x1c0   :  { %v190_v30 = vsel %vm53_vm1, %v186_v29, 0.0 }
 0x1c3   :  { %191 = vadd.xlane.f32.xlu0 %v190_v30 }
 0x24c   :  { %v189_v31 = vpop.xlane.xlu0 %188 }
 0x24d   :  { %v194_v32 = vmul.f32 0.03125, %v189_v31 }
 0x24f   :  { %v196_v33 = vsub.f32 %v185_v27, %v194_v32 }
 0x250   :  { %v192_v34 = vpop.xlane.xlu0 %191 }
 0x251   :  { %v195_v35 = vmul.f32 0.03125, %v192_v34  ;;  %v198_v36 = vmul.f32 %v196_v33, %v196_v33 }
 0x253   :  { %v197_v37 = vsub.f32 %v186_v29, %v195_v35  ;;  %v200_v38 = vsel %vm53_vm1, %v198_v36, 0.0 }
 0x254   :  { %201 = vadd.xlane.f32.xlu1 %v200_v38 }
 0x255   :  { %v199_v39 = vmul.f32 %v197_v37, %v197_v37 }
 0x257   :  { %v203_v40 = vsel %vm53_vm1, %v199_v39, 0.0 }
 0x258   :  { %204 = vadd.xlane.f32.xlu1 %v203_v40 }
 0x2e1   :  { %v202_v41 = vpop.xlane.xlu1 %201 }
 0x2e2   :  { %v206_v42 = vmul.f32 0.03125, %v202_v41 }
 0x2e4   :  { %v208_v43 = vadd.f32 1e-05, %v206_v42 }
 0x2e5   :  { %v205_v44 = vpop.xlane.xlu1 %204 }
 0x2e6   :  { %286 = vrsqrt.f32 %v208_v43  ;;  %v207_v45 = vmul.f32 0.03125, %v205_v44 }
 0x2e8   :  { %v209_v46 = vadd.f32 1e-05, %v207_v45 }
 0x2ea   :  { %288 = vrsqrt.f32 %v209_v46 }
 0x2f0   :  { %v287_v47 = vpop.eup %286 }
 0x2f1   :  { %v212_v49 = vmul.f32 %v287_v47, %v196_v33 }
 0x2f3   :  { %v221_v51 = vmul.f32 %v248_v48, %v212_v49 }
 0x2f4   :  { %v289_v52 = vpop.eup %288 }
 0x2f5   :  { %v230_v53 = vadd.f32 %v249_v50, %v221_v51  ;;  %v213_v54 = vmul.f32 %v289_v52, %v197_v37 }
 0x2f7   :  { %232 = vst.msk [vmem:[%s388_s7] sm:$0xff] %vm53_vm1, %v230_v53  ;;  %v222_v55 = vmul.f32 %v248_v48, %v213_v54 }
 0x2f9   :  { %v231_v56 = vadd.f32 %v249_v50, %v222_v55 }
 0x2fb   :  { %233 = vst.msk [vmem:[%s388_s7 + $0x8] sm:$0xff] %vm53_vm1, %v231_v56 }

// kernel: transformer_forward.27
= control target key start
LH: loop header
LB: loop body
LE: loop exit
PB: predicated region body
PF: predicated region fallthrough
CT: control target
= control target key end

     0   :  { %v158_v1 = vmov 0.0   ;;  %vm159_vm0 = vmmov 0   ;;  %s207_s0 = inlined_call_operand.vmem [shape: bf16[16,32], index: 0, kind: input, shape index: {}]   ;;  %s208_s1 = inlined_call_operand.vmem [shape: bf16[32,16], index: 1, kind: input, shape index: {}]   ;;  %s209_s2 = inlined_call_operand.vmem [shape: f32[1,16], index: 2, kind: input, shape index: {}]   ;;  %s210_s3 = inlined_call_operand.hbm [shape: f32[16,16], index: 3, kind: output, shape index: {}]  }
   0x1   :  { %v131_v0 = vld [vmem:[%s208_s1] sm:$0xff]   ;;  %118 = vmatprep.subr.bf16.mxu0 %v158_v1  ;;  %v132_v2 = vld [vmem:[%s208_s1 + $0x8] sm:$0xff]   ;;  %122 = vmatprep.mubr.msk.bf16.mxu0 %vm159_vm0, %v158_v1 }
   0x2   :  { %119 = vmatpush3.bf16.msra.mxu0 %v131_v0 }
   0x3   :  { %120 = vmatprep.subr.bf16.mxu0 %v158_v1 }
   0x4   :  { %8 = vsyncpa [#allocation3], 0  ;;  %v133_v3 = vld [vmem:[%s207_s0] sm:$0xff]   ;;  %vm46_vm1 = vcmask 261120   ;;  %s160_s20 = smov [#allocation2]   ;;  %vm91_vm2 = vcmask 130048  }
   0x5   :  { %v110_v4 = vld [vmem:[%s209_s2] ss:$0 sm:$0xff]  ;;  %s99_s21 = sshll.u32 %s160_s20, 4  ;;  %s100_s21 = int_to_ptr.vmem [resolvable:$true] %s99_s21 }
   0x6   :  { %121 = vmatpush3.bf16.msra.mxu0 %v132_v2  ;;  %s134_s0 = scalar_lea.vmem %s100_s21, 256  ;;  %p139_p1 = scmp.lt.s32.totalorder %s100_s21, %s100_s21 }
   0x7   :  { %p135_p0 = scmp.ne.s32.totalorder %s100_s21, %s134_s0  ;;  %p140_p2 = scmp.lt.s32.totalorder %s134_s0, %s134_s0 }
   0x9   :  { %123 = vmatmul.mubr.msk.bf16.vlgmr.msra.gmra.mrb[0].mxu0 %vm46_vm1, %v133_v3  ;;  %p141_p3 = por %p140_p2, %p139_p1 }
   0xb   :  { %p142_p4 = pnand %p141_p3, %p135_p0 }
  0xdc   :  { %v84_v5 = vpop.f32.mrb[0].mxu0 }
  0xdd   :  { %v85_v6 = vadd.f32 %v110_v4, %v84_v5  ;;  %v124_v7 = vpop.f32.mrb[1].mxu0 }
  0xde   :  { %v87_v8 = vpop.f32.mrb[2].mxu0 }
  0xdf   :  { %92 = vst.msk [vmem:[#allocation2] sm:$0xff] %vm91_vm2, %v85_v6  ;;  %v88_v9 = vadd.f32 %v110_v4, %v87_v8  ;;  %v125_v10 = vpop.f32.mrb[3].mxu0 }
  0xe1   :  { %93 = vst.msk [vmem:[#allocation2 + $0x8] sm:$0xff] %vm91_vm2, %v88_v9 }
  0xe2   :  { %145 = shalt.err (!%p142_p4)
}
  0xe3   :  { %s146_s22 = scalar_lea.hbm %s210_s3, 256 }
  0xe4   :  { %p147_p5 = scmp.ne.s32.totalorder %s210_s3, %s146_s22  ;;  %p150_p6 = scmp.lt.u32.totalorder %s146_s22, %s210_s3 }
  0xe6   :  { %p152_p7 = pnand %p150_p6, %p147_p5 }
  0xe8   :  { %155 = shalt.err (!%p152_p7)
}
  0xe9   :  { %s161_s27 = smov 128   ;;  %s162_s28 = smov 8  }
  0xea   :  { %105 = dma.vmem_to_hbm [thread:$0]  %s100_s21, 256, %s210_s3, [#allocation3], %s161_s27, %s161_s27, %s162_s28  }
  0xeb   :  { %156 = dma.done.wait [#allocation3], 256  }
  0xec   :  { %157 = vsyncadd [#allocation3], 4294967040 }
  0xed   :  { %109 = vsyncpa [#allocation3], 1 }

</bundles_post_ra>
